<compile_context>
chip_gen: v7x
topology: tpu7x:2x2x1
jax: 0.10.0
libtpu: 0.0.40
codegen_flags: <defaults>
</compile_context>

<pallas_src>
import functools

import jax
import jax.numpy as jnp
from jax.experimental import pallas as pl
from jax.experimental.pallas import tpu as pltpu

EPS = 1e-5


# --------------------------------------------------------------------------
# Fused kernel: encoder + siamese classifier per batch tile, BatchNorm +
# log_softmax finalized on the last grid step over the VMEM-resident logits.
# --------------------------------------------------------------------------
def siamese_dan_kernel(d_ref, q_ref, w1_ref, b1_ref, w2a_ref, w2b_ref,
                       b2_ref, gamma_ref, beta_ref, out_ref,
                       *, valid_rows, valid_cols):
    i = pl.program_id(0)
    tb = d_ref.shape[0]

    # Shared DAN encoder: two MXU pushes against the resident w1 (bf16
    # operands, f32 accumulation), then bias + ReLU on the VPU in f32.
    hd = jnp.dot(d_ref[...], w1_ref[...], preferred_element_type=jnp.float32)
    hq = jnp.dot(q_ref[...], w1_ref[...], preferred_element_type=jnp.float32)
    hd = jnp.maximum(hd + b1_ref[...], 0.0)
    hq = jnp.maximum(hq + b1_ref[...], 0.0)

    # Siamese combination; cat(h1, h2) @ W2 == h1 @ W2[:H] + h2 @ W2[H:]
    # as two accumulating dots (no lane-axis concat / relayout).
    h1 = (hd * hq).astype(jnp.bfloat16)
    h2 = (hd + hq).astype(jnp.bfloat16)
    logits = (jnp.dot(h1, w2a_ref[...], preferred_element_type=jnp.float32)
              + jnp.dot(h2, w2b_ref[...], preferred_element_type=jnp.float32)
              + b2_ref[...])

    row0 = pl.multiple_of(i * tb, tb)
    out_ref[pl.ds(row0, tb), :] = logits          # resident (Bp, Cp) block

    # Finalize on the last grid step: BatchNorm1d (training-mode batch stats,
    # biased variance) + log_softmax, in place on the resident logits block.
    @pl.when(i == pl.num_programs(0) - 1)
    def _():
        x = out_ref[...]                                        # (Bp, Cp) f32
        rows = jax.lax.broadcasted_iota(jnp.int32, x.shape, 0)
        row_mask = rows < valid_rows                            # drop pad rows
        inv_n = 1.0 / valid_rows
        mu = jnp.sum(jnp.where(row_mask, x, 0.0), axis=0, keepdims=True) * inv_n
        var = jnp.sum(jnp.where(row_mask, (x - mu) ** 2, 0.0),
                      axis=0, keepdims=True) * inv_n            # biased var
        scale = gamma_ref[...] * jax.lax.rsqrt(var + EPS)       # EUP rsqrt
        y = (x - mu) * scale + beta_ref[...]

        cols = jax.lax.broadcasted_iota(jnp.int32, x.shape, 1)
        y = jnp.where(cols < valid_cols, y, -jnp.inf)           # drop pad lanes
        m = jnp.max(y, axis=1, keepdims=True)
        z = y - m
        lse = jnp.log(jnp.sum(jnp.exp(z), axis=1, keepdims=True))
        out_ref[...] = z - lse


# --------------------------------------------------------------------------
# Parameters
# --------------------------------------------------------------------------
def init_params(key, vocab_size, embedding_dim, hidden_dim, num_classes):
    k_emb, k_w1, k_w2 = jax.random.split(key, 3)
    emb = jax.random.normal(k_emb, (vocab_size, embedding_dim), jnp.float32) * 0.1
    w1 = jax.random.normal(k_w1, (embedding_dim, hidden_dim), jnp.float32) * 0.1
    b1 = jnp.zeros((1, hidden_dim), jnp.float32)
    w2 = jax.random.normal(k_w2, (2 * hidden_dim, num_classes), jnp.float32) * 0.1
    b2 = jnp.zeros((1, num_classes), jnp.float32)
    gamma = jnp.ones((1, num_classes), jnp.float32)   # BatchNorm weight
    beta = jnp.zeros((1, num_classes), jnp.float32)   # BatchNorm bias
    return {"embedding": emb, "w1": w1, "b1": b1, "w2": w2, "b2": b2,
            "gamma": gamma, "beta": beta}


def _round_up(x, m):
    return (x + m - 1) // m * m


# --------------------------------------------------------------------------
# Forward wrapper
# --------------------------------------------------------------------------
def siamese_dan_forward(d_tokens, q_tokens, params, *, batch_tile=256):
    # batch_tile=256 fills the 2x256 MXU height on v6e/v7x; use 128 on v5e.
    emb = params["embedding"]

    # Pre-reduce: gather + sequence mean fused by XLA; cast to bf16 here so
    # the kernel streams half the bytes.
    d_avg = jnp.mean(jnp.take(emb, d_tokens, axis=0), axis=1).astype(jnp.bfloat16)
    q_avg = jnp.mean(jnp.take(emb, q_tokens, axis=0), axis=1).astype(jnp.bfloat16)

    B, E = d_avg.shape
    H = params["w1"].shape[1]
    C = params["w2"].shape[-1]
    LANE = 128
    Cp = _round_up(C, LANE)                        # lane-dense logits

    tb = min(batch_tile, _round_up(B, 16))         # multiple of 16 (bf16 tiles)
    n_tiles = pl.cdiv(B, tb)
    Bp = n_tiles * tb
    if Bp != B:
        pad = Bp - B
        d_avg = jnp.pad(d_avg, ((0, pad), (0, 0)))
        q_avg = jnp.pad(q_avg, ((0, pad), (0, 0)))

    # MXU operands in bf16; classifier weight pre-split and lane-padded.
    w1 = params["w1"].astype(jnp.bfloat16)                                # (E, H)
    w2a = jnp.pad(params["w2"][:H], ((0, 0), (0, Cp - C))).astype(jnp.bfloat16)
    w2b = jnp.pad(params["w2"][H:], ((0, 0), (0, Cp - C))).astype(jnp.bfloat16)
    b1 = params["b1"]
    b2 = jnp.pad(params["b2"], ((0, 0), (0, Cp - C)))
    gamma = jnp.pad(params["gamma"], ((0, 0), (0, Cp - C)), constant_values=1.0)
    beta = jnp.pad(params["beta"], ((0, 0), (0, Cp - C)))

    kernel = functools.partial(siamese_dan_kernel, valid_rows=B, valid_cols=C)

    flops = 2 * (2 * Bp * E * H) + 2 * (2 * Bp * H * Cp)
    bytes_accessed = (2 * Bp * E * 2                                  # d/q bf16
                      + (w1.size + w2a.size + w2b.size) * 2           # weights
                      + (b1.size + b2.size + gamma.size + beta.size) * 4
                      + Bp * Cp * 4)                                  # logits out
    cost = pl.CostEstimate(flops=int(flops), transcendentals=int(Bp * Cp),
                           bytes_accessed=int(bytes_accessed))

    resident = lambda i: (0, 0)
    out = pl.pallas_call(
        kernel,
        out_shape=jax.ShapeDtypeStruct((Bp, Cp), jnp.float32),
        grid_spec=pltpu.PrefetchScalarGridSpec(
            num_scalar_prefetch=0,
            grid=(n_tiles,),
            in_specs=[
                pl.BlockSpec((tb, E), lambda i: (i, 0)),   # d tile (streamed)
                pl.BlockSpec((tb, E), lambda i: (i, 0)),   # q tile (streamed)
                pl.BlockSpec((E, H), resident),            # w1 (resident)
                pl.BlockSpec((1, H), resident),            # b1
                pl.BlockSpec((H, Cp), resident),           # w2[:H]
                pl.BlockSpec((H, Cp), resident),           # w2[H:]
                pl.BlockSpec((1, Cp), resident),           # b2
                pl.BlockSpec((1, Cp), resident),           # gamma
                pl.BlockSpec((1, Cp), resident),           # beta
            ],
            # Constant index_map -> whole (Bp, Cp) logits block stays in VMEM
            # across the grid; the last step finalizes it in place.
            out_specs=pl.BlockSpec((Bp, Cp), resident),
        ),
        compiler_params=pltpu.CompilerParams(
            dimension_semantics=("arbitrary",),   # resident-output finalize
            vmem_limit_bytes=32 * 1024 * 1024,    # fits v5e/v6e/v7x scoped VMEM
        ),
        cost_estimate=cost,
    )(d_avg, q_avg, w1, b1, w2a, w2b, b2, gamma, beta)

    return out[:B, :C]   # drop padded rows / lanes


# --------------------------------------------------------------------------
# Pure-JAX f32 reference (PyTorch semantics) for a correctness check.
# --------------------------------------------------------------------------
def siamese_dan_reference(d_tokens, q_tokens, params):
    emb = params["embedding"]

    def dan(tokens):
        x = jnp.mean(jnp.take(emb, tokens, axis=0), axis=1)
        return jnp.maximum(x @ params["w1"] + params["b1"], 0.0)

    d = dan(d_tokens)
    q = dan(q_tokens)
    x = jnp.concatenate([d * q, d + q], axis=1) @ params["w2"] + params["b2"]
    mu = jnp.mean(x, axis=0, keepdims=True)
    var = jnp.mean((x - mu) ** 2, axis=0, keepdims=True)
    y = (x - mu) * jax.lax.rsqrt(var + EPS) * params["gamma"] + params["beta"]
    return jax.nn.log_softmax(y, axis=1)


if __name__ == "__main__":
    VOCAB, EMB, HID, CLS = 50, 32, 32, 2
    B, S = 384, 8   # 2 batch tiles of 256 (128 padded rows): exercises the
                    # pipelined grid, the resident-output finalize, and the
                    # padded-row masking of the batch statistics.

    key = jax.random.PRNGKey(0)
    k_params, k_d, k_q = jax.random.split(key, 3)

    params = init_params(k_params, VOCAB, EMB, HID, CLS)
    d_tokens = jax.random.randint(k_d, (B, S), 0, VOCAB, dtype=jnp.int32)
    q_tokens = jax.random.randint(k_q, (B, S), 0, VOCAB, dtype=jnp.int32)

    out = jax.block_until_ready(siamese_dan_forward(d_tokens, q_tokens, params))

    assert out.shape == (B, CLS)
    # log_softmax rows must exponentiate-and-sum to ~1.
    assert jnp.allclose(jnp.sum(jnp.exp(out), axis=1), 1.0, atol=1e-3)
    # bf16 MXU operands vs the f32 reference -> loose, documented tolerance.
    ref = siamese_dan_reference(d_tokens, q_tokens, params)
    max_err = float(jnp.max(jnp.abs(out - ref)))
    assert max_err < 0.15, max_err
    print("KERNEL_OK")
</pallas_src>

<mosaic_0001>
module attributes {stable_mosaic.version = 11 : i64} {
  func.func @siamese_dan_kernel(%arg0: i32, %arg1: memref<256x32xbf16, #tpu.memory_space<vmem>>, %arg2: memref<256x32xbf16, #tpu.memory_space<vmem>>, %arg3: memref<32x32xbf16, #tpu.memory_space<vmem>>, %arg4: memref<1x32xf32, #tpu.memory_space<vmem>>, %arg5: memref<32x128xbf16, #tpu.memory_space<vmem>>, %arg6: memref<32x128xbf16, #tpu.memory_space<vmem>>, %arg7: memref<1x128xf32, #tpu.memory_space<vmem>>, %arg8: memref<1x128xf32, #tpu.memory_space<vmem>>, %arg9: memref<1x128xf32, #tpu.memory_space<vmem>>, %arg10: memref<512x128xf32, #tpu.memory_space<vmem>>) attributes {dimension_semantics = [#tpu.dimension_semantics<arbitrary>], iteration_bounds = array<i64: 2>, scalar_prefetch = 0 : i64, scratch_operands = 0 : i64, tpu.core_type = #tpu.core_type<tc>, window_params = [{transform_indices = @transform_0, window_bounds = array<i64: 256, 32>}, {transform_indices = @transform_1, window_bounds = array<i64: 256, 32>}, {pipeline_mode = #tpu.pipeline_mode<synchronous>, transform_indices = @transform_2, window_bounds = array<i64: 32, 32>}, {pipeline_mode = #tpu.pipeline_mode<synchronous>, transform_indices = @transform_3, window_bounds = array<i64: 1, 32>}, {pipeline_mode = #tpu.pipeline_mode<synchronous>, transform_indices = @transform_4, window_bounds = array<i64: 32, 128>}, {pipeline_mode = #tpu.pipeline_mode<synchronous>, transform_indices = @transform_5, window_bounds = array<i64: 32, 128>}, {pipeline_mode = #tpu.pipeline_mode<synchronous>, transform_indices = @transform_6, window_bounds = array<i64: 1, 128>}, {pipeline_mode = #tpu.pipeline_mode<synchronous>, transform_indices = @transform_7, window_bounds = array<i64: 1, 128>}, {pipeline_mode = #tpu.pipeline_mode<synchronous>, transform_indices = @transform_8, window_bounds = array<i64: 1, 128>}, {pipeline_mode = #tpu.pipeline_mode<synchronous>, transform_indices = @transform_9, window_bounds = array<i64: 512, 128>}]} {
    %c0 = arith.constant 0 : index
    %c0_0 = arith.constant 0 : index
    %0 = vector.load %arg1[%c0, %c0_0] : memref<256x32xbf16, #tpu.memory_space<vmem>>, vector<256x32xbf16>
    %c0_1 = arith.constant 0 : index
    %c0_2 = arith.constant 0 : index
    %1 = vector.load %arg3[%c0_1, %c0_2] : memref<32x32xbf16, #tpu.memory_space<vmem>>, vector<32x32xbf16>
    %cst = arith.constant dense<0.000000e+00> : vector<256x32xf32>
    %2 = tpu.matmul %0, %1, %cst {dimension_numbers = #tpu.dot_dimension_numbers<[1], [0], [0], [1], [0, 0, 1, 1], [], []>} : vector<256x32xbf16>, vector<32x32xbf16>, vector<256x32xf32> -> vector<256x32xf32>
    %c0_3 = arith.constant 0 : index
    %c0_4 = arith.constant 0 : index
    %3 = vector.load %arg2[%c0_3, %c0_4] : memref<256x32xbf16, #tpu.memory_space<vmem>>, vector<256x32xbf16>
    %c0_5 = arith.constant 0 : index
    %c0_6 = arith.constant 0 : index
    %4 = vector.load %arg3[%c0_5, %c0_6] : memref<32x32xbf16, #tpu.memory_space<vmem>>, vector<32x32xbf16>
    %cst_7 = arith.constant dense<0.000000e+00> : vector<256x32xf32>
    %5 = tpu.matmul %3, %4, %cst_7 {dimension_numbers = #tpu.dot_dimension_numbers<[1], [0], [0], [1], [0, 0, 1, 1], [], []>} : vector<256x32xbf16>, vector<32x32xbf16>, vector<256x32xf32> -> vector<256x32xf32>
    %c0_8 = arith.constant 0 : index
    %c0_9 = arith.constant 0 : index
    %6 = vector.load %arg4[%c0_8, %c0_9] : memref<1x32xf32, #tpu.memory_space<vmem>>, vector<1x32xf32>
    %7 = vector.broadcast %6 : vector<1x32xf32> to vector<256x32xf32>
    %8 = arith.addf %2, %7 : vector<256x32xf32>
    %cst_10 = arith.constant 0.000000e+00 : f32
    %9 = vector.broadcast %cst_10 : f32 to vector<256x32xf32>
    %10 = arith.maximumf %8, %9 : vector<256x32xf32>
    %c0_11 = arith.constant 0 : index
    %c0_12 = arith.constant 0 : index
    %11 = vector.load %arg4[%c0_11, %c0_12] : memref<1x32xf32, #tpu.memory_space<vmem>>, vector<1x32xf32>
    %12 = vector.broadcast %11 : vector<1x32xf32> to vector<256x32xf32>
    %13 = arith.addf %5, %12 : vector<256x32xf32>
    %cst_13 = arith.constant 0.000000e+00 : f32
    %14 = vector.broadcast %cst_13 : f32 to vector<256x32xf32>
    %15 = arith.maximumf %13, %14 : vector<256x32xf32>
    %16 = arith.mulf %10, %15 : vector<256x32xf32>
    %17 = arith.truncf %16 : vector<256x32xf32> to vector<256x32xbf16>
    %18 = arith.addf %10, %15 : vector<256x32xf32>
    %19 = arith.truncf %18 : vector<256x32xf32> to vector<256x32xbf16>
    %c0_14 = arith.constant 0 : index
    %c0_15 = arith.constant 0 : index
    %20 = vector.load %arg5[%c0_14, %c0_15] : memref<32x128xbf16, #tpu.memory_space<vmem>>, vector<32x128xbf16>
    %cst_16 = arith.constant dense<0.000000e+00> : vector<256x128xf32>
    %21 = tpu.matmul %17, %20, %cst_16 {dimension_numbers = #tpu.dot_dimension_numbers<[1], [0], [0], [1], [0, 0, 1, 1], [], []>} : vector<256x32xbf16>, vector<32x128xbf16>, vector<256x128xf32> -> vector<256x128xf32>
    %c0_17 = arith.constant 0 : index
    %c0_18 = arith.constant 0 : index
    %22 = vector.load %arg6[%c0_17, %c0_18] : memref<32x128xbf16, #tpu.memory_space<vmem>>, vector<32x128xbf16>
    %cst_19 = arith.constant dense<0.000000e+00> : vector<256x128xf32>
    %23 = tpu.matmul %19, %22, %cst_19 {dimension_numbers = #tpu.dot_dimension_numbers<[1], [0], [0], [1], [0, 0, 1, 1], [], []>} : vector<256x32xbf16>, vector<32x128xbf16>, vector<256x128xf32> -> vector<256x128xf32>
    %24 = arith.addf %21, %23 : vector<256x128xf32>
    %c0_20 = arith.constant 0 : index
    %c0_21 = arith.constant 0 : index
    %25 = vector.load %arg7[%c0_20, %c0_21] : memref<1x128xf32, #tpu.memory_space<vmem>>, vector<1x128xf32>
    %26 = vector.broadcast %25 : vector<1x128xf32> to vector<256x128xf32>
    %27 = arith.addf %24, %26 : vector<256x128xf32>
    %c256_i32 = arith.constant 256 : i32
    %28 = arith.muli %arg0, %c256_i32 : i32
    %29 = tpu.assume_multiple %28, 256 : i32
    %30 = arith.index_cast %29 : i32 to index
    %c0_22 = arith.constant 0 : index
    %31 = vector.load %arg10[%30, %c0_22] : memref<512x128xf32, #tpu.memory_space<vmem>>, vector<256x128xf32>
    tpu.vector_store %arg10[%30, %c0_22], %27 {strides = array<i32>} : memref<512x128xf32, #tpu.memory_space<vmem>>, vector<256x128xf32>,
    %c1_i32 = arith.constant 1 : i32
    %32 = arith.cmpi eq, %arg0, %c1_i32 : i32
    %33 = arith.extui %32 : i1 to i32
    %c0_i32 = arith.constant 0 : i32
    %34 = arith.cmpi ne, %33, %c0_i32 : i32
    scf.if %34 {
      %c0_23 = arith.constant 0 : index
      %c0_24 = arith.constant 0 : index
      %35 = vector.load %arg10[%c0_23, %c0_24] : memref<512x128xf32, #tpu.memory_space<vmem>>, vector<512x128xf32>
      %36 = tpu.iota {dimensions = array<i32: 0>} : vector<512x128xi32>
      %c384_i32 = arith.constant 384 : i32
      %37 = vector.broadcast %c384_i32 : i32 to vector<512x128xi32>
      %38 = arith.cmpi slt, %36, %37 : vector<512x128xi32>
      %cst_25 = arith.constant 0.000000e+00 : f32
      %39 = vector.broadcast %cst_25 : f32 to vector<512x128xf32>
      %40 = arith.select %38, %35, %39 : vector<512x128xi1>, vector<512x128xf32>
      %cst_26 = arith.constant dense<0.000000e+00> : vector<128xf32>
      %41 = vector.multi_reduction <add>, %40, %cst_26 [0] : vector<512x128xf32> to vector<128xf32>
      %42 = vector.shape_cast %41 : vector<128xf32> to vector<1x128xf32>
      %cst_27 = arith.constant 0.00260416674 : f32
      %43 = vector.broadcast %cst_27 : f32 to vector<1x128xf32>
      %44 = arith.mulf %42, %43 : vector<1x128xf32>
      %45 = vector.broadcast %44 : vector<1x128xf32> to vector<512x128xf32>
      %46 = arith.subf %35, %45 : vector<512x128xf32>
      %47 = arith.mulf %46, %46 : vector<512x128xf32>
      %cst_28 = arith.constant 0.000000e+00 : f32
      %48 = vector.broadcast %cst_28 : f32 to vector<512x128xf32>
      %49 = arith.select %38, %47, %48 : vector<512x128xi1>, vector<512x128xf32>
      %cst_29 = arith.constant dense<0.000000e+00> : vector<128xf32>
      %50 = vector.multi_reduction <add>, %49, %cst_29 [0] : vector<512x128xf32> to vector<128xf32>
      %51 = vector.shape_cast %50 : vector<128xf32> to vector<1x128xf32>
      %cst_30 = arith.constant 0.00260416674 : f32
      %52 = vector.broadcast %cst_30 : f32 to vector<1x128xf32>
      %53 = arith.mulf %51, %52 : vector<1x128xf32>
      %c0_31 = arith.constant 0 : index
      %c0_32 = arith.constant 0 : index
      %54 = vector.load %arg8[%c0_31, %c0_32] : memref<1x128xf32, #tpu.memory_space<vmem>>, vector<1x128xf32>
      %cst_33 = arith.constant 9.99999974E-6 : f32
      %55 = vector.broadcast %cst_33 : f32 to vector<1x128xf32>
      %56 = arith.addf %53, %55 : vector<1x128xf32>
      %57 = math.rsqrt %56 : vector<1x128xf32>
      %58 = arith.mulf %54, %57 : vector<1x128xf32>
      %59 = vector.broadcast %44 : vector<1x128xf32> to vector<512x128xf32>
      %60 = arith.subf %35, %59 : vector<512x128xf32>
      %61 = vector.broadcast %58 : vector<1x128xf32> to vector<512x128xf32>
      %62 = arith.mulf %60, %61 : vector<512x128xf32>
      %c0_34 = arith.constant 0 : index
      %c0_35 = arith.constant 0 : index
      %63 = vector.load %arg9[%c0_34, %c0_35] : memref<1x128xf32, #tpu.memory_space<vmem>>, vector<1x128xf32>
      %64 = vector.broadcast %63 : vector<1x128xf32> to vector<512x128xf32>
      %65 = arith.addf %62, %64 : vector<512x128xf32>
      %66 = tpu.iota {dimensions = array<i32: 1>} : vector<512x128xi32>
      %c2_i32 = arith.constant 2 : i32
      %67 = vector.broadcast %c2_i32 : i32 to vector<512x128xi32>
      %68 = arith.cmpi slt, %66, %67 : vector<512x128xi32>
      %cst_36 = arith.constant 0xFF800000 : f32
      %69 = vector.broadcast %cst_36 : f32 to vector<512x128xf32>
      %70 = arith.select %68, %65, %69 : vector<512x128xi1>, vector<512x128xf32>
      %cst_37 = arith.constant dense<0xFF800000> : vector<512xf32>
      %71 = vector.multi_reduction <maximumf>, %70, %cst_37 [1] : vector<512x128xf32> to vector<512xf32>
      %72 = vector.shape_cast %71 : vector<512xf32> to vector<512x1xf32>
      %73 = vector.broadcast %72 : vector<512x1xf32> to vector<512x128xf32>
      %74 = arith.subf %70, %73 : vector<512x128xf32>
      %75 = math.exp %74 : vector<512x128xf32>
      %cst_38 = arith.constant dense<0.000000e+00> : vector<512xf32>
      %76 = vector.multi_reduction <add>, %75, %cst_38 [1] : vector<512x128xf32> to vector<512xf32>
      %77 = vector.shape_cast %76 : vector<512xf32> to vector<512x1xf32>
      %78 = math.log %77 : vector<512x1xf32>
      %79 = vector.broadcast %78 : vector<512x1xf32> to vector<512x128xf32>
      %80 = arith.subf %74, %79 : vector<512x128xf32>
      %c0_39 = arith.constant 0 : index
      %c0_40 = arith.constant 0 : index
      %81 = vector.load %arg10[%c0_39, %c0_40] : memref<512x128xf32, #tpu.memory_space<vmem>>, vector<512x128xf32>
      tpu.vector_store %arg10[%c0_39, %c0_40], %80 {strides = array<i32>} : memref<512x128xf32, #tpu.memory_space<vmem>>, vector<512x128xf32>,
    } else {
    }
    return
  }
  func.func @transform_0(%arg0: i32) -> (i32, i32) {
    %c0_i32 = arith.constant 0 : i32
    %c0_i32_0 = arith.constant 0 : i32
    return %arg0, %c0_i32 : i32, i32
  }
  func.func @transform_1(%arg0: i32) -> (i32, i32) {
    %c0_i32 = arith.constant 0 : i32
    %c0_i32_0 = arith.constant 0 : i32
    return %arg0, %c0_i32 : i32, i32
  }
  func.func @transform_2(%arg0: i32) -> (i32, i32) {
    %c0_i32 = arith.constant 0 : i32
    %c0_i32_0 = arith.constant 0 : i32
    %c0_i32_1 = arith.constant 0 : i32
    return %c0_i32, %c0_i32_0 : i32, i32
  }
  func.func @transform_3(%arg0: i32) -> (i32, i32) {
    %c0_i32 = arith.constant 0 : i32
    %c0_i32_0 = arith.constant 0 : i32
    %c0_i32_1 = arith.constant 0 : i32
    return %c0_i32, %c0_i32_0 : i32, i32
  }
  func.func @transform_4(%arg0: i32) -> (i32, i32) {
    %c0_i32 = arith.constant 0 : i32
    %c0_i32_0 = arith.constant 0 : i32
    %c0_i32_1 = arith.constant 0 : i32
    return %c0_i32, %c0_i32_0 : i32, i32
  }
  func.func @transform_5(%arg0: i32) -> (i32, i32) {
    %c0_i32 = arith.constant 0 : i32
    %c0_i32_0 = arith.constant 0 : i32
    %c0_i32_1 = arith.constant 0 : i32
    return %c0_i32, %c0_i32_0 : i32, i32
  }
  func.func @transform_6(%arg0: i32) -> (i32, i32) {
    %c0_i32 = arith.constant 0 : i32
    %c0_i32_0 = arith.constant 0 : i32
    %c0_i32_1 = arith.constant 0 : i32
    return %c0_i32, %c0_i32_0 : i32, i32
  }
  func.func @transform_7(%arg0: i32) -> (i32, i32) {
    %c0_i32 = arith.constant 0 : i32
    %c0_i32_0 = arith.constant 0 : i32
    %c0_i32_1 = arith.constant 0 : i32
    return %c0_i32, %c0_i32_0 : i32, i32
  }
  func.func @transform_8(%arg0: i32) -> (i32, i32) {
    %c0_i32 = arith.constant 0 : i32
    %c0_i32_0 = arith.constant 0 : i32
    %c0_i32_1 = arith.constant 0 : i32
    return %c0_i32, %c0_i32_0 : i32, i32
  }
  func.func @transform_9(%arg0: i32) -> (i32, i32) {
    %c0_i32 = arith.constant 0 : i32
    %c0_i32_0 = arith.constant 0 : i32
    %c0_i32_1 = arith.constant 0 : i32
    return %c0_i32, %c0_i32_0 : i32, i32
  }
}

</mosaic_0001>

<bundles_post_ra>
// kernel: tpu_custom_call.1
= control target key start
LH: loop header
LB: loop body
LE: loop exit
PB: predicated region body
PF: predicated region fallthrough
CT: control target
= control target key end

     0   :  { %14 = vsyncpa [#allocation3], 0  ;;  %s4035_s30 = smov 0   ;;  %s5912_s0 = inlined_call_operand.vmem [shape: bf16[512,32], index: 0, kind: input, shape index: {}]   ;;  %s5913_s1 = inlined_call_operand.vmem [shape: bf16[512,32], index: 1, kind: input, shape index: {}]   ;;  %s5914_s2 = inlined_call_operand.vmem [shape: bf16[32,32], index: 2, kind: input, shape index: {}]   ;;  %s5915_s3 = inlined_call_operand.vmem [shape: f32[1,32], index: 3, kind: input, shape index: {}]   ;;  %s5916_s4 = inlined_call_operand.vmem [shape: bf16[32,128], index: 4, kind: input, shape index: {}]   ;;  %s5917_s5 = inlined_call_operand.vmem [shape: bf16[32,128], index: 5, kind: input, shape index: {}]   ;;  %s5918_s6 = inlined_call_operand.vmem [shape: f32[1,128], index: 6, kind: input, shape index: {}]   ;;  %s5919_s7 = inlined_call_operand.vmem [shape: f32[1,128], index: 7, kind: input, shape index: {}]   ;;  %s5920_s8 = inlined_call_operand.vmem [shape: f32[1,128], index: 8, kind: input, shape index: {}]   ;;  %s5921_s9 = inlined_call_operand.hbm [shape: f32[512,128], index: 9, kind: output, shape index: {}]  }
   0x1 LB: > { %s4041_s10 = sadd.s32 4294967295, %s3980_s30   ;;  %p3267_p0 = scmp.ge.s32.totalorder %s3980_s30, 1  ;;  %s3980_s30 = sphi %s4035_s30, %s20_s30  }
   0x2   : > { %p295_p1 = scmp.lt.s32.totalorder %s3980_s30, 3 }
   0x4   : > { %p296_p2 = pnand %p3267_p0, %p295_p1 }
   0x5   : > { %v3648_v0 = vld [vmem:[%s5914_s2] sm:$0xff] (!%p296_p2)   ;;  %s3268_s13 = sshll.u32 (!%p296_p2), %s4041_s10, 5  ;;  %v3649_v1 = vld [vmem:[%s5914_s2 + $0x8] sm:$0xff] (!%p296_p2)   ;;  %vm511_vm0 = vcmask (!%p296_p2), 261120   ;;  %s3376_s14 = sshll.u32 (!%p296_p2), %s4041_s10, 8 }
   0x6   : > { %299 = sbr.rel (%p296_p2) target bundleno = 1362 (0x552), region = 56  ;;  %p332_p3 = scmp.lt.s32.totalorder (!%p296_p2), %s3268_s13, 63  ;;  %3455 = vmatprep.subr.bf16.mxu1 (!%p296_p2), %v3648_v0  ;;  %v3682_v34 = vld [vmem:[%s5917_s5] sm:$0xff] (!%p296_p2)   ;;  %v3683_v35 = vld [vmem:[%s5917_s5 + $0x8] sm:$0xff] (!%p296_p2)  }
   0x7   : > { %3456 = vmatpush3.bf16.msra.mxu1 (!%p296_p2), %v3648_v0  ;;  %3527 = vmatprep.subr.bf16.mxu0 (!%p296_p2), %v3682_v34  ;;  %v4135_v36 = vld [vmem:[%s5916_s4] sm:$0xff] (!%p296_p2)   ;;  %s4434_s17 = scalar_lea.vmem (!%p296_p2), [#allocation2], %s3376_s14  ;;  %p3377_p4 = scmp.ne.s32.totalorder (!%p296_p2), %s4041_s10, 1 }
   0x8   : > { %3457 = vmatprep.subr.bf16.mxu1 (!%p296_p2), %v3649_v1  ;;  %3528 = vmatpush3.bf16.msra.mxu0 (!%p296_p2), %v3682_v34 }
   0x9   : > { %3529 = vmatprep.subr.bf16.mxu0 (!%p296_p2), %v3683_v35 }
   0xb   : > { %3458 = vmatpush3.bf16.msra.mxu1 (!%p296_p2), %v3649_v1 }
   0xc   : > { %3491 = vmatprep.subr.bf16.mxu1 (!%p296_p2), %v3648_v0  ;;  %3530 = vmatpush3.bf16.msra.mxu0 (!%p296_p2), %v3683_v35 }
   0xd   : > { %s6057_s13 = smov (!%p332_p3, %s3268_s13), 63  ;;  %3563 = vmatprep.subr.bf16.mxu0 %v4135_v36 }
   0xe   : > { %s3269_s16 = sshll.u32 %s6057_s13, 2 }
   0xf   : > { %s4055_s19 = scalar_lea.vmem %s5912_s0, %s3269_s16  ;;  %s4070_s22 = scalar_lea.vmem %s5913_s1, %s3269_s16 }
  0x10   : > { %v3650_v2 = vld [vmem:[%s4055_s19] sm:$0xff]   ;;  %v3651_v3 = vld [vmem:[%s4055_s19 + $0x8] sm:$0xff]   ;;  %v3652_v4 = vld [vmem:[%s4055_s19 + $0x10] sm:$0xff]  }
  0x11   : > { %3459 = vmatprep.mubr.msk.bf16.mxu1 %vm511_vm0, %v3650_v2  ;;  %v3653_v5 = vld [vmem:[%s4055_s19 + $0x18] sm:$0xff]   ;;  %v3654_v6 = vld [vmem:[%s4055_s19 + $0x20] sm:$0xff]   ;;  %v3655_v7 = vld [vmem:[%s4055_s19 + $0x28] sm:$0xff]  }
  0x12   : > { %3460 = vmatmul.mubr.msk.bf16.vlgmr.msra.gmra.mrb[0].mxu1 %vm511_vm0, %v3651_v3  ;;  %v3656_v8 = vld [vmem:[%s4055_s19 + $0x30] sm:$0xff]   ;;  %v3657_v9 = vld [vmem:[%s4055_s19 + $0x38] sm:$0xff]   ;;  %v3658_v10 = vld [vmem:[%s4055_s19 + $0x40] sm:$0xff]  }
  0x13   : > { %3492 = vmatpush3.bf16.msra.mxu1 %v3648_v0  ;;  %3463 = vmatprep.mubr.msk.bf16.mxu1 %vm511_vm0, %v3652_v4  ;;  %v3659_v11 = vld [vmem:[%s4055_s19 + $0x48] sm:$0xff]   ;;  %v3660_v12 = vld [vmem:[%s4055_s19 + $0x50] sm:$0xff]   ;;  %v3661_v13 = vld [vmem:[%s4055_s19 + $0x58] sm:$0xff]  }
  0x14   : > { %3493 = vmatprep.subr.bf16.mxu1 %v3649_v1  ;;  %v3662_v14 = vld [vmem:[%s4055_s19 + $0x60] sm:$0xff]   ;;  %v3663_v15 = vld [vmem:[%s4055_s19 + $0x68] sm:$0xff]   ;;  %v3664_v16 = vld [vmem:[%s4055_s19 + $0x70] sm:$0xff]  }
  0x15   : > { %v3665_v17 = vld [vmem:[%s4055_s19 + $0x78] sm:$0xff]   ;;  %v3666_v18 = vld [vmem:[%s4070_s22] sm:$0xff]   ;;  %v3667_v19 = vld [vmem:[%s4070_s22 + $0x8] sm:$0xff]  }
  0x16   : > { %v3668_v20 = vld [vmem:[%s4070_s22 + $0x10] sm:$0xff]   ;;  %v3669_v21 = vld [vmem:[%s4070_s22 + $0x18] sm:$0xff]   ;;  %v3670_v22 = vld [vmem:[%s4070_s22 + $0x20] sm:$0xff]  }
  0x17   : > { %3494 = vmatpush3.bf16.msra.mxu1 %v3649_v1  ;;  %v3671_v23 = vld [vmem:[%s4070_s22 + $0x28] sm:$0xff]   ;;  %v3672_v24 = vld [vmem:[%s4070_s22 + $0x30] sm:$0xff]   ;;  %v3673_v25 = vld [vmem:[%s4070_s22 + $0x38] sm:$0xff]  }
  0x18   : > { %v3674_v26 = vld [vmem:[%s4070_s22 + $0x40] sm:$0xff]   ;;  %v3675_v27 = vld [vmem:[%s4070_s22 + $0x48] sm:$0xff]   ;;  %v3676_v28 = vld [vmem:[%s4070_s22 + $0x50] sm:$0xff]  }
  0x19   : > { %v3677_v29 = vld [vmem:[%s4070_s22 + $0x58] sm:$0xff]   ;;  %v3678_v30 = vld [vmem:[%s4070_s22 + $0x60] sm:$0xff]   ;;  %v3679_v31 = vld [vmem:[%s4070_s22 + $0x68] sm:$0xff]  }
  0x1a   : > { %3464 = vmatmul.mubr.msk.bf16.gmra.mrb[4].mxu1 %vm511_vm0, %v3653_v5  ;;  %v3680_v32 = vld [vmem:[%s4070_s22 + $0x70] sm:$0xff]   ;;  %v3681_v33 = vld [vmem:[%s4070_s22 + $0x78] sm:$0xff]   ;;  %v4189_v5 = vld [vmem:[%s5915_s3] ss:$0 sm:$0xff] }
  0x1b   : > { %3467 = vmatprep.mubr.msk.bf16.mxu1 %vm511_vm0, %v3654_v6 }
  0x22   : > { %3468 = vmatmul.mubr.msk.bf16.gmra.mrb[8].mxu1 %vm511_vm0, %v3655_v7 }
  0x23   : > { %3471 = vmatprep.mubr.msk.bf16.mxu1 %vm511_vm0, %v3656_v8 }
  0x2a   : > { %3472 = vmatmul.mubr.msk.bf16.gmra.mrb[12].mxu1 %vm511_vm0, %v3657_v9 }
  0x2b   : > { %3475 = vmatprep.mubr.msk.bf16.mxu1 %vm511_vm0, %v3658_v10 }
  0x32   : > { %3476 = vmatmul.mubr.msk.bf16.gmra.mrb[16].mxu1 %vm511_vm0, %v3659_v11 }
  0x33   : > { %3479 = vmatprep.mubr.msk.bf16.mxu1 %vm511_vm0, %v3660_v12 }
  0x3a   : > { %3480 = vmatmul.mubr.msk.bf16.gmra.mrb[20].mxu1 %vm511_vm0, %v3661_v13 }
  0x3b   : > { %3483 = vmatprep.mubr.msk.bf16.mxu1 %vm511_vm0, %v3662_v14 }
  0x42   : > { %3484 = vmatmul.mubr.msk.bf16.gmra.mrb[24].mxu1 %vm511_vm0, %v3663_v15 }
  0x43   : > { %3487 = vmatprep.mubr.msk.bf16.mxu1 %vm511_vm0, %v3664_v16 }
  0x4a   : > { %3488 = vmatmul.mubr.msk.bf16.gmra.mrb[28].mxu1 %vm511_vm0, %v3665_v17 }
  0x4b   : > { %3495 = vmatprep.mubr.msk.bf16.mxu1 %vm511_vm0, %v3666_v18 }
  0x52   : > { %3496 = vmatmul.mubr.msk.bf16.vlgmr.msra.gmra.mrb[32].mxu1 %vm511_vm0, %v3667_v19 }
  0x53   : > { %3499 = vmatprep.mubr.msk.bf16.mxu1 %vm511_vm0, %v3668_v20 }
  0x5a   : > { %3500 = vmatmul.mubr.msk.bf16.gmra.mrb[36].mxu1 %vm511_vm0, %v3669_v21 }
  0x5b   : > { %3503 = vmatprep.mubr.msk.bf16.mxu1 %vm511_vm0, %v3670_v22 }
  0x62   : > { %3504 = vmatmul.mubr.msk.bf16.gmra.mrb[40].mxu1 %vm511_vm0, %v3671_v23 }
  0x63   : > { %3507 = vmatprep.mubr.msk.bf16.mxu1 %vm511_vm0, %v3672_v24 }
  0x6a   : > { %3508 = vmatmul.mubr.msk.bf16.gmra.mrb[44].mxu1 %vm511_vm0, %v3673_v25 }
  0x6b   : > { %3511 = vmatprep.mubr.msk.bf16.mxu1 %vm511_vm0, %v3674_v26 }
  0x72   : > { %3512 = vmatmul.mubr.msk.bf16.gmra.mrb[48].mxu1 %vm511_vm0, %v3675_v27 }
  0x73   : > { %3515 = vmatprep.mubr.msk.bf16.mxu1 %vm511_vm0, %v3676_v28 }
  0x7a   : > { %3516 = vmatmul.mubr.msk.bf16.gmra.mrb[52].mxu1 %vm511_vm0, %v3677_v29 }
  0x7b   : > { %3519 = vmatprep.mubr.msk.bf16.mxu1 %vm511_vm0, %v3678_v30 }
  0x82   : > { %3520 = vmatmul.mubr.msk.bf16.gmra.mrb[56].mxu1 %vm511_vm0, %v3679_v31 }
  0x83   : > { %3523 = vmatprep.mubr.msk.bf16.mxu1 %vm511_vm0, %v3680_v32 }
  0x8a   : > { %3524 = vmatmul.mubr.msk.bf16.gmra.mrb[60].mxu1 %vm511_vm0, %v3681_v33 }
  0xe5   : > { %v3461_v37 = vpop.f32.mrb[0].mxu1 }
  0xe6   : > { %v594_v38 = vpop.f32.mrb[1].mxu1  ;;  %v603_v6 = vadd.f32 %v3461_v37, %v4189_v5 }
  0xe7   : > { %v3462_v39 = vpop.f32.mrb[2].mxu1  ;;  %v595_v7 = vadd.f32 %v4189_v5, %v594_v38 }
  0xe8   : > { %v597_v40 = vpop.f32.mrb[3].mxu1  ;;  %v606_v9 = vadd.f32 %v3462_v39, %v4189_v5  ;;  %v723_v15 = vmax.f32 %v603_v6, 0.0 }
  0xe9   : > { %v598_v12 = vadd.f32 %v4189_v5, %v597_v40  ;;  %v721_v19 = vmax.f32 %v595_v7, 0.0 }
  0xea   : > { %v724_v22 = vmax.f32 %v606_v9, 0.0 }
  0xeb   : > { %v722_v26 = vmax.f32 %v598_v12, 0.0 }
  0xed   : > { %v3465_v41 = vpop.f32.mrb[4].mxu1 }
  0xee   : > { %v610_v42 = vpop.f32.mrb[5].mxu1  ;;  %v619_v30 = vadd.f32 %v3465_v41, %v4189_v5 }
  0xef   : > { %v3466_v43 = vpop.f32.mrb[6].mxu1  ;;  %v611_v33 = vadd.f32 %v4189_v5, %v610_v42 }
  0xf0   : > { %v613_v44 = vpop.f32.mrb[7].mxu1  ;;  %v622_v38 = vadd.f32 %v3466_v43, %v4189_v5 }
  0xf1   : > { %v614_v41 = vadd.f32 %v4189_v5, %v613_v44 }
  0xf5   : > { %v4138_v45 = vpop.f32.mrb[8].mxu1 }
  0xf6   : > { %v4140_v46 = vpop.f32.mrb[9].mxu1 }
  0xf7   : > { %v4142_v47 = vpop.f32.mrb[10].mxu1 }
  0xf8   : > { %v4144_v48 = vpop.f32.mrb[11].mxu1 }
  0xfd   : > { %v4146_v49 = vpop.f32.mrb[12].mxu1 }
  0xfe   : > { %v4148_v50 = vpop.f32.mrb[13].mxu1 }
  0xff   : > { %v4150_v51 = vpop.f32.mrb[14].mxu1 }
 0x100   : > { %v4152_v52 = vpop.f32.mrb[15].mxu1 }
 0x105   : > { %v4154_v53 = vpop.f32.mrb[16].mxu1 }
 0x106   : > { %v4156_v54 = vpop.f32.mrb[17].mxu1 }
 0x107   : > { %v4158_v55 = vpop.f32.mrb[18].mxu1 }
 0x108   : > { %v4160_v56 = vpop.f32.mrb[19].mxu1 }
 0x10d   : > { %v4162_v57 = vpop.f32.mrb[20].mxu1 }
 0x10e   : > { %v4164_v58 = vpop.f32.mrb[21].mxu1 }
 0x10f   : > { %v4166_v59 = vpop.f32.mrb[22].mxu1 }
 0x110   : > { %v4168_v60 = vpop.f32.mrb[23].mxu1 }
 0x115   : > { %v4170_v61 = vpop.f32.mrb[24].mxu1 }
 0x116   : > { %v4172_v62 = vpop.f32.mrb[25].mxu1 }
 0x117   : > { %v4174_v63 = vpop.f32.mrb[26].mxu1 }
 0x118   : > { %v4176_v0 = vpop.f32.mrb[27].mxu1 }
 0x11d   : > { %v4178_v1 = vpop.f32.mrb[28].mxu1 }
 0x11e   : > { %v4180_v2 = vpop.f32.mrb[29].mxu1 }
 0x11f   : > { %v4182_v3 = vpop.f32.mrb[30].mxu1 }
 0x120   : > { %v4184_v4 = vpop.f32.mrb[31].mxu1 }
 0x125   : > { %v3497_v8 = vpop.f32.mrb[32].mxu1 }
 0x126   : > { %v924_v10 = vadd.f32 %v3497_v8, %v4189_v5  ;;  %v915_v11 = vpop.f32.mrb[33].mxu1 }
 0x127   : > { %v916_v13 = vadd.f32 %v4189_v5, %v915_v11  ;;  %v3498_v14 = vpop.f32.mrb[34].mxu1  ;;  %v727_v11 = vmax.f32 %v619_v30, 0.0  ;;  %v627_v30 = vadd.f32 %v4189_v5, %v4140_v46 }
 0x128   : > { %v1044_v16 = vmax.f32 %v924_v10, 0.0  ;;  %v927_v17 = vadd.f32 %v3498_v14, %v4189_v5  ;;  %v918_v18 = vpop.f32.mrb[35].mxu1  ;;  %v3685_v14 = vld [vmem:[%s5916_s4 + $0x8] sm:$0xff]  }
 0x129   : > { %v1042_v20 = vmax.f32 %v916_v13, 0.0  ;;  %v919_v21 = vadd.f32 %v4189_v5, %v918_v18 }
 0x12a   : > { %v4199_v23 = vmul.f32 %v1044_v16, %v723_v15  ;;  %v1124_v24 = vadd.f32 %v1044_v16, %v723_v15  ;;  %v1045_v25 = vmax.f32 %v927_v17, 0.0  ;;  %v725_v15 = vmax.f32 %v611_v33, 0.0 }
 0x12b   : > { %v4201_v27 = vmul.f32 %v1042_v20, %v721_v19  ;;  %v1122_v28 = vadd.f32 %v1042_v20, %v721_v19  ;;  %v1043_v29 = vmax.f32 %v919_v21, 0.0  ;;  %v728_v17 = vmax.f32 %v622_v38, 0.0 }
 0x12c   : > { %v4204_v31 = vmul.f32 %v1045_v25, %v724_v22  ;;  %v1125_v32 = vadd.f32 %v1045_v25, %v724_v22  ;;  %v726_v21 = vmax.f32 %v614_v41, 0.0 }
 0x12d   : > { %v4207_v34 = vmul.f32 %v1043_v29, %v722_v26  ;;  %v1123_v35 = vadd.f32 %v1043_v29, %v722_v26  ;;  %v3501_v37 = vpop.f32.mrb[36].mxu1  ;;  %v635_v26 = vadd.f32 %v4138_v45, %v4189_v5 }
 0x12e   : > { %v1107_v39 = vpack.c.bf16 %v4204_v31, %v4199_v23  ;;  %v1155_v40 = vpack.c.bf16 %v1125_v32, %v1124_v24  ;;  %v940_v6 = vadd.f32 %v3501_v37, %v4189_v5  ;;  %v931_v7 = vpop.f32.mrb[37].mxu1  ;;  %v638_v37 = vadd.f32 %v4142_v47, %v4189_v5 }
 0x12f   : > { %v1106_v8 = vpack.c.bf16 %v4207_v34, %v4201_v27  ;;  %v932_v42 = vadd.f32 %v4189_v5, %v931_v7  ;;  %v3502_v9 = vpop.f32.mrb[38].mxu1  ;;  %v1154_v10 = vpack.c.bf16 %v1123_v35, %v1122_v28  ;;  %v4430_v27 = vld [vmem:[%s5918_s6] ss:$0 sm:$0xff] }
 0x130   : > { %v1048_v12 = vmax.f32 %v940_v6, 0.0  ;;  %v943_v43 = vadd.f32 %v3502_v9, %v4189_v5  ;;  %v934_v13 = vpop.f32.mrb[39].mxu1  ;;  %v630_v6 = vadd.f32 %v4189_v5, %v4144_v48  ;;  %v731_v9 = vmax.f32 %v635_v26, 0.0 }
 0x131   : > { %v1046_v16 = vmax.f32 %v932_v42, 0.0  ;;  %v935_v44 = vadd.f32 %v4189_v5, %v934_v13  ;;  %3531 = vmatprep.mubr.msk.bf16.mxu0 %vm511_vm0, %v1154_v10  ;;  %v732_v48 = vmax.f32 %v638_v37, 0.0  ;;  %v643_v26 = vadd.f32 %v4189_v5, %v4148_v50 }
 0x132   : > { %v4223_v18 = vmul.f32 %v1048_v12, %v727_v11  ;;  %v1128_v19 = vadd.f32 %v1048_v12, %v727_v11  ;;  %v1049_v20 = vmax.f32 %v943_v43, 0.0  ;;  %3532 = vmatmul.mubr.msk.bf16.vlgmr.msra.gmra.mrb[0].mxu0 %vm511_vm0, %v1155_v40  ;;  %v729_v12 = vmax.f32 %v627_v30, 0.0 }
 0x133   : > { %v4226_v22 = vmul.f32 %v1046_v16, %v725_v15  ;;  %v1126_v24 = vadd.f32 %v1046_v16, %v725_v15  ;;  %v1047_v25 = vmax.f32 %v935_v44, 0.0  ;;  %3564 = vmatpush3.bf16.msra.mxu0 %v4135_v36 }
 0x134   : > { %v4231_v28 = vmul.f32 %v1049_v20, %v728_v17  ;;  %v1129_v29 = vadd.f32 %v1049_v20, %v728_v17  ;;  %3565 = vmatprep.subr.bf16.mxu0 %v3685_v14  ;;  %v730_v17 = vmax.f32 %v630_v6, 0.0 }
 0x135   : > { %v4235_v32 = vmul.f32 %v1047_v25, %v726_v21  ;;  %v1127_v33 = vadd.f32 %v1047_v25, %v726_v21  ;;  %v3505_v35 = vpop.f32.mrb[40].mxu1  ;;  %v651_v21 = vadd.f32 %v4146_v49, %v4189_v5 }
 0x136   : > { %v1109_v36 = vpack.c.bf16 %v4231_v28, %v4223_v18  ;;  %v1157_v38 = vpack.c.bf16 %v1129_v29, %v1128_v19  ;;  %v956_v45 = vadd.f32 %v3505_v35, %v4189_v5  ;;  %v947_v40 = vpop.f32.mrb[41].mxu1  ;;  %v654_v35 = vadd.f32 %v4150_v51, %v4189_v5 }
 0x137   : > { %v1108_v46 = vpack.c.bf16 %v4235_v32, %v4226_v22  ;;  %v1156_v7 = vpack.c.bf16 %v1127_v33, %v1126_v24  ;;  %v948_v41 = vadd.f32 %v4189_v5, %v947_v40  ;;  %v3506_v42 = vpop.f32.mrb[42].mxu1  ;;  %3566 = vmatpush3.bf16.msra.mxu0 %v3685_v14  ;;  %v646_v40 = vadd.f32 %v4189_v5, %v4152_v52 }
 0x138   : > { %v1052_v47 = vmax.f32 %v956_v45, 0.0  ;;  %v959_v10 = vadd.f32 %v3506_v42, %v4189_v5  ;;  %v950_v11 = vpop.f32.mrb[43].mxu1  ;;  %v735_v42 = vmax.f32 %v651_v21, 0.0 }
 0x139   : > { %v1050_v43 = vmax.f32 %v948_v41, 0.0  ;;  %v951_v13 = vadd.f32 %v4189_v5, %v950_v11  ;;  %3535 = vmatprep.mubr.msk.bf16.mxu0 %vm511_vm0, %v1156_v7 }
 0x13a   : > { %v4250_v15 = vmul.f32 %v1052_v47, %v731_v9  ;;  %v1132_v16 = vadd.f32 %v1052_v47, %v731_v9  ;;  %v1053_v44 = vmax.f32 %v959_v10, 0.0  ;;  %3536 = vmatmul.mubr.msk.bf16.gmra.mrb[4].mxu0 %vm511_vm0, %v1157_v38  ;;  %v733_v10 = vmax.f32 %v643_v26, 0.0 }
 0x13b   : > { %v4253_v14 = vmul.f32 %v1050_v43, %v729_v12  ;;  %v1130_v19 = vadd.f32 %v1050_v43, %v729_v12  ;;  %v1051_v20 = vmax.f32 %v951_v13, 0.0  ;;  %v736_v43 = vmax.f32 %v654_v35, 0.0 }
 0x13c   : > { %v4257_v24 = vmul.f32 %v1053_v44, %v732_v48  ;;  %v1133_v25 = vadd.f32 %v1053_v44, %v732_v48  ;;  %v659_v26 = vadd.f32 %v4189_v5, %v4156_v54 }
 0x13d   : > { %v4261_v29 = vmul.f32 %v1051_v20, %v730_v17  ;;  %v1131_v30 = vadd.f32 %v1051_v20, %v730_v17  ;;  %v3509_v33 = vpop.f32.mrb[44].mxu1  ;;  %v667_v20 = vadd.f32 %v4154_v53, %v4189_v5 }
 0x13e   : > { %v1111_v37 = vpack.c.bf16 %v4257_v24, %v4250_v15  ;;  %v1159_v38 = vpack.c.bf16 %v1133_v25, %v1132_v16  ;;  %v972_v45 = vadd.f32 %v3509_v33, %v4189_v5  ;;  %v963_v49 = vpop.f32.mrb[45].mxu1  ;;  %v734_v16 = vmax.f32 %v646_v40, 0.0 }
 0x13f   : > { %v1110_v50 = vpack.c.bf16 %v4261_v29, %v4253_v14  ;;  %v1158_v6 = vpack.c.bf16 %v1131_v30, %v1130_v19  ;;  %v964_v7 = vadd.f32 %v4189_v5, %v963_v49  ;;  %v3510_v41 = vpop.f32.mrb[46].mxu1 }
 0x140   : > { %v1056_v9 = vmax.f32 %v972_v45, 0.0  ;;  %v975_v51 = vadd.f32 %v3510_v41, %v4189_v5  ;;  %v966_v47 = vpop.f32.mrb[47].mxu1 }
 0x141   : > { %v1054_v11 = vmax.f32 %v964_v7, 0.0  ;;  %v967_v12 = vadd.f32 %v4189_v5, %v966_v47  ;;  %3539 = vmatprep.mubr.msk.bf16.mxu0 %vm511_vm0, %v1158_v6  ;;  %v662_v6 = vadd.f32 %v4189_v5, %v4160_v56 }
 0x142   : > { %v4276_v52 = vmul.f32 %v1056_v9, %v735_v42  ;;  %v1136_v13 = vadd.f32 %v1056_v9, %v735_v42  ;;  %v1057_v48 = vmax.f32 %v975_v51, 0.0  ;;  %3540 = vmatmul.mubr.msk.bf16.gmra.mrb[8].mxu0 %vm511_vm0, %v1159_v38  ;;  %v670_v38 = vadd.f32 %v4158_v55, %v4189_v5 }
 0x143   : > { %v4279_v44 = vmul.f32 %v1054_v11, %v733_v10  ;;  %v1134_v17 = vadd.f32 %v1054_v11, %v733_v10  ;;  %v1055_v19 = vmax.f32 %v967_v12, 0.0  ;;  %v739_v9 = vmax.f32 %v667_v20, 0.0 }
 0x144   : > { %v4283_v21 = vmul.f32 %v1057_v48, %v736_v43  ;;  %v1137_v25 = vadd.f32 %v1057_v48, %v736_v43  ;;  %v737_v10 = vmax.f32 %v659_v26, 0.0  ;;  %v740_v43 = vmax.f32 %v670_v38, 0.0 }
 0x145   : > { %v4287_v30 = vmul.f32 %v1055_v19, %v734_v16  ;;  %v1135_v33 = vadd.f32 %v1055_v19, %v734_v16  ;;  %v3513_v35 = vpop.f32.mrb[48].mxu1  ;;  %v738_v16 = vmax.f32 %v662_v6, 0.0 }
 0x146   : > { %v1113_v45 = vpack.c.bf16 %v4283_v21, %v4276_v52  ;;  %v1161_v49 = vpack.c.bf16 %v1137_v25, %v1136_v13  ;;  %v988_v40 = vadd.f32 %v3513_v35, %v4189_v5  ;;  %v979_v53 = vpop.f32.mrb[49].mxu1  ;;  %v683_v25 = vadd.f32 %v4162_v57, %v4189_v5 }
 0x147   : > { %v1112_v54 = vpack.c.bf16 %v4287_v30, %v4279_v44  ;;  %v1160_v7 = vpack.c.bf16 %v1135_v33, %v1134_v17  ;;  %v980_v41 = vadd.f32 %v4189_v5, %v979_v53  ;;  %v3514_v42 = vpop.f32.mrb[50].mxu1  ;;  %v675_v35 = vadd.f32 %v4189_v5, %v4164_v58 }
 0x148   : > { %v1060_v51 = vmax.f32 %v988_v40, 0.0  ;;  %v991_v55 = vadd.f32 %v3514_v42, %v4189_v5  ;;  %v982_v47 = vpop.f32.mrb[51].mxu1  ;;  %v678_v42 = vadd.f32 %v4189_v5, %v4168_v60 }
 0x149   : > { %v1058_v11 = vmax.f32 %v980_v41, 0.0  ;;  %v983_v12 = vadd.f32 %v4189_v5, %v982_v47  ;;  %3543 = vmatprep.mubr.msk.bf16.mxu0 %vm511_vm0, %v1160_v7  ;;  %v743_v47 = vmax.f32 %v683_v25, 0.0 }
 0x14a   : > { %v4302_v56 = vmul.f32 %v1060_v51, %v739_v9  ;;  %v1140_v13 = vadd.f32 %v1060_v51, %v739_v9  ;;  %v1061_v48 = vmax.f32 %v991_v55, 0.0  ;;  %3544 = vmatmul.mubr.msk.bf16.gmra.mrb[12].mxu0 %vm511_vm0, %v1161_v49  ;;  %v686_v49 = vadd.f32 %v4166_v59, %v4189_v5 }
 0x14b   : > { %v4305_v17 = vmul.f32 %v1058_v11, %v737_v10  ;;  %v1138_v19 = vadd.f32 %v1058_v11, %v737_v10  ;;  %v1059_v20 = vmax.f32 %v983_v12, 0.0  ;;  %v741_v12 = vmax.f32 %v675_v35, 0.0 }
 0x14c   : > { %v4309_v26 = vmul.f32 %v1061_v48, %v740_v43  ;;  %v1141_v33 = vadd.f32 %v1061_v48, %v740_v43  ;;  %v744_v48 = vmax.f32 %v686_v49, 0.0  ;;  %v699_v35 = vadd.f32 %v4170_v61, %v4189_v5 }
 0x14d   : > { %v4313_v38 = vmul.f32 %v1059_v20, %v738_v16  ;;  %v1139_v40 = vadd.f32 %v1059_v20, %v738_v16  ;;  %v3517_v53 = vpop.f32.mrb[52].mxu1  ;;  %v691_v49 = vadd.f32 %v4189_v5, %v4172_v62 }
 0x14e   : > { %v1115_v6 = vpack.c.bf16 %v4309_v26, %v4302_v56  ;;  %v1163_v7 = vpack.c.bf16 %v1141_v33, %v1140_v13  ;;  %v1004_v41 = vadd.f32 %v3517_v53, %v4189_v5  ;;  %v995_v57 = vpop.f32.mrb[53].mxu1 }
 0x14f   : > { %v1114_v58 = vpack.c.bf16 %v4313_v38, %v4305_v17  ;;  %v1162_v9 = vpack.c.bf16 %v1139_v40, %v1138_v19  ;;  %v996_v51 = vadd.f32 %v4189_v5, %v995_v57  ;;  %v3518_v55 = vpop.f32.mrb[54].mxu1  ;;  %v742_v19 = vmax.f32 %v678_v42, 0.0 }
 0x150   : > { %v1064_v10 = vmax.f32 %v1004_v41, 0.0  ;;  %v1007_v59 = vadd.f32 %v3518_v55, %v4189_v5  ;;  %v998_v11 = vpop.f32.mrb[55].mxu1 }
 0x151   : > { %v1062_v43 = vmax.f32 %v996_v51, 0.0  ;;  %v999_v13 = vadd.f32 %v4189_v5, %v998_v11  ;;  %3547 = vmatprep.mubr.msk.bf16.mxu0 %vm511_vm0, %v1162_v9 }
 0x152   : > { %v4328_v60 = vmul.f32 %v1064_v10, %v743_v47  ;;  %v1144_v16 = vadd.f32 %v1064_v10, %v743_v47  ;;  %v1065_v20 = vmax.f32 %v1007_v59, 0.0  ;;  %3548 = vmatmul.mubr.msk.bf16.gmra.mrb[16].mxu0 %vm511_vm0, %v1163_v7  ;;  %v702_v7 = vadd.f32 %v4174_v63, %v4189_v5 }
 0x153   : > { %v4331_v33 = vmul.f32 %v1062_v43, %v741_v12  ;;  %v1142_v25 = vadd.f32 %v1062_v43, %v741_v12  ;;  %v1063_v40 = vmax.f32 %v999_v13, 0.0  ;;  %v694_v10 = vadd.f32 %v4189_v5, %v4176_v0 }
 0x154   : > { %v4335_v53 = vmul.f32 %v1065_v20, %v744_v48  ;;  %v1145_v41 = vadd.f32 %v1065_v20, %v744_v48  ;;  %v747_v43 = vmax.f32 %v699_v35, 0.0  ;;  %v745_v20 = vmax.f32 %v691_v49, 0.0 }
 0x155   : > { %v4339_v57 = vmul.f32 %v1063_v40, %v742_v19  ;;  %v1143_v9 = vadd.f32 %v1063_v40, %v742_v19  ;;  %v3521_v51 = vpop.f32.mrb[56].mxu1  ;;  %v748_v40 = vmax.f32 %v702_v7, 0.0 }
 0x156   : > { %v1165_v55 = vpack.c.bf16 %v1145_v41, %v1144_v16  ;;  %v1020_v47 = vadd.f32 %v3521_v51, %v4189_v5  ;;  %v1011_v61 = vpop.f32.mrb[57].mxu1  ;;  %v5961_v23 = vpack.c.bf16 %v4335_v53, %v4328_v60 }
 0x157   : > { %v1116_v62 = vpack.c.bf16 %v4339_v57, %v4331_v33  ;;  %v1164_v59 = vpack.c.bf16 %v1143_v9, %v1142_v25  ;;  %v1012_v11 = vadd.f32 %v4189_v5, %v1011_v61  ;;  %v3522_v12 = vpop.f32.mrb[58].mxu1  ;;  %v746_v25 = vmax.f32 %v694_v10, 0.0 }
 0x158   : > { %v1068_v13 = vmax.f32 %v1020_v47, 0.0  ;;  %v1023_v63 = vadd.f32 %v3522_v12, %v4189_v5  ;;  %v1014_v48 = vpop.f32.mrb[59].mxu1  ;;  %v715_v61 = vadd.f32 %v4178_v1, %v4189_v5  ;;  %v707_v12 = vadd.f32 %v4189_v5, %v4180_v2 }
 0x159   : > { %v1066_v16 = vmax.f32 %v1012_v11, 0.0  ;;  %v1015_v19 = vadd.f32 %v4189_v5, %v1014_v48  ;;  %3551 = vmatprep.mubr.msk.bf16.mxu0 %vm511_vm0, %v1164_v59  ;;  %v710_v1 = vadd.f32 %v4189_v5, %v4184_v4 }
 0x15a   : > { %v4354_v0 = vmul.f32 %v1068_v13, %v747_v43  ;;  %v1148_v41 = vadd.f32 %v1068_v13, %v747_v43  ;;  %v1069_v51 = vmax.f32 %v1023_v63, 0.0  ;;  %3552 = vmatmul.mubr.msk.bf16.gmra.mrb[20].mxu0 %vm511_vm0, %v1165_v55  ;;  %v718_v43 = vadd.f32 %v4182_v3, %v4189_v5 }
 0x15b   : > { %v1098_v9 = vmul.f32 %v1066_v16, %v745_v20  ;;  %v1146_v35 = vadd.f32 %v1066_v16, %v745_v20  ;;  %v1067_v47 = vmax.f32 %v1015_v19, 0.0  ;;  %v749_v3 = vmax.f32 %v707_v12, 0.0 }
 0x15c   : > { %v1101_v49 = vmul.f32 %v1069_v51, %v748_v40  ;;  %v1149_v11 = vadd.f32 %v1069_v51, %v748_v40  ;;  %v751_v40 = vmax.f32 %v715_v61, 0.0 }
 0x15d   : > { %v1099_v59 = vmul.f32 %v1067_v47, %v746_v25  ;;  %v1147_v7 = vadd.f32 %v1067_v47, %v746_v25  ;;  %v3525_v48 = vpop.f32.mrb[60].mxu1 }
 0x15e   : > { %v1119_v55 = vpack.c.bf16 %v1101_v49, %v4354_v0  ;;  %v1167_v10 = vpack.c.bf16 %v1149_v11, %v1148_v41  ;;  %v1036_v13 = vadd.f32 %v3525_v48, %v4189_v5  ;;  %v1027_v63 = vpop.f32.mrb[61].mxu1  ;;  %v752_v41 = vmax.f32 %v718_v43, 0.0 }
 0x15f   : > { %v1118_v20 = vpack.c.bf16 %v1099_v59, %v1098_v9  ;;  %v1166_v16 = vpack.c.bf16 %v1147_v7, %v1146_v35  ;;  %v1028_v19 = vadd.f32 %v4189_v5, %v1027_v63  ;;  %v3526_v2 = vpop.f32.mrb[62].mxu1  ;;  %v750_v9 = vmax.f32 %v710_v1, 0.0 }
 0x160   : > { %v1072_v51 = vmax.f32 %v1036_v13, 0.0  ;;  %v1039_v25 = vadd.f32 %v3526_v2, %v4189_v5  ;;  %v1030_v47 = vpop.f32.mrb[63].mxu1 }
 0x161   : > { %v1070_v42 = vmax.f32 %v1028_v19, 0.0  ;;  %v1031_v0 = vadd.f32 %v4189_v5, %v1030_v47  ;;  %3555 = vmatprep.mubr.msk.bf16.mxu0 %vm511_vm0, %v1166_v16 }
 0x162   : > { %v1104_v49 = vmul.f32 %v1072_v51, %v751_v40  ;;  %v1152_v11 = vadd.f32 %v1072_v51, %v751_v40  ;;  %v1073_v4 = vmax.f32 %v1039_v25, 0.0  ;;  %3556 = vmatmul.mubr.msk.bf16.gmra.mrb[24].mxu0 %vm511_vm0, %v1167_v10 }
 0x163   : > { %v1102_v35 = vmul.f32 %v1070_v42, %v749_v3  ;;  %v1150_v59 = vadd.f32 %v1070_v42, %v749_v3  ;;  %v1071_v61 = vmax.f32 %v1031_v0, 0.0 }
 0x164   : > { %v1105_v7 = vmul.f32 %v1073_v4, %v752_v41  ;;  %v1153_v48 = vadd.f32 %v1073_v4, %v752_v41 }
 0x165   : > { %v1103_v13 = vmul.f32 %v1071_v61, %v750_v9  ;;  %v1151_v63 = vadd.f32 %v1071_v61, %v750_v9 }
 0x166   : > { %v1121_v12 = vpack.c.bf16 %v1105_v7, %v1104_v49  ;;  %v1169_v19 = vpack.c.bf16 %v1153_v48, %v1152_v11 }
 0x167   : > { %v1120_v2 = vpack.c.bf16 %v1103_v13, %v1102_v35  ;;  %v1168_v5 = vpack.c.bf16 %v1151_v63, %v1150_v59 }
 0x169   : > { %3559 = vmatprep.mubr.msk.bf16.mxu0 %vm511_vm0, %v1168_v5 }
 0x16a   : > { %3560 = vmatmul.mubr.msk.bf16.gmra.mrb[28].mxu0 %vm511_vm0, %v1169_v19 }
 0x16b   : > { %3567 = vmatprep.mubr.msk.bf16.mxu0 %vm511_vm0, %v1106_v8 }
 0x172   : > { %3568 = vmatmul.mubr.msk.bf16.vlgmr.msra.gmra.mrb[0].mxu0 %vm511_vm0, %v1107_v39 }
 0x173   : > { %3571 = vmatprep.mubr.msk.bf16.mxu0 %vm511_vm0, %v1108_v46 }
 0x17a   : > { %3572 = vmatmul.mubr.msk.bf16.gmra.mrb[4].mxu0 %vm511_vm0, %v1109_v36 }
 0x17b   : > { %3575 = vmatprep.mubr.msk.bf16.mxu0 %vm511_vm0, %v1110_v50 }
 0x182   : > { %3576 = vmatmul.mubr.msk.bf16.gmra.mrb[8].mxu0 %vm511_vm0, %v1111_v37 }
 0x183   : > { %3579 = vmatprep.mubr.msk.bf16.mxu0 %vm511_vm0, %v1112_v54 }
 0x18a   : > { %3580 = vmatmul.mubr.msk.bf16.gmra.mrb[12].mxu0 %vm511_vm0, %v1113_v45 }
 0x18b   : > { %3583 = vmatprep.mubr.msk.bf16.mxu0 %vm511_vm0, %v1114_v58 }
 0x192   : > { %3584 = vmatmul.mubr.msk.bf16.gmra.mrb[16].mxu0 %vm511_vm0, %v1115_v6 }
 0x193   : > { %3587 = vmatprep.mubr.msk.bf16.mxu0 %vm511_vm0, %v1116_v62 }
 0x19a   : > { %3588 = vmatmul.mubr.msk.bf16.gmra.mrb[20].mxu0 %vm511_vm0, %v5961_v23 }
 0x19b   : > { %3591 = vmatprep.mubr.msk.bf16.mxu0 %vm511_vm0, %v1118_v20 }
 0x1a2   : > { %3592 = vmatmul.mubr.msk.bf16.gmra.mrb[24].mxu0 %vm511_vm0, %v1119_v55 }
 0x1a3   : > { %3595 = vmatprep.mubr.msk.bf16.mxu0 %vm511_vm0, %v1120_v2 }
 0x1aa   : > { %3596 = vmatmul.mubr.msk.bf16.gmra.mrb[28].mxu0 %vm511_vm0, %v1121_v12 }
 0x245   : > { %v3569_v31 = vpop.f32.mrb[0].mxu0 }
 0x246   : > { %v1629_v34 = vadd.f32 %v3569_v31, %v4430_v27  ;;  %v1493_v39 = vpop.f32.mrb[1].mxu0 }
 0x247   : > { %v1627_v8 = vadd.f32 %v4430_v27, %v1493_v39  ;;  %v3570_v18 = vpop.f32.mrb[2].mxu0 }
 0x248   : > { %1663 = vst [vmem:[%s4434_s17 + $0x10] sm:$0xff] %v1629_v34  ;;  %v1630_v22 = vadd.f32 %v3570_v18, %v4430_v27  ;;  %v1496_v28 = vpop.f32.mrb[3].mxu0 }
 0x249   : > { %1661 = vst [vmem:[%s4434_s17] sm:$0xff] %v1627_v8  ;;  %v1628_v32 = vadd.f32 %v4430_v27, %v1496_v28 }
 0x24a   : > { %1664 = vst [vmem:[%s4434_s17 + $0x18] sm:$0xff] %v1630_v22 }
 0x24b   : > { %1662 = vst [vmem:[%s4434_s17 + $0x8] sm:$0xff] %v1628_v32 }
 0x24d   : > { %v3573_v36 = vpop.f32.mrb[4].mxu0 }
 0x24e   : > { %v1633_v46 = vadd.f32 %v3573_v36, %v4430_v27  ;;  %v1509_v15 = vpop.f32.mrb[5].mxu0 }
 0x24f   : > { %v1631_v14 = vadd.f32 %v4430_v27, %v1509_v15  ;;  %v3574_v24 = vpop.f32.mrb[6].mxu0 }
 0x250   : > { %1667 = vst [vmem:[%s4434_s17 + $0x30] sm:$0xff] %v1633_v46  ;;  %v1634_v29 = vadd.f32 %v3574_v24, %v4430_v27  ;;  %v1512_v37 = vpop.f32.mrb[7].mxu0 }
 0x251   : > { %1665 = vst [vmem:[%s4434_s17 + $0x20] sm:$0xff] %v1631_v14  ;;  %v1632_v50 = vadd.f32 %v4430_v27, %v1512_v37 }
 0x252   : > { %1668 = vst [vmem:[%s4434_s17 + $0x38] sm:$0xff] %v1634_v29 }
 0x253   : > { %1666 = vst [vmem:[%s4434_s17 + $0x28] sm:$0xff] %v1632_v50 }
 0x255   : > { %v3577_v52 = vpop.f32.mrb[8].mxu0 }
 0x256   : > { %v1637_v44 = vadd.f32 %v3577_v52, %v4430_v27  ;;  %v1525_v21 = vpop.f32.mrb[9].mxu0 }
 0x257   : > { %v1635_v30 = vadd.f32 %v4430_v27, %v1525_v21  ;;  %v3578_v45 = vpop.f32.mrb[10].mxu0 }
 0x258   : > { %1671 = vst [vmem:[%s4434_s17 + $0x50] sm:$0xff] %v1637_v44  ;;  %v1638_v54 = vadd.f32 %v3578_v45, %v4430_v27  ;;  %v1528_v56 = vpop.f32.mrb[11].mxu0 }
 0x259   : > { %1669 = vst [vmem:[%s4434_s17 + $0x40] sm:$0xff] %v1635_v30  ;;  %v1636_v17 = vadd.f32 %v4430_v27, %v1528_v56 }
 0x25a   : > { %1672 = vst [vmem:[%s4434_s17 + $0x58] sm:$0xff] %v1638_v54 }
 0x25b   : > { %1670 = vst [vmem:[%s4434_s17 + $0x48] sm:$0xff] %v1636_v17 }
 0x25d   : > { %v3581_v26 = vpop.f32.mrb[12].mxu0 }
 0x25e   : > { %v1641_v38 = vadd.f32 %v3581_v26, %v4430_v27  ;;  %v1541_v6 = vpop.f32.mrb[13].mxu0 }
 0x25f   : > { %v1639_v58 = vadd.f32 %v4430_v27, %v1541_v6  ;;  %v3582_v60 = vpop.f32.mrb[14].mxu0 }
 0x260   : > { %1675 = vst [vmem:[%s4434_s17 + $0x70] sm:$0xff] %v1641_v38  ;;  %v1642_v33 = vadd.f32 %v3582_v60, %v4430_v27  ;;  %v1544_v53 = vpop.f32.mrb[15].mxu0 }
 0x261   : > { %1673 = vst [vmem:[%s4434_s17 + $0x60] sm:$0xff] %v1639_v58  ;;  %v1640_v57 = vadd.f32 %v4430_v27, %v1544_v53 }
 0x262   : > { %1676 = vst [vmem:[%s4434_s17 + $0x78] sm:$0xff] %v1642_v33 }
 0x263   : > { %1674 = vst [vmem:[%s4434_s17 + $0x68] sm:$0xff] %v1640_v57 }
 0x265   : > { %v3585_v42 = vpop.f32.mrb[16].mxu0 }
 0x266   : > { %v1645_v62 = vadd.f32 %v3585_v42, %v4430_v27  ;;  %v1557_v43 = vpop.f32.mrb[17].mxu0 }
 0x267   : > { %v1643_v55 = vadd.f32 %v4430_v27, %v1557_v43  ;;  %v3586_v10 = vpop.f32.mrb[18].mxu0 }
 0x268   : > { %1679 = vst [vmem:[%s4434_s17 + $0x90] sm:$0xff] %v1645_v62  ;;  %v1646_v1 = vadd.f32 %v3586_v10, %v4430_v27  ;;  %v1560_v20 = vpop.f32.mrb[19].mxu0 }
 0x269   : > { %1677 = vst [vmem:[%s4434_s17 + $0x80] sm:$0xff] %v1643_v55  ;;  %v1644_v16 = vadd.f32 %v4430_v27, %v1560_v20 }
 0x26a   : > { %1680 = vst [vmem:[%s4434_s17 + $0x98] sm:$0xff] %v1646_v1 }
 0x26b   : > { %1678 = vst [vmem:[%s4434_s17 + $0x88] sm:$0xff] %v1644_v16 }
 0x26d   : > { %v3589_v40 = vpop.f32.mrb[20].mxu0 }
 0x26e   : > { %v1649_v51 = vadd.f32 %v3589_v40, %v4430_v27  ;;  %v1573_v25 = vpop.f32.mrb[21].mxu0 }
 0x26f   : > { %v1647_v47 = vadd.f32 %v4430_v27, %v1573_v25  ;;  %v3590_v3 = vpop.f32.mrb[22].mxu0 }
 0x270   : > { %1683 = vst [vmem:[%s4434_s17 + $0xb0] sm:$0xff] %v1649_v51  ;;  %v1650_v0 = vadd.f32 %v3590_v3, %v4430_v27  ;;  %v1576_v41 = vpop.f32.mrb[23].mxu0 }
 0x271   : > { %1681 = vst [vmem:[%s4434_s17 + $0xa0] sm:$0xff] %v1647_v47  ;;  %v1648_v49 = vadd.f32 %v4430_v27, %v1576_v41 }
 0x272   : > { %1684 = vst [vmem:[%s4434_s17 + $0xb8] sm:$0xff] %v1650_v0 }
 0x273   : > { %1682 = vst [vmem:[%s4434_s17 + $0xa8] sm:$0xff] %v1648_v49 }
 0x275   : > { %v3593_v11 = vpop.f32.mrb[24].mxu0 }
 0x276   : > { %v1653_v4 = vadd.f32 %v3593_v11, %v4430_v27  ;;  %v1589_v9 = vpop.f32.mrb[25].mxu0 }
 0x277   : > { %v1651_v35 = vadd.f32 %v4430_v27, %v1589_v9  ;;  %v3594_v59 = vpop.f32.mrb[26].mxu0 }
 0x278   : > { %1687 = vst [vmem:[%s4434_s17 + $0xd0] sm:$0xff] %v1653_v4  ;;  %v1654_v61 = vadd.f32 %v3594_v59, %v4430_v27  ;;  %v1592_v7 = vpop.f32.mrb[27].mxu0 }
 0x279   : > { %1685 = vst [vmem:[%s4434_s17 + $0xc0] sm:$0xff] %v1651_v35  ;;  %v1652_v48 = vadd.f32 %v4430_v27, %v1592_v7 }
 0x27a   : > { %1688 = vst [vmem:[%s4434_s17 + $0xd8] sm:$0xff] %v1654_v61 }
 0x27b   : > { %1686 = vst [vmem:[%s4434_s17 + $0xc8] sm:$0xff] %v1652_v48 }
 0x27d   : > { %v3597_v13 = vpop.f32.mrb[28].mxu0  ;;  %1696 = sbr.rel (%p3377_p4) target bundleno = 1336 (0x538), region = 60 }
 0x27e   : > { %v1657_v63 = vadd.f32 %v3597_v13, %v4430_v27  ;;  %v1605_v12 = vpop.f32.mrb[29].mxu0 }
 0x27f   : > { %v1655_v19 = vadd.f32 %v4430_v27, %v1605_v12  ;;  %v3598_v2 = vpop.f32.mrb[30].mxu0 }
 0x280   : > { %1691 = vst [vmem:[%s4434_s17 + $0xf0] sm:$0xff] %v1657_v63  ;;  %v1658_v5 = vadd.f32 %v3598_v2, %v4430_v27  ;;  %v1608_v23 = vpop.f32.mrb[31].mxu0 }
 0x281   : > { %1689 = vst [vmem:[%s4434_s17 + $0xe0] sm:$0xff] %v1655_v19  ;;  %v1656_v31 = vadd.f32 %v4430_v27, %v1608_v23 }
 0x282   : > { %1692 = vst [vmem:[%s4434_s17 + $0xf8] sm:$0xff] %v1658_v5 }
 0x283   : > { %1690 = vst [vmem:[%s4434_s17 + $0xe8] sm:$0xff] %v1656_v31 }
 0x28a   : > { %v4499_v34 = vld [vmem:[#allocation2] sm:$0xff]  ;;  %v4501_v39 = vld [vmem:[#allocation2 + $0x8] sm:$0xff]  ;;  %v4503_v8 = vld [vmem:[#allocation2 + $0x10] sm:$0xff] }
 0x28b   : > { %v1954_v18 = vadd.f32 %v4501_v39, %v4499_v34  ;;  %v4507_v22 = vld [vmem:[#allocation2 + $0x18] sm:$0xff]  ;;  %v4510_v32 = vld [vmem:[#allocation2 + $0x20] sm:$0xff]  ;;  %v4513_v36 = vld [vmem:[#allocation2 + $0x28] sm:$0xff] }
 0x28c   : > { %v4516_v15 = vld [vmem:[#allocation2 + $0x30] sm:$0xff]  ;;  %v4519_v24 = vld [vmem:[#allocation2 + $0x38] sm:$0xff]  ;;  %v4522_v37 = vld [vmem:[#allocation2 + $0x40] sm:$0xff] }
 0x28d   : > { %v1955_v28 = vadd.f32 %v1954_v18, %v4503_v8  ;;  %v4525_v52 = vld [vmem:[#allocation2 + $0x48] sm:$0xff]  ;;  %v4528_v21 = vld [vmem:[#allocation2 + $0x50] sm:$0xff]  ;;  %v4531_v45 = vld [vmem:[#allocation2 + $0x58] sm:$0xff] }
 0x28e   : > { %v4534_v56 = vld [vmem:[#allocation2 + $0x60] sm:$0xff]  ;;  %v4537_v26 = vld [vmem:[#allocation2 + $0x68] sm:$0xff]  ;;  %v4540_v6 = vld [vmem:[#allocation2 + $0x70] sm:$0xff] }
 0x28f   : > { %v1956_v27 = vadd.f32 %v1955_v28, %v4507_v22  ;;  %v4543_v60 = vld [vmem:[#allocation2 + $0x78] sm:$0xff]  ;;  %v4546_v53 = vld [vmem:[#allocation2 + $0x80] sm:$0xff]  ;;  %v4549_v42 = vld [vmem:[#allocation2 + $0x88] sm:$0xff] }
 0x290   : > { %v4552_v43 = vld [vmem:[#allocation2 + $0x90] sm:$0xff]  ;;  %v4555_v10 = vld [vmem:[#allocation2 + $0x98] sm:$0xff]  ;;  %v4558_v20 = vld [vmem:[#allocation2 + $0xa0] sm:$0xff] }
 0x291   : > { %v1957_v46 = vadd.f32 %v1956_v27, %v4510_v32  ;;  %v4561_v40 = vld [vmem:[#allocation2 + $0xa8] sm:$0xff]  ;;  %v4564_v25 = vld [vmem:[#allocation2 + $0xb0] sm:$0xff]  ;;  %v4567_v3 = vld [vmem:[#allocation2 + $0xb8] sm:$0xff] }
 0x292   : > { %v4570_v41 = vld [vmem:[#allocation2 + $0xc0] sm:$0xff]  ;;  %v4573_v11 = vld [vmem:[#allocation2 + $0xc8] sm:$0xff]  ;;  %v4576_v9 = vld [vmem:[#allocation2 + $0xd0] sm:$0xff] }
 0x293   : > { %v1958_v14 = vadd.f32 %v1957_v46, %v4513_v36  ;;  %v4579_v59 = vld [vmem:[#allocation2 + $0xd8] sm:$0xff]  ;;  %v4582_v7 = vld [vmem:[#allocation2 + $0xe0] sm:$0xff]  ;;  %v4585_v13 = vld [vmem:[#allocation2 + $0xe8] sm:$0xff] }
 0x294   : > { %v4588_v12 = vld [vmem:[#allocation2 + $0xf0] sm:$0xff]  ;;  %v4591_v2 = vld [vmem:[#allocation2 + $0xf8] sm:$0xff]  ;;  %v4594_v23 = vld [vmem:[#allocation2 + $0x100] sm:$0xff] }
 0x295   : > { %v1959_v29 = vadd.f32 %v1958_v14, %v4516_v15  ;;  %v4597_v18 = vld [vmem:[#allocation2 + $0x108] sm:$0xff]  ;;  %v4600_v27 = vld [vmem:[#allocation2 + $0x110] sm:$0xff]  ;;  %v4603_v14 = vld [vmem:[#allocation2 + $0x118] sm:$0xff] }
 0x297   : > { %v1960_v50 = vadd.f32 %v1959_v29, %v4519_v24 }
 0x299   : > { %v1961_v44 = vadd.f32 %v1960_v50, %v4522_v37  ;;  %v4606_v50 = vld [vmem:[#allocation2 + $0x120] sm:$0xff] }
 0x29b   : > { %v1962_v30 = vadd.f32 %v1961_v44, %v4525_v52 }
 0x29d   : > { %v1963_v54 = vadd.f32 %v1962_v30, %v4528_v21  ;;  %v4609_v30 = vld [vmem:[#allocation2 + $0x128] sm:$0xff] }
 0x29f   : > { %v1964_v17 = vadd.f32 %v1963_v54, %v4531_v45 }
 0x2a1   : > { %v1965_v38 = vadd.f32 %v1964_v17, %v4534_v56  ;;  %v4612_v17 = vld [vmem:[#allocation2 + $0x130] sm:$0xff] }
 0x2a3   : > { %v1966_v58 = vadd.f32 %v1965_v38, %v4537_v26 }
 0x2a5   : > { %v1967_v33 = vadd.f32 %v1966_v58, %v4540_v6  ;;  %v4615_v58 = vld [vmem:[#allocation2 + $0x138] sm:$0xff] }
 0x2a7   : > { %v1968_v57 = vadd.f32 %v1967_v33, %v4543_v60 }
 0x2a9   : > { %v1969_v62 = vadd.f32 %v1968_v57, %v4546_v53  ;;  %v4618_v57 = vld [vmem:[#allocation2 + $0x140] sm:$0xff] }
 0x2ab   : > { %v1970_v55 = vadd.f32 %v1969_v62, %v4549_v42 }
 0x2ad   : > { %v1971_v1 = vadd.f32 %v1970_v55, %v4552_v43  ;;  %v4621_v55 = vld [vmem:[#allocation2 + $0x148] sm:$0xff] }
 0x2af   : > { %v1972_v16 = vadd.f32 %v1971_v1, %v4555_v10 }
 0x2b1   : > { %v1973_v51 = vadd.f32 %v1972_v16, %v4558_v20  ;;  %v4624_v16 = vld [vmem:[#allocation2 + $0x150] sm:$0xff] }
 0x2b3   : > { %v1974_v47 = vadd.f32 %v1973_v51, %v4561_v40 }
 0x2b5   : > { %v1975_v0 = vadd.f32 %v1974_v47, %v4564_v25  ;;  %v4627_v47 = vld [vmem:[#allocation2 + $0x158] sm:$0xff] }
 0x2b7   : > { %v1976_v49 = vadd.f32 %v1975_v0, %v4567_v3 }
 0x2b9   : > { %v1977_v4 = vadd.f32 %v1976_v49, %v4570_v41  ;;  %v4630_v49 = vld [vmem:[#allocation2 + $0x160] sm:$0xff] }
 0x2bb   : > { %v1978_v35 = vadd.f32 %v1977_v4, %v4573_v11 }
 0x2bd   : > { %v1979_v61 = vadd.f32 %v1978_v35, %v4576_v9  ;;  %v4633_v35 = vld [vmem:[#allocation2 + $0x168] sm:$0xff] }
 0x2bf   : > { %v1980_v48 = vadd.f32 %v1979_v61, %v4579_v59 }
 0x2c1   : > { %v1981_v63 = vadd.f32 %v1980_v48, %v4582_v7  ;;  %v4636_v48 = vld [vmem:[#allocation2 + $0x170] sm:$0xff] }
 0x2c3   : > { %v1982_v19 = vadd.f32 %v1981_v63, %v4585_v13 }
 0x2c5   : > { %v1983_v5 = vadd.f32 %v1982_v19, %v4588_v12  ;;  %v4639_v19 = vld [vmem:[#allocation2 + $0x178] sm:$0xff] }
 0x2c7   : > { %v1984_v31 = vadd.f32 %v1983_v5, %v4591_v2 }
 0x2c9   : > { %v1985_v28 = vadd.f32 %v1984_v31, %v4594_v23 }
 0x2cb   : > { %v1986_v46 = vadd.f32 %v1985_v28, %v4597_v18 }
 0x2cd   : > { %v1987_v29 = vadd.f32 %v1986_v46, %v4600_v27 }
 0x2cf   : > { %v1988_v44 = vadd.f32 %v1987_v29, %v4603_v14 }
 0x2d1   : > { %v1989_v54 = vadd.f32 %v1988_v44, %v4606_v50 }
 0x2d3   : > { %v1990_v38 = vadd.f32 %v1989_v54, %v4609_v30 }
 0x2d5   : > { %v1991_v33 = vadd.f32 %v1990_v38, %v4612_v17 }
 0x2d7   : > { %v1992_v62 = vadd.f32 %v1991_v33, %v4615_v58 }
 0x2d9   : > { %v1993_v1 = vadd.f32 %v1992_v62, %v4618_v57 }
 0x2db   : > { %v1994_v51 = vadd.f32 %v1993_v1, %v4621_v55 }
 0x2dd   : > { %v1995_v0 = vadd.f32 %v1994_v51, %v4624_v16 }
 0x2df   : > { %v1996_v4 = vadd.f32 %v1995_v0, %v4627_v47 }
 0x2e1   : > { %v1997_v61 = vadd.f32 %v1996_v4, %v4630_v49 }
 0x2e3   : > { %v1998_v63 = vadd.f32 %v1997_v61, %v4633_v35 }
 0x2e5   : > { %v1999_v5 = vadd.f32 %v1998_v63, %v4636_v48 }
 0x2e7   : > { %v2000_v31 = vadd.f32 %v1999_v5, %v4639_v19 }
 0x2e9   : > { %v2017_v28 = vrot.slane %v2000_v31, 4 }
 0x2eb   : > { %v2018_v46 = vadd.f32 %v2017_v28, %v2000_v31 }
 0x2ed   : > { %v2019_v29 = vrot.slane %v2018_v46, 2 }
 0x2ef   : > { %v2020_v44 = vadd.f32 %v2019_v29, %v2018_v46 }
 0x2f1   : > { %v2021_v54 = vrot.slane %v2020_v44, 1 }
 0x2f3   : > { %v2022_v38 = vadd.f32 %v2021_v54, %v2020_v44 }
 0x2f5   : > { %v4643_v33 = vmul.f32 0.0026041667, %v2022_v38 }
 0x2f7   : > { %v4647_v62 = vsub.f32 %v4499_v34, %v4643_v33  ;;  %v4651_v1 = vsub.f32 %v4501_v39, %v4643_v33  ;;  %v4655_v51 = vsub.f32 %v4503_v8, %v4643_v33  ;;  %v4659_v0 = vsub.f32 %v4507_v22, %v4643_v33 }
 0x2f8   : > { %v4667_v34 = vsub.f32 %v4510_v32, %v4643_v33  ;;  %v4673_v8 = vsub.f32 %v4513_v36, %v4643_v33  ;;  %v4679_v5 = vsub.f32 %v4516_v15, %v4643_v33  ;;  %v4685_v28 = vsub.f32 %v4519_v24, %v4643_v33 }
 0x2f9   : > { %v2088_v4 = vmul.f32 %v4647_v62, %v4647_v62  ;;  %v2089_v61 = vmul.f32 %v4651_v1, %v4651_v1  ;;  %v2090_v39 = vmul.f32 %v4655_v51, %v4655_v51  ;;  %v2091_v22 = vmul.f32 %v4659_v0, %v4659_v0 }
 0x2fa   : > { %v2092_v31 = vmul.f32 %v4667_v34, %v4667_v34  ;;  %v2093_v36 = vmul.f32 %v4673_v8, %v4673_v8  ;;  %v4691_v29 = vsub.f32 %v4522_v37, %v4643_v33  ;;  %v2094_v15 = vmul.f32 %v4679_v5, %v4679_v5 }
 0x2fb   : > { %v2216_v63 = vadd.f32 %v2089_v61, %v2088_v4  ;;  %v4697_v54 = vsub.f32 %v4525_v52, %v4643_v33  ;;  %v2095_v24 = vmul.f32 %v4685_v28, %v4685_v28  ;;  %v4703_v4 = vsub.f32 %v4528_v21, %v4643_v33 }
 0x2fc   : > { %v2096_v37 = vmul.f32 %v4691_v29, %v4691_v29 }
 0x2fd   : > { %v2217_v32 = vadd.f32 %v2216_v63, %v2090_v39  ;;  %v4709_v39 = vsub.f32 %v4531_v45, %v4643_v33  ;;  %v2097_v52 = vmul.f32 %v4697_v54, %v4697_v54  ;;  %v4715_v63 = vsub.f32 %v4534_v56, %v4643_v33 }
 0x2fe   : > { %v2098_v21 = vmul.f32 %v4703_v4, %v4703_v4 }
 0x2ff   : > { %v2218_v46 = vadd.f32 %v2217_v32, %v2091_v22  ;;  %v4721_v32 = vsub.f32 %v4537_v26, %v4643_v33  ;;  %v2099_v45 = vmul.f32 %v4709_v39, %v4709_v39  ;;  %v2100_v56 = vmul.f32 %v4715_v63, %v4715_v63 }
 0x301   : > { %v2219_v44 = vadd.f32 %v2218_v46, %v2092_v31  ;;  %v4727_v46 = vsub.f32 %v4540_v6, %v4643_v33  ;;  %v2101_v26 = vmul.f32 %v4721_v32, %v4721_v32 }
 0x303   : > { %v2220_v38 = vadd.f32 %v2219_v44, %v2093_v36  ;;  %v4733_v44 = vsub.f32 %v4543_v60, %v4643_v33  ;;  %v2102_v6 = vmul.f32 %v4727_v46, %v4727_v46 }
 0x305   : > { %v2221_v61 = vadd.f32 %v2220_v38, %v2094_v15  ;;  %v4739_v38 = vsub.f32 %v4546_v53, %v4643_v33  ;;  %v2103_v60 = vmul.f32 %v4733_v44, %v4733_v44 }
 0x307   : > { %v2222_v22 = vadd.f32 %v2221_v61, %v2095_v24  ;;  %v4745_v61 = vsub.f32 %v4549_v42, %v4643_v33  ;;  %v2104_v53 = vmul.f32 %v4739_v38, %v4739_v38 }
 0x309   : > { %v2223_v31 = vadd.f32 %v2222_v22, %v2096_v37  ;;  %v4751_v22 = vsub.f32 %v4552_v43, %v4643_v33  ;;  %v2105_v42 = vmul.f32 %v4745_v61, %v4745_v61 }
 0x30b   : > { %v2224_v36 = vadd.f32 %v2223_v31, %v2097_v52  ;;  %v4757_v31 = vsub.f32 %v4555_v10, %v4643_v33  ;;  %v2106_v43 = vmul.f32 %v4751_v22, %v4751_v22 }
 0x30d   : > { %v2225_v15 = vadd.f32 %v2224_v36, %v2098_v21  ;;  %v4763_v36 = vsub.f32 %v4558_v20, %v4643_v33  ;;  %v2107_v10 = vmul.f32 %v4757_v31, %v4757_v31 }
 0x30f   : > { %v2226_v24 = vadd.f32 %v2225_v15, %v2099_v45  ;;  %v4769_v15 = vsub.f32 %v4561_v40, %v4643_v33  ;;  %v2108_v20 = vmul.f32 %v4763_v36, %v4763_v36 }
 0x311   : > { %v2227_v37 = vadd.f32 %v2226_v24, %v2100_v56  ;;  %v4775_v24 = vsub.f32 %v4564_v25, %v4643_v33  ;;  %v2109_v40 = vmul.f32 %v4769_v15, %v4769_v15 }
 0x313   : > { %v2228_v52 = vadd.f32 %v2227_v37, %v2101_v26  ;;  %v4781_v37 = vsub.f32 %v4567_v3, %v4643_v33  ;;  %v2110_v25 = vmul.f32 %v4775_v24, %v4775_v24 }
 0x315   : > { %v2229_v21 = vadd.f32 %v2228_v52, %v2102_v6  ;;  %v4787_v52 = vsub.f32 %v4570_v41, %v4643_v33  ;;  %v2111_v3 = vmul.f32 %v4781_v37, %v4781_v37 }
 0x317   : > { %v2230_v45 = vadd.f32 %v2229_v21, %v2103_v60  ;;  %v4793_v21 = vsub.f32 %v4573_v11, %v4643_v33  ;;  %v2112_v41 = vmul.f32 %v4787_v52, %v4787_v52 }
 0x319   : > { %v2231_v56 = vadd.f32 %v2230_v45, %v2104_v53  ;;  %v4799_v45 = vsub.f32 %v4576_v9, %v4643_v33  ;;  %v2113_v11 = vmul.f32 %v4793_v21, %v4793_v21 }
 0x31b   : > { %v2232_v26 = vadd.f32 %v2231_v56, %v2105_v42  ;;  %v4805_v56 = vsub.f32 %v4579_v59, %v4643_v33  ;;  %v2114_v9 = vmul.f32 %v4799_v45, %v4799_v45 }
 0x31d   : > { %v2233_v6 = vadd.f32 %v2232_v26, %v2106_v43  ;;  %v4811_v26 = vsub.f32 %v4582_v7, %v4643_v33  ;;  %v2115_v59 = vmul.f32 %v4805_v56, %v4805_v56 }
 0x31f   : > { %v2234_v60 = vadd.f32 %v2233_v6, %v2107_v10  ;;  %5962 = vst [vmem:[#allocation5_spill] sm:$0xff] %v4811_v26  ;;  %v4817_v6 = vsub.f32 %v4585_v13, %v4643_v33  ;;  %v2116_v7 = vmul.f32 %v4811_v26, %v4811_v26 }
 0x321   : > { %v2235_v53 = vadd.f32 %v2234_v60, %v2108_v20  ;;  %5963 = vst [vmem:[#allocation6_spill] sm:$0xff] %v4817_v6  ;;  %v4823_v60 = vsub.f32 %v4588_v12, %v4643_v33  ;;  %v2117_v13 = vmul.f32 %v4817_v6, %v4817_v6 }
 0x323   : > { %v2236_v42 = vadd.f32 %v2235_v53, %v2109_v40  ;;  %5964 = vst [vmem:[#allocation7_spill] sm:$0xff] %v4823_v60  ;;  %v4829_v53 = vsub.f32 %v4591_v2, %v4643_v33  ;;  %v2118_v12 = vmul.f32 %v4823_v60, %v4823_v60 }
 0x325   : > { %v2237_v43 = vadd.f32 %v2236_v42, %v2110_v25  ;;  %5965 = vst [vmem:[#allocation8_spill] sm:$0xff] %v4829_v53  ;;  %v4835_v42 = vsub.f32 %v4594_v23, %v4643_v33  ;;  %v2119_v2 = vmul.f32 %v4829_v53, %v4829_v53 }
 0x327   : > { %v2238_v10 = vadd.f32 %v2237_v43, %v2111_v3  ;;  %v4841_v43 = vsub.f32 %v4597_v18, %v4643_v33  ;;  %v2120_v23 = vmul.f32 %v4835_v42, %v4835_v42 }
 0x329   : > { %v2239_v20 = vadd.f32 %v2238_v10, %v2112_v41  ;;  %v4847_v10 = vsub.f32 %v4600_v27, %v4643_v33  ;;  %v2121_v18 = vmul.f32 %v4841_v43, %v4841_v43 }
 0x32b   : > { %v2240_v40 = vadd.f32 %v2239_v20, %v2113_v11  ;;  %v4853_v20 = vsub.f32 %v4603_v14, %v4643_v33  ;;  %v2122_v27 = vmul.f32 %v4847_v10, %v4847_v10 }
 0x32d   : > { %v2241_v25 = vadd.f32 %v2240_v40, %v2114_v9  ;;  %v4859_v40 = vsub.f32 %v4606_v50, %v4643_v33  ;;  %v2123_v14 = vmul.f32 %v4853_v20, %v4853_v20 }
 0x32f   : > { %v2242_v3 = vadd.f32 %v2241_v25, %v2115_v59  ;;  %v4865_v25 = vsub.f32 %v4609_v30, %v4643_v33  ;;  %v2124_v50 = vmul.f32 %v4859_v40, %v4859_v40 }
 0x331   : > { %v2243_v41 = vadd.f32 %v2242_v3, %v2116_v7  ;;  %v4871_v3 = vsub.f32 %v4612_v17, %v4643_v33  ;;  %v2125_v30 = vmul.f32 %v4865_v25, %v4865_v25 }
 0x333   : > { %v2244_v11 = vadd.f32 %v2243_v41, %v2117_v13  ;;  %v4877_v41 = vsub.f32 %v4615_v58, %v4643_v33  ;;  %v2126_v17 = vmul.f32 %v4871_v3, %v4871_v3 }
 0x335   : > { %v2245_v9 = vadd.f32 %v2244_v11, %v2118_v12  ;;  %v4883_v11 = vsub.f32 %v4618_v57, %v4643_v33  ;;  %v2127_v58 = vmul.f32 %v4877_v41, %v4877_v41 }
 0x337   : > { %v2246_v59 = vadd.f32 %v2245_v9, %v2119_v2  ;;  %v4889_v9 = vsub.f32 %v4621_v55, %v4643_v33  ;;  %v2128_v57 = vmul.f32 %v4883_v11, %v4883_v11 }
 0x339   : > { %v2247_v7 = vadd.f32 %v2246_v59, %v2120_v23  ;;  %v4895_v59 = vsub.f32 %v4624_v16, %v4643_v33  ;;  %v2129_v55 = vmul.f32 %v4889_v9, %v4889_v9 }
 0x33b   : > { %v2248_v13 = vadd.f32 %v2247_v7, %v2121_v18  ;;  %v4901_v7 = vsub.f32 %v4627_v47, %v4643_v33  ;;  %v2130_v16 = vmul.f32 %v4895_v59, %v4895_v59 }
 0x33d   : > { %v2249_v12 = vadd.f32 %v2248_v13, %v2122_v27  ;;  %v4907_v13 = vsub.f32 %v4630_v49, %v4643_v33  ;;  %v2131_v47 = vmul.f32 %v4901_v7, %v4901_v7 }
 0x33f   : > { %v2250_v2 = vadd.f32 %v2249_v12, %v2123_v14  ;;  %v4913_v12 = vsub.f32 %v4633_v35, %v4643_v33  ;;  %v2132_v49 = vmul.f32 %v4907_v13, %v4907_v13 }
 0x341   : > { %v2251_v23 = vadd.f32 %v2250_v2, %v2124_v50  ;;  %v4919_v2 = vsub.f32 %v4636_v48, %v4643_v33  ;;  %v2133_v35 = vmul.f32 %v4913_v12, %v4913_v12 }
 0x343   : > { %v2252_v18 = vadd.f32 %v2251_v23, %v2125_v30  ;;  %v4925_v23 = vsub.f32 %v4639_v19, %v4643_v33 }
 0x345   : > { %v2253_v27 = vadd.f32 %v2252_v18, %v2126_v17  ;;  %5966 = vst [vmem:[#allocation9_spill] sm:$0xff] %v4925_v23  ;;  %v2134_v18 = vmul.f32 %v4919_v2, %v4919_v2  ;;  %v2135_v48 = vmul.f32 %v4925_v23, %v4925_v23 }
 0x347   : > { %v2254_v14 = vadd.f32 %v2253_v27, %v2127_v58 }
 0x349   : > { %v2255_v50 = vadd.f32 %v2254_v14, %v2128_v57 }
 0x34b   : > { %v2256_v30 = vadd.f32 %v2255_v50, %v2129_v55 }
 0x34d   : > { %v2257_v17 = vadd.f32 %v2256_v30, %v2130_v16 }
 0x34f   : > { %v2258_v58 = vadd.f32 %v2257_v17, %v2131_v47  ;;  %v2291_v47 = vlaneseq }
 0x351   : > { %v2259_v57 = vadd.f32 %v2258_v58, %v2132_v49  ;;  %v2292_v17 = vshrl.u32 %v2291_v47, 7  ;;  %v2286_v49 = vld [vmem:[%s5919_s7] sm:$0x1] }
 0x353   : > { %v2260_v27 = vadd.f32 %v2259_v57, %v2133_v35  ;;  %v2293_v58 = vsub.s32 0, %v2292_v17 }
 0x355   : > { %v2261_v55 = vadd.f32 %v2260_v27, %v2134_v18  ;;  %v4936_v18 = vand.u32 127, %v2291_v47  ;;  %v4955_v27 = vld [vmem:[#allocation2 + $0x188] sm:$0xff] }
 0x357   : > { %v2262_v14 = vadd.f32 %v2261_v55, %v2135_v48  ;;  %v4953_v48 = vld [vmem:[#allocation2 + $0x180] sm:$0xff]  ;;  %vm2433_vm1 = vcmp.lt.s32.totalorder %v4936_v18, 2 }
 0x359   : > { %v2279_v50 = vrot.slane %v2262_v14, 4 }
 0x35b   : > { %v2280_v16 = vadd.f32 %v2279_v50, %v2262_v14  ;;  %v4962_v14 = vld [vmem:[#allocation2 + $0x190] sm:$0xff] }
 0x35d   : > { %v2281_v30 = vrot.slane %v2280_v16, 2 }
 0x35f   : > { %v2282_v53 = vadd.f32 %v2281_v30, %v2280_v16  ;;  %v4970_v30 = vld [vmem:[#allocation2 + $0x1a0] sm:$0xff] }
 0x360   : > { %5967 = vst [vmem:[#allocation10_spill] sm:$0xff] %v4970_v30  ;;  %v5031_v30 = vld [vmem:[#allocation2 + $0x1e8] sm:$0xff] }
 0x361   : > { %v2283_v19 = vrot.slane %v2282_v53, 1 }
 0x363   : > { %v2284_v60 = vadd.f32 %v2283_v19, %v2282_v53  ;;  %v4943_v53 = vld [vmem:[%s5920_s8] ss:$0 sm:$0xff]  ;;  %v4972_v19 = vld [vmem:[#allocation2 + $0x1a8] sm:$0xff] }
 0x364   : > { %5968 = vst [vmem:[#allocation11_spill] sm:$0xff] %v4972_v19 }
 0x365   : > { %v2285_v6 = vmul.f32 0.0026041667, %v2284_v60 }
 0x367   : > { %v2287_v26 = vadd.f32 1e-05, %v2285_v6 }
 0x369   : > { %3686 = vrsqrt.f32 %v2287_v26 }
 0x373   : > { %v3687_v23 = vpop.eup %3686 }
 0x374   : > { %v2289_v35 = vmul.f32 %v3687_v23, %v2286_v49 }
 0x376   : > { %v4938_v57 = vrot.slane %v2289_v35, %v2293_v58  ;;  %v4992_v35 = vld [vmem:[#allocation2 + $0x1b0] sm:$0xff]  ;;  %v5010_v58 = vld [vmem:[#allocation2 + $0x1d8] sm:$0xff] }
 0x378   : > { %v2296_v26 = vmul.f32 %v4938_v57, %v4647_v62  ;;  %v2298_v6 = vmul.f32 %v4938_v57, %v4655_v51  ;;  %v2297_v60 = vmul.f32 %v4938_v57, %v4651_v1  ;;  %v2299_v23 = vmul.f32 %v4938_v57, %v4659_v0  ;;  %v4964_v51 = vld [vmem:[#allocation2 + $0x198] sm:$0xff] }
 0x379   : > { %v2300_v55 = vmul.f32 %v4938_v57, %v4667_v34  ;;  %v2301_v62 = vmul.f32 %v4938_v57, %v4673_v8  ;;  %v2302_v34 = vmul.f32 %v4938_v57, %v4679_v5  ;;  %v5008_v5 = vld [vmem:[#allocation2 + $0x1d0] sm:$0xff]  ;;  %v2305_v19 = vmul.f32 %v4938_v57, %v4697_v54 }
 0x37a   : > { %v2367_v1 = vadd.f32 %v4943_v53, %v2296_v26  ;;  %v2369_v0 = vadd.f32 %v4943_v53, %v2298_v6  ;;  %v2368_v50 = vadd.f32 %v4943_v53, %v2297_v60  ;;  %v2370_v16 = vadd.f32 %v4943_v53, %v2299_v23  ;;  %v4994_v26 = vld [vmem:[#allocation2 + $0x1b8] sm:$0xff]  ;;  %v4996_v6 = vld [vmem:[#allocation2 + $0x1c0] sm:$0xff] }
 0x37b   : > { %v2303_v60 = vmul.f32 %v4938_v57, %v4685_v28  ;;  %v2371_v28 = vadd.f32 %v4943_v53, %v2300_v55  ;;  %v2372_v23 = vadd.f32 %v4943_v53, %v2301_v62  ;;  %v2304_v55 = vmul.f32 %v4938_v57, %v4691_v29 }
 0x37c   : > { %v4982_v17 = vsel %vm2433_vm1, %v2367_v1, -inf  ;;  %v4986_v49 = vsel %vm2433_vm1, %v2369_v0, -inf  ;;  %v5006_v0 = vld [vmem:[#allocation2 + $0x1c8] sm:$0xff]  ;;  %v5014_v47 = vsel %vm2433_vm1, %v2368_v50, -inf  ;;  %v5018_v8 = vsel %vm2433_vm1, %v2370_v16, -inf  ;;  %v5033_v16 = vld [vmem:[#allocation2 + $0x1f0] sm:$0xff] }
 0x37d   : > { %5969 = vst [vmem:[#allocation12_spill] sm:$0xff] %v4982_v17  ;;  %5970 = vst [vmem:[#allocation13_spill] sm:$0xff] %v4986_v49  ;;  %2498 = vmax.xlane.f32.xlu0 %v4982_v17  ;;  %2502 = vmax.xlane.f32.xlu1 %v4986_v49  ;;  %v5022_v49 = vld [vmem:[#allocation2 + $0x1e0] sm:$0xff]  ;;  %v2373_v1 = vadd.f32 %v4943_v53, %v2302_v34  ;;  %v2374_v50 = vadd.f32 %v4943_v53, %v2303_v60  ;;  %v5052_v62 = vsel %vm2433_vm1, %v2371_v28, -inf }
 0x37e   : > { %5971 = vst [vmem:[#allocation14_spill] sm:$0xff] %v5018_v8  ;;  %5972 = vst [vmem:[#allocation15_spill] sm:$0xff] %v5052_v62  ;;  %v5056_v34 = vsel %vm2433_vm1, %v2372_v23, -inf  ;;  %v2306_v29 = vmul.f32 %v4938_v57, %v4703_v4  ;;  %v2307_v28 = vmul.f32 %v4938_v57, %v4709_v39  ;;  %v2308_v23 = vmul.f32 %v4938_v57, %v4715_v63 }
 0x37f   : > { %5973 = vst [vmem:[#allocation16_spill] sm:$0xff] %v5056_v34  ;;  %v5064_v54 = vsel %vm2433_vm1, %v2373_v1, -inf  ;;  %v2309_v17 = vmul.f32 %v4938_v57, %v4721_v32  ;;  %v2310_v60 = vmul.f32 %v4938_v57, %v4727_v46  ;;  %v2311_v1 = vmul.f32 %v4938_v57, %v4733_v44 }
 0x380   : > { %v5083_v4 = vsel %vm2433_vm1, %v2374_v50, -inf  ;;  %v2376_v39 = vadd.f32 %v4943_v53, %v2305_v19  ;;  %v2312_v63 = vmul.f32 %v4938_v57, %v4739_v38  ;;  %v2313_v32 = vmul.f32 %v4938_v57, %v4745_v61 }
 0x381   : > { %2500 = vmax.xlane.f32.xlu0 %v5014_v47  ;;  %2504 = vmax.xlane.f32.xlu1 %v5018_v8  ;;  %v2375_v8 = vadd.f32 %v4943_v53, %v2304_v55  ;;  %5974 = vst [vmem:[#allocation17_spill] sm:$0xff] %v5083_v4  ;;  %v2314_v46 = vmul.f32 %v4938_v57, %v4751_v22 }
 0x382   : > { %v2315_v44 = vmul.f32 %v4938_v57, %v4757_v31  ;;  %v2316_v55 = vmul.f32 %v4938_v57, %v4763_v36  ;;  %v2317_v50 = vmul.f32 %v4938_v57, %v4769_v15  ;;  %v2377_v19 = vadd.f32 %v4943_v53, %v2306_v29  ;;  %v5110_v15 = vld [vmem:[#allocation2 + $0x1f8] sm:$0xff] }
 0x383   : > { %v2379_v38 = vadd.f32 %v4943_v53, %v2308_v23  ;;  %v2318_v61 = vmul.f32 %v4938_v57, %v4775_v24  ;;  %v5105_v22 = vsel %vm2433_vm1, %v2375_v8, -inf  ;;  %v2380_v31 = vadd.f32 %v4943_v53, %v2309_v17 }
 0x384   : > { %v2381_v36 = vadd.f32 %v4943_v53, %v2310_v60  ;;  %v5116_v29 = vsel %vm2433_vm1, %v2376_v39, -inf  ;;  %v2383_v24 = vadd.f32 %v4943_v53, %v2312_v63  ;;  %v2384_v8 = vadd.f32 %v4943_v53, %v2313_v32 }
 0x385   : > { %2506 = vmax.xlane.f32.xlu0 %v5052_v62  ;;  %2508 = vmax.xlane.f32.xlu1 %v5056_v34  ;;  %v2378_v34 = vadd.f32 %v4943_v53, %v2307_v28  ;;  %v2382_v62 = vadd.f32 %v4943_v53, %v2311_v1  ;;  %v2319_v17 = vmul.f32 %v4938_v57, %v4781_v37  ;;  %v5139_v32 = vsel %vm2433_vm1, %v2379_v38, -inf }
 0x386   : > { %v2385_v60 = vadd.f32 %v4943_v53, %v2314_v46  ;;  %v2386_v28 = vadd.f32 %v4943_v53, %v2315_v44  ;;  %v2387_v23 = vadd.f32 %v4943_v53, %v2316_v55  ;;  %v2388_v1 = vadd.f32 %v4943_v53, %v2317_v50 }
 0x387   : > { %v5132_v39 = vsel %vm2433_vm1, %v2378_v34, -inf  ;;  %v2389_v63 = vadd.f32 %v4943_v53, %v2318_v61  ;;  %v5143_v46 = vsel %vm2433_vm1, %v2380_v31, -inf  ;;  %v5147_v44 = vsel %vm2433_vm1, %v2381_v36, -inf }
 0x388   : > { %v5151_v34 = vsel %vm2433_vm1, %v2382_v62, -inf  ;;  %v5157_v55 = vsel %vm2433_vm1, %v2383_v24, -inf  ;;  %v5161_v50 = vsel %vm2433_vm1, %v2384_v8, -inf  ;;  %v2320_v38 = vmul.f32 %v4938_v57, %v4787_v52 }
 0x389   : > { %2510 = vmax.xlane.f32.xlu0 %v5064_v54  ;;  %2512 = vmax.xlane.f32.xlu1 %v5083_v4  ;;  %v5128_v4 = vsel %vm2433_vm1, %v2377_v19, -inf  ;;  %5975 = vst [vmem:[#allocation18_spill] sm:$0xff] %v5151_v34  ;;  %5976 = vst [vmem:[#allocation19_spill] sm:$0xff] %v5157_v55  ;;  %v2390_v19 = vadd.f32 %v4943_v53, %v2319_v17  ;;  %v5168_v62 = vsel %vm2433_vm1, %v2385_v60, -inf  ;;  %v5172_v61 = vsel %vm2433_vm1, %v2386_v28, -inf }
 0x38a   : > { %5977 = vst [vmem:[#allocation20_spill] sm:$0xff] %v5161_v50  ;;  %v5176_v31 = vsel %vm2433_vm1, %v2387_v23, -inf  ;;  %v5180_v36 = vsel %vm2433_vm1, %v2388_v1, -inf  ;;  %v5184_v24 = vsel %vm2433_vm1, %v2389_v63, -inf  ;;  %v2321_v52 = vmul.f32 %v4938_v57, %v4793_v21 }
 0x38b   : > { %v5190_v8 = vmul.f32 %v4938_v57, %v4799_v45  ;;  %v5194_v17 = vmul.f32 %v4938_v57, %v4805_v56  ;;  %v2328_v60 = vmul.f32 %v4938_v57, %v4835_v42  ;;  %v2329_v28 = vmul.f32 %v4938_v57, %v4841_v43 }
 0x38c   : > { %v2330_v23 = vmul.f32 %v4938_v57, %v4847_v10  ;;  %v2331_v21 = vmul.f32 %v4938_v57, %v4853_v20  ;;  %v5208_v45 = vsel %vm2433_vm1, %v2390_v19, -inf  ;;  %v5211_v56 = vadd.f32 %v4943_v53, %v2320_v38 }
 0x38d   : > { %2514 = vmax.xlane.f32.xlu0 %v5105_v22  ;;  %2516 = vmax.xlane.f32.xlu1 %v5116_v29  ;;  %v2332_v42 = vmul.f32 %v4938_v57, %v4859_v40  ;;  %v2333_v43 = vmul.f32 %v4938_v57, %v4865_v25  ;;  %v2399_v10 = vadd.f32 %v4943_v53, %v2328_v60 }
 0x38e   : > { %v2400_v20 = vadd.f32 %v4943_v53, %v2329_v28  ;;  %v2401_v1 = vadd.f32 %v4943_v53, %v2330_v23  ;;  %v2402_v63 = vadd.f32 %v4943_v53, %v2331_v21  ;;  %v5222_v19 = vadd.f32 %v4943_v53, %v2321_v52 }
 0x38f   : > { %v2403_v38 = vadd.f32 %v4943_v53, %v2332_v42  ;;  %v2404_v37 = vadd.f32 %v4943_v53, %v2333_v43  ;;  %v2334_v40 = vmul.f32 %v4938_v57, %v4871_v3  ;;  %v5230_v25 = vsel %vm2433_vm1, %v2399_v10, -inf }
 0x390   : > { %v5234_v60 = vsel %vm2433_vm1, %v2400_v20, -inf  ;;  %v5238_v28 = vsel %vm2433_vm1, %v2401_v1, -inf  ;;  %v5242_v52 = vsel %vm2433_vm1, %v2402_v63, -inf  ;;  %v2335_v42 = vmul.f32 %v4938_v57, %v4877_v41 }
 0x391   : > { %2518 = vmax.xlane.f32.xlu0 %v5128_v4  ;;  %2520 = vmax.xlane.f32.xlu1 %v5132_v39  ;;  %v5248_v3 = vsel %vm2433_vm1, %v2403_v38, -inf  ;;  %v5252_v23 = vsel %vm2433_vm1, %v2404_v37, -inf  ;;  %v2405_v21 = vadd.f32 %v4943_v53, %v2334_v40  ;;  %v2336_v43 = vmul.f32 %v4938_v57, %v4883_v11 }
 0x392   : > { %v2337_v10 = vmul.f32 %v4938_v57, %v4889_v9  ;;  %v2338_v20 = vmul.f32 %v4938_v57, %v4895_v59  ;;  %v2339_v1 = vmul.f32 %v4938_v57, %v4901_v7  ;;  %v2406_v63 = vadd.f32 %v4943_v53, %v2335_v42 }
 0x393   : > { %v5267_v37 = vsel %vm2433_vm1, %v2405_v21, -inf  ;;  %v2340_v41 = vmul.f32 %v4938_v57, %v4907_v13  ;;  %v2341_v11 = vmul.f32 %v4938_v57, %v4913_v12  ;;  %v2407_v9 = vadd.f32 %v4943_v53, %v2336_v43 }
 0x394   : > { %v2408_v38 = vadd.f32 %v4943_v53, %v2337_v10  ;;  %v2409_v59 = vadd.f32 %v4943_v53, %v2338_v20  ;;  %v2410_v7 = vadd.f32 %v4943_v53, %v2339_v1  ;;  %v5282_v40 = vsel %vm2433_vm1, %v2406_v63, -inf }
 0x395   : > { %2522 = vmax.xlane.f32.xlu0 %v5139_v32  ;;  %2524 = vmax.xlane.f32.xlu1 %v5143_v46  ;;  %v2411_v13 = vadd.f32 %v4943_v53, %v2340_v41  ;;  %v2412_v12 = vadd.f32 %v4943_v53, %v2341_v11  ;;  %v2342_v21 = vmul.f32 %v4938_v57, %v4919_v2  ;;  %v5290_v42 = vsel %vm2433_vm1, %v2407_v9, -inf  ;;  %v5978_v41 = vld [vmem:[#allocation9_spill] sm:$0xff] }
 0x396   : > { %v5294_v43 = vsel %vm2433_vm1, %v2408_v38, -inf  ;;  %v5298_v10 = vsel %vm2433_vm1, %v2409_v59, -inf  ;;  %v5302_v20 = vsel %vm2433_vm1, %v2410_v7, -inf  ;;  %v2343_v11 = vmul.f32 %v4938_v57, %v5978_v41 }
 0x397   : > { %v5306_v1 = vsel %vm2433_vm1, %v2411_v13, -inf  ;;  %v5310_v2 = vsel %vm2433_vm1, %v2412_v12, -inf  ;;  %v2413_v63 = vadd.f32 %v4943_v53, %v2342_v21  ;;  %v5979_v9 = vsub.f32 %v4953_v48, %v4643_v33 }
 0x398   : > { %v5980_v59 = vsub.f32 %v4955_v27, %v4643_v33  ;;  %v5981_v13 = vsub.f32 %v4962_v14, %v4643_v33  ;;  %v5982_v21 = vsub.f32 %v4964_v51, %v4643_v33  ;;  %v2414_v27 = vadd.f32 %v4943_v53, %v2343_v11 }
 0x399   : > { %2526 = vmax.xlane.f32.xlu0 %v5147_v44  ;;  %2528 = vmax.xlane.f32.xlu1 %v5151_v34  ;;  %v2344_v38 = vmul.f32 %v4938_v57, %v5979_v9  ;;  %v5335_v48 = vsel %vm2433_vm1, %v2413_v63, -inf  ;;  %v5983_v9 = vld [vmem:[#allocation10_spill] sm:$0xff] }
 0x39a   : > { %v2345_v7 = vmul.f32 %v4938_v57, %v5980_v59  ;;  %v2346_v12 = vmul.f32 %v4938_v57, %v5981_v13  ;;  %v2347_v41 = vmul.f32 %v4938_v57, %v5982_v21  ;;  %v5984_v14 = vsub.f32 %v5983_v9, %v4643_v33  ;;  %v5985_v13 = vld [vmem:[#allocation11_spill] sm:$0xff] }
 0x39b   : > { %v5986_v51 = vsub.f32 %v5985_v13, %v4643_v33  ;;  %v5352_v11 = vsel %vm2433_vm1, %v2414_v27, -inf  ;;  %v5987_v13 = vsub.f32 %v4992_v35, %v4643_v33 }
 0x39c   : > { %v2348_v59 = vmul.f32 %v4938_v57, %v5984_v14  ;;  %v2417_v34 = vadd.f32 %v4943_v53, %v2346_v12  ;;  %v2418_v63 = vadd.f32 %v4943_v53, %v2347_v41 }
 0x39d   : > { %2530 = vmax.xlane.f32.xlu0 %v5157_v55  ;;  %2532 = vmax.xlane.f32.xlu1 %v5161_v50  ;;  %v2349_v21 = vmul.f32 %v4938_v57, %v5986_v51  ;;  %v2415_v55 = vadd.f32 %v4943_v53, %v2344_v38  ;;  %v2416_v50 = vadd.f32 %v4943_v53, %v2345_v7 }
 0x39e   : > { %v2419_v9 = vadd.f32 %v4943_v53, %v2348_v59  ;;  %v2350_v51 = vmul.f32 %v4938_v57, %v5987_v13  ;;  %v5370_v12 = vsel %vm2433_vm1, %v2417_v34, -inf  ;;  %v5374_v41 = vsel %vm2433_vm1, %v2418_v63, -inf }
 0x39f   : > { %v2420_v14 = vadd.f32 %v4943_v53, %v2349_v21  ;;  %v5362_v38 = vsel %vm2433_vm1, %v2415_v55, -inf  ;;  %v5366_v7 = vsel %vm2433_vm1, %v2416_v50, -inf  ;;  %v5988_v34 = vsub.f32 %v4994_v26, %v4643_v33 }
 0x3a0   : > { %v5380_v35 = vsel %vm2433_vm1, %v2419_v9, -inf  ;;  %v2421_v50 = vadd.f32 %v4943_v53, %v2350_v51  ;;  %v5989_v59 = vsub.f32 %v4996_v6, %v4643_v33  ;;  %v5990_v63 = vsub.f32 %v5006_v0, %v4643_v33 }
 0x3a1   : > { %2534 = vmax.xlane.f32.xlu0 %v5168_v62  ;;  %2536 = vmax.xlane.f32.xlu1 %v5172_v61  ;;  %v5384_v55 = vsel %vm2433_vm1, %v2420_v14, -inf  ;;  %v2351_v27 = vmul.f32 %v4938_v57, %v5988_v34  ;;  %v5991_v14 = vsub.f32 %v5008_v5, %v4643_v33  ;;  %v5992_v26 = vsub.f32 %v5010_v58, %v4643_v33 }
 0x3a2   : > { %v2352_v21 = vmul.f32 %v4938_v57, %v5989_v59  ;;  %v2353_v9 = vmul.f32 %v4938_v57, %v5990_v63  ;;  %v5409_v6 = vsel %vm2433_vm1, %v2421_v50, -inf  ;;  %v5993_v0 = vsub.f32 %v5022_v49, %v4643_v33 }
 0x3a3   : > { %v2354_v13 = vmul.f32 %v4938_v57, %v5991_v14  ;;  %v2355_v51 = vmul.f32 %v4938_v57, %v5992_v26  ;;  %v2422_v34 = vadd.f32 %v4943_v53, %v2351_v27  ;;  %v5994_v5 = vsub.f32 %v5031_v30, %v4643_v33 }
 0x3a4   : > { %v2356_v59 = vmul.f32 %v4938_v57, %v5993_v0  ;;  %v2423_v58 = vadd.f32 %v4943_v53, %v2352_v21  ;;  %v2424_v14 = vadd.f32 %v4943_v53, %v2353_v9  ;;  %v5995_v21 = vsub.f32 %v5033_v16, %v4643_v33 }
 0x3a5   : > { %v2357_v63 = vmul.f32 %v4938_v57, %v5994_v5  ;;  %v2425_v26 = vadd.f32 %v4943_v53, %v2354_v13  ;;  %v2426_v50 = vadd.f32 %v4943_v53, %v2355_v51  ;;  %2538 = vmax.xlane.f32.xlu0 %v5176_v31  ;;  %2540 = vmax.xlane.f32.xlu1 %v5180_v36  ;;  %v5428_v49 = vsel %vm2433_vm1, %v2422_v34, -inf }
 0x3a6   : > { %v2427_v30 = vadd.f32 %v4943_v53, %v2356_v59  ;;  %v2358_v9 = vmul.f32 %v4938_v57, %v5995_v21  ;;  %v5438_v13 = vsel %vm2433_vm1, %v2423_v58, -inf  ;;  %v5442_v51 = vsel %vm2433_vm1, %v2424_v14, -inf  ;;  %v6001_v14 = vld [vmem:[#allocation5_spill] sm:$0xff] }
 0x3a7   : > { %v2428_v27 = vadd.f32 %v4943_v53, %v2357_v63  ;;  %v5446_v34 = vsel %vm2433_vm1, %v2425_v26, -inf  ;;  %v5450_v0 = vsel %vm2433_vm1, %v2426_v50, -inf  ;;  %v6000_v63 = vsub.f32 %v5110_v15, %v4643_v33  ;;  %v6002_v50 = vld [vmem:[#allocation6_spill] sm:$0xff] }
 0x3a8   : > { %5996 = vst [vmem:[#allocation9_spill] sm:$0xff] %v5446_v34  ;;  %5997 = vst [vmem:[#allocation10_spill] sm:$0xff] %v5450_v0  ;;  %v5454_v16 = vsel %vm2433_vm1, %v2427_v30, -inf  ;;  %v2429_v5 = vadd.f32 %v4943_v53, %v2358_v9  ;;  %v2324_v26 = vmul.f32 %v4938_v57, %v6001_v14  ;;  %v2325_v30 = vmul.f32 %v4938_v57, %v6002_v50  ;;  %v6006_v50 = vld [vmem:[#allocation8_spill] sm:$0xff] }
 0x3a9   : > { %5998 = vst [vmem:[#allocation11_spill] sm:$0xff] %v5454_v16  ;;  %v5458_v59 = vsel %vm2433_vm1, %v2428_v27, -inf  ;;  %v2359_v58 = vmul.f32 %v4938_v57, %v6000_v63  ;;  %2542 = vmax.xlane.f32.xlu0 %v5184_v24  ;;  %2544 = vmax.xlane.f32.xlu1 %v5208_v45  ;;  %v5479_v33 = vsel %vm2433_vm1, %v5211_v56, -inf  ;;  %v5484_v15 = vsel %vm2433_vm1, %v5222_v19, -inf }
 0x3aa   : > { %5999 = vst [vmem:[#allocation21_spill] sm:$0xff] %v5458_v59  ;;  %v5473_v27 = vsel %vm2433_vm1, %v2429_v5, -inf  ;;  %v2393_v9 = vadd.f32 %v4943_v53, %v5190_v8  ;;  %v2394_v63 = vadd.f32 %v4943_v53, %v5194_v17  ;;  %v2395_v56 = vadd.f32 %v4943_v53, %v2324_v26 }
 0x3ab   : > { %6003 = vst [vmem:[#allocation5_spill] sm:$0xff] %v5473_v27  ;;  %v2430_v21 = vadd.f32 %v4943_v53, %v2359_v58  ;;  %v6005_v58 = vld [vmem:[#allocation7_spill] sm:$0xff]  ;;  %v2396_v17 = vadd.f32 %v4943_v53, %v2325_v30 }
 0x3ac   : > { %v2326_v19 = vmul.f32 %v4938_v57, %v6005_v58  ;;  %v5501_v14 = vsel %vm2433_vm1, %v2393_v9, -inf  ;;  %v5505_v8 = vsel %vm2433_vm1, %v2394_v63, -inf  ;;  %v5514_v26 = vsel %vm2433_vm1, %v2395_v56, -inf  ;;  %v6007_v56 = vld [vmem:[#allocation12_spill] sm:$0xff] }
 0x3ad   : > { %v5492_v5 = vsel %vm2433_vm1, %v2430_v21, -inf  ;;  %2546 = vmax.xlane.f32.xlu0 %v5479_v33  ;;  %2548 = vmax.xlane.f32.xlu1 %v5484_v15  ;;  %v2327_v21 = vmul.f32 %v4938_v57, %v6006_v50  ;;  %v5518_v9 = vsel %vm2433_vm1, %v2396_v17, -inf  ;;  %v6009_v17 = vld [vmem:[#allocation13_spill] sm:$0xff] }
 0x3ae   : > { %6004 = vst [vmem:[#allocation6_spill] sm:$0xff] %v5492_v5  ;;  %v2397_v63 = vadd.f32 %v4943_v53, %v2326_v19 }
 0x3af   : > { %v2398_v58 = vadd.f32 %v4943_v53, %v2327_v21 }
 0x3b0   : > { %v5526_v57 = vsel %vm2433_vm1, %v2397_v63, -inf }
 0x3b1   : > { %2550 = vmax.xlane.f32.xlu0 %v5501_v14  ;;  %2552 = vmax.xlane.f32.xlu1 %v5505_v8  ;;  %v5530_v30 = vsel %vm2433_vm1, %v2398_v58, -inf }
 0x3b5   : > { %2554 = vmax.xlane.f32.xlu0 %v5514_v26  ;;  %2556 = vmax.xlane.f32.xlu1 %v5518_v9 }
 0x3b9   : > { %2558 = vmax.xlane.f32.xlu0 %v5526_v57  ;;  %2560 = vmax.xlane.f32.xlu1 %v5530_v30 }
 0x3bd   : > { %2562 = vmax.xlane.f32.xlu0 %v5230_v25  ;;  %2564 = vmax.xlane.f32.xlu1 %v5234_v60 }
 0x3c1   : > { %2566 = vmax.xlane.f32.xlu0 %v5238_v28  ;;  %2568 = vmax.xlane.f32.xlu1 %v5242_v52 }
 0x3c5   : > { %2570 = vmax.xlane.f32.xlu0 %v5248_v3  ;;  %2572 = vmax.xlane.f32.xlu1 %v5252_v23 }
 0x3c9   : > { %2574 = vmax.xlane.f32.xlu0 %v5267_v37  ;;  %2576 = vmax.xlane.f32.xlu1 %v5282_v40 }
 0x3cd   : > { %2578 = vmax.xlane.f32.xlu0 %v5290_v42  ;;  %2580 = vmax.xlane.f32.xlu1 %v5294_v43 }
 0x3d1   : > { %2582 = vmax.xlane.f32.xlu0 %v5298_v10  ;;  %2584 = vmax.xlane.f32.xlu1 %v5302_v20 }
 0x3d5   : > { %2586 = vmax.xlane.f32.xlu0 %v5306_v1  ;;  %2588 = vmax.xlane.f32.xlu1 %v5310_v2 }
 0x3d9   : > { %2590 = vmax.xlane.f32.xlu0 %v5335_v48  ;;  %2592 = vmax.xlane.f32.xlu1 %v5352_v11 }
 0x3dd   : > { %2594 = vmax.xlane.f32.xlu0 %v5362_v38  ;;  %2596 = vmax.xlane.f32.xlu1 %v5366_v7 }
 0x3e1   : > { %2598 = vmax.xlane.f32.xlu0 %v5370_v12  ;;  %2600 = vmax.xlane.f32.xlu1 %v5374_v41 }
 0x3e5   : > { %2602 = vmax.xlane.f32.xlu0 %v5380_v35  ;;  %2604 = vmax.xlane.f32.xlu1 %v5384_v55 }
 0x3e9   : > { %2606 = vmax.xlane.f32.xlu0 %v5409_v6  ;;  %2608 = vmax.xlane.f32.xlu1 %v5428_v49 }
 0x3ed   : > { %2610 = vmax.xlane.f32.xlu0 %v5438_v13  ;;  %2612 = vmax.xlane.f32.xlu1 %v5442_v51 }
 0x3f1   : > { %2614 = vmax.xlane.f32.xlu0 %v5446_v34  ;;  %2616 = vmax.xlane.f32.xlu1 %v5450_v0 }
 0x3f5   : > { %2618 = vmax.xlane.f32.xlu0 %v5454_v16  ;;  %2620 = vmax.xlane.f32.xlu1 %v5458_v59 }
 0x3f9   : > { %2622 = vmax.xlane.f32.xlu0 %v5473_v27  ;;  %2624 = vmax.xlane.f32.xlu1 %v5492_v5  ;;  %v6011_v27 = vld [vmem:[#allocation14_spill] sm:$0xff] }
 0x40a   : > { %v2499_v18 = vpop.xlane.xlu0 %2498  ;;  %v2503_v53 = vpop.xlane.xlu1 %2502 }
 0x40b   : > { %v5567_v19 = vsub.f32 %v6007_v56, %v2499_v18  ;;  %v5570_v50 = vsub.f32 %v6009_v17, %v2503_v53 }
 0x40d   : > { %6008 = vst [vmem:[#allocation7_spill] sm:$0xff] %v5567_v19  ;;  %6010 = vst [vmem:[#allocation8_spill] sm:$0xff] %v5570_v50  ;;  %v2690_v21 = vmul.f32 1.442695, %v5567_v19  ;;  %v2694_v63 = vmul.f32 1.442695, %v5570_v50 }
 0x40e   : > { %v2501_v58 = vpop.xlane.xlu0 %2500  ;;  %v2505_v16 = vpop.xlane.xlu1 %2504  ;;  %v6013_v19 = vld [vmem:[#allocation15_spill] sm:$0xff]  ;;  %v6014_v50 = vld [vmem:[#allocation16_spill] sm:$0xff] }
 0x40f   : > { %3688 = vpow2.f32 %v2690_v21  ;;  %v5575_v59 = vsub.f32 %v5014_v47, %v2501_v58  ;;  %v5578_v5 = vsub.f32 %v6011_v27, %v2505_v16  ;;  %v6016_v58 = vld [vmem:[#allocation17_spill] sm:$0xff] }
 0x410   : > { %3690 = vpow2.f32 %v2694_v63 }
 0x411   : > { %6012 = vst [vmem:[#allocation12_spill] sm:$0xff] %v5578_v5  ;;  %v2692_v18 = vmul.f32 1.442695, %v5575_v59  ;;  %v2696_v56 = vmul.f32 1.442695, %v5578_v5 }
 0x412   : > { %v2507_v53 = vpop.xlane.xlu0 %2506  ;;  %v2509_v17 = vpop.xlane.xlu1 %2508 }
 0x413   : > { %3692 = vpow2.f32 %v2692_v18  ;;  %v5583_v0 = vsub.f32 %v6013_v19, %v2507_v53  ;;  %v5586_v34 = vsub.f32 %v6014_v50, %v2509_v17 }
 0x414   : > { %3694 = vpow2.f32 %v2696_v56 }
 0x415   : > { %6015 = vst [vmem:[#allocation13_spill] sm:$0xff] %v5586_v34  ;;  %v2698_v47 = vmul.f32 1.442695, %v5583_v0  ;;  %v2700_v16 = vmul.f32 1.442695, %v5586_v34 }
 0x416   : > { %v2511_v27 = vpop.xlane.xlu0 %2510  ;;  %v2513_v21 = vpop.xlane.xlu1 %2512 }
 0x417   : > { %3696 = vpow2.f32 %v2698_v47  ;;  %v5591_v63 = vsub.f32 %v5064_v54, %v2511_v27  ;;  %v5594_v5 = vsub.f32 %v6016_v58, %v2513_v21 }
 0x418   : > { %3698 = vpow2.f32 %v2700_v16 }
 0x419   : > { %v3689_v18 = vpop.eup %3688  ;;  %v2702_v19 = vmul.f32 1.442695, %v5591_v63  ;;  %v2704_v50 = vmul.f32 1.442695, %v5594_v5 }
 0x41a   : > { %2818 = vadd.xlane.f32.xlu0 %v3689_v18  ;;  %v2515_v56 = vpop.xlane.xlu0 %2514  ;;  %v2517_v53 = vpop.xlane.xlu1 %2516 }
 0x41b   : > { %v3691_v17 = vpop.eup %3690  ;;  %3700 = vpow2.f32 %v2702_v19  ;;  %v5599_v34 = vsub.f32 %v5105_v22, %v2515_v56  ;;  %v5602_v54 = vsub.f32 %v5116_v29, %v2517_v53 }
 0x41c   : > { %3702 = vpow2.f32 %v2704_v50 }
 0x41d   : > { %v3693_v47 = vpop.eup %3692  ;;  %v2706_v27 = vmul.f32 1.442695, %v5599_v34  ;;  %v2708_v16 = vmul.f32 1.442695, %v5602_v54 }
 0x41e   : > { %2822 = vadd.xlane.f32.xlu0 %v3691_v17  ;;  %2820 = vadd.xlane.f32.xlu1 %v3693_v47  ;;  %v2519_v21 = vpop.xlane.xlu0 %2518  ;;  %v2521_v58 = vpop.xlane.xlu1 %2520 }
 0x41f   : > { %v3695_v18 = vpop.eup %3694  ;;  %3704 = vpow2.f32 %v2706_v27  ;;  %v5607_v19 = vsub.f32 %v5128_v4, %v2519_v21  ;;  %v5610_v22 = vsub.f32 %v5132_v39, %v2521_v58 }
 0x420   : > { %3706 = vpow2.f32 %v2708_v16 }
 0x421   : > { %v3697_v29 = vpop.eup %3696  ;;  %v2710_v50 = vmul.f32 1.442695, %v5607_v19  ;;  %v2712_v56 = vmul.f32 1.442695, %v5610_v22 }
 0x422   : > { %2824 = vadd.xlane.f32.xlu1 %v3695_v18  ;;  %2826 = vadd.xlane.f32.xlu0 %v3697_v29  ;;  %v2523_v53 = vpop.xlane.xlu0 %2522  ;;  %v2525_v17 = vpop.xlane.xlu1 %2524 }
 0x423   : > { %v3699_v47 = vpop.eup %3698  ;;  %3708 = vpow2.f32 %v2710_v50  ;;  %v5615_v27 = vsub.f32 %v5139_v32, %v2523_v53  ;;  %v5618_v4 = vsub.f32 %v5143_v46, %v2525_v17  ;;  %v6019_v32 = vld [vmem:[#allocation18_spill] sm:$0xff] }
 0x424   : > { %3710 = vpow2.f32 %v2712_v56 }
 0x425   : > { %6017 = vst [vmem:[#allocation14_spill] sm:$0xff] %v5615_v27  ;;  %6018 = vst [vmem:[#allocation15_spill] sm:$0xff] %v5618_v4  ;;  %v3701_v39 = vpop.eup %3700  ;;  %v2714_v16 = vmul.f32 1.442695, %v5615_v27  ;;  %v2716_v21 = vmul.f32 1.442695, %v5618_v4 }
 0x426   : > { %2828 = vadd.xlane.f32.xlu1 %v3699_v47  ;;  %2830 = vadd.xlane.f32.xlu0 %v3701_v39  ;;  %v2527_v58 = vpop.xlane.xlu0 %2526  ;;  %v2529_v18 = vpop.xlane.xlu1 %2528  ;;  %v6021_v27 = vld [vmem:[#allocation19_spill] sm:$0xff] }
 0x427   : > { %v3703_v29 = vpop.eup %3702  ;;  %3712 = vpow2.f32 %v2714_v16  ;;  %v5623_v50 = vsub.f32 %v5147_v44, %v2527_v58  ;;  %v5626_v53 = vsub.f32 %v6019_v32, %v2529_v18  ;;  %v6022_v44 = vld [vmem:[#allocation20_spill] sm:$0xff] }
 0x428   : > { %3714 = vpow2.f32 %v2716_v21 }
 0x429   : > { %6020 = vst [vmem:[#allocation16_spill] sm:$0xff] %v5626_v53  ;;  %v3705_v46 = vpop.eup %3704  ;;  %v2718_v56 = vmul.f32 1.442695, %v5623_v50  ;;  %v2720_v17 = vmul.f32 1.442695, %v5626_v53 }
 0x42a   : > { %2832 = vadd.xlane.f32.xlu1 %v3703_v29  ;;  %2834 = vadd.xlane.f32.xlu0 %v3705_v46  ;;  %v2531_v47 = vpop.xlane.xlu0 %2530  ;;  %v2533_v39 = vpop.xlane.xlu1 %2532 }
 0x42b   : > { %v3707_v4 = vpop.eup %3706  ;;  %3716 = vpow2.f32 %v2718_v56  ;;  %v5631_v16 = vsub.f32 %v6021_v27, %v2531_v47  ;;  %v5634_v58 = vsub.f32 %v6022_v44, %v2533_v39 }
 0x42c   : > { %3718 = vpow2.f32 %v2720_v17 }
 0x42d   : > { %v3709_v18 = vpop.eup %3708  ;;  %v2722_v21 = vmul.f32 1.442695, %v5631_v16  ;;  %v2724_v32 = vmul.f32 1.442695, %v5634_v58 }
 0x42e   : > { %2836 = vadd.xlane.f32.xlu1 %v3707_v4  ;;  %2838 = vadd.xlane.f32.xlu0 %v3709_v18  ;;  %v2535_v29 = vpop.xlane.xlu0 %2534  ;;  %v2537_v46 = vpop.xlane.xlu1 %2536 }
 0x42f   : > { %v3711_v53 = vpop.eup %3710  ;;  %3720 = vpow2.f32 %v2722_v21  ;;  %v5639_v56 = vsub.f32 %v5168_v62, %v2535_v29  ;;  %v5642_v27 = vsub.f32 %v5172_v61, %v2537_v46 }
 0x430   : > { %3722 = vpow2.f32 %v2724_v32 }
 0x431   : > { %v3713_v47 = vpop.eup %3712  ;;  %v2726_v17 = vmul.f32 1.442695, %v5639_v56  ;;  %v2728_v39 = vmul.f32 1.442695, %v5642_v27 }
 0x432   : > { %2840 = vadd.xlane.f32.xlu1 %v3711_v53  ;;  %2842 = vadd.xlane.f32.xlu0 %v3713_v47  ;;  %v2539_v4 = vpop.xlane.xlu0 %2538  ;;  %v2541_v44 = vpop.xlane.xlu1 %2540 }
 0x433   : > { %v3715_v18 = vpop.eup %3714  ;;  %3724 = vpow2.f32 %v2726_v17  ;;  %v5647_v21 = vsub.f32 %v5176_v31, %v2539_v4  ;;  %v5650_v62 = vsub.f32 %v5180_v36, %v2541_v44 }
 0x434   : > { %3726 = vpow2.f32 %v2728_v39 }
 0x435   : > { %v3717_v61 = vpop.eup %3716  ;;  %v2730_v32 = vmul.f32 1.442695, %v5647_v21  ;;  %v2732_v29 = vmul.f32 1.442695, %v5650_v62 }
 0x436   : > { %2844 = vadd.xlane.f32.xlu1 %v3715_v18  ;;  %2846 = vadd.xlane.f32.xlu0 %v3717_v61  ;;  %v2543_v53 = vpop.xlane.xlu0 %2542  ;;  %v2545_v46 = vpop.xlane.xlu1 %2544 }
 0x437   : > { %v3719_v47 = vpop.eup %3718  ;;  %3728 = vpow2.f32 %v2730_v32  ;;  %v5655_v17 = vsub.f32 %v5184_v24, %v2543_v53  ;;  %v5658_v31 = vsub.f32 %v5208_v45, %v2545_v46 }
 0x438   : > { %3730 = vpow2.f32 %v2732_v29 }
 0x439   : > { %v3721_v36 = vpop.eup %3720  ;;  %v2734_v39 = vmul.f32 1.442695, %v5655_v17  ;;  %v2736_v4 = vmul.f32 1.442695, %v5658_v31 }
 0x43a   : > { %2848 = vadd.xlane.f32.xlu1 %v3719_v47  ;;  %2850 = vadd.xlane.f32.xlu0 %v3721_v36  ;;  %v2547_v44 = vpop.xlane.xlu0 %2546  ;;  %v2549_v18 = vpop.xlane.xlu1 %2548 }
 0x43b   : > { %v3723_v61 = vpop.eup %3722  ;;  %3732 = vpow2.f32 %v2734_v39  ;;  %v5663_v32 = vsub.f32 %v5479_v33, %v2547_v44  ;;  %v5666_v24 = vsub.f32 %v5484_v15, %v2549_v18 }
 0x43c   : > { %3734 = vpow2.f32 %v2736_v4 }
 0x43d   : > { %v3725_v45 = vpop.eup %3724  ;;  %v2738_v29 = vmul.f32 1.442695, %v5663_v32  ;;  %v2740_v53 = vmul.f32 1.442695, %v5666_v24 }
 0x43e   : > { %2852 = vadd.xlane.f32.xlu1 %v3723_v61  ;;  %2854 = vadd.xlane.f32.xlu0 %v3725_v45  ;;  %v2551_v46 = vpop.xlane.xlu0 %2550  ;;  %v2553_v47 = vpop.xlane.xlu1 %2552 }
 0x43f   : > { %v3727_v36 = vpop.eup %3726  ;;  %3736 = vpow2.f32 %v2738_v29  ;;  %v5671_v39 = vsub.f32 %v5501_v14, %v2551_v46  ;;  %v5674_v33 = vsub.f32 %v5505_v8, %v2553_v47 }
 0x440   : > { %3738 = vpow2.f32 %v2740_v53 }
 0x441   : > { %v3729_v15 = vpop.eup %3728  ;;  %v2742_v4 = vmul.f32 1.442695, %v5671_v39  ;;  %v2744_v44 = vmul.f32 1.442695, %v5674_v33 }
 0x442   : > { %2856 = vadd.xlane.f32.xlu1 %v3727_v36  ;;  %2858 = vadd.xlane.f32.xlu0 %v3729_v15  ;;  %v2555_v18 = vpop.xlane.xlu0 %2554  ;;  %v2557_v61 = vpop.xlane.xlu1 %2556 }
 0x443   : > { %v3731_v45 = vpop.eup %3730  ;;  %3740 = vpow2.f32 %v2742_v4  ;;  %v5679_v29 = vsub.f32 %v5514_v26, %v2555_v18  ;;  %v5682_v14 = vsub.f32 %v5518_v9, %v2557_v61 }
 0x444   : > { %3742 = vpow2.f32 %v2744_v44 }
 0x445   : > { %v3733_v8 = vpop.eup %3732  ;;  %v2746_v53 = vmul.f32 1.442695, %v5679_v29  ;;  %v2748_v46 = vmul.f32 1.442695, %v5682_v14 }
 0x446   : > { %2860 = vadd.xlane.f32.xlu1 %v3731_v45  ;;  %2862 = vadd.xlane.f32.xlu0 %v3733_v8  ;;  %v2559_v47 = vpop.xlane.xlu0 %2558  ;;  %v2561_v36 = vpop.xlane.xlu1 %2560 }
 0x447   : > { %v3735_v15 = vpop.eup %3734  ;;  %3744 = vpow2.f32 %v2746_v53  ;;  %v5687_v4 = vsub.f32 %v5526_v57, %v2559_v47  ;;  %v5690_v26 = vsub.f32 %v5530_v30, %v2561_v36 }
 0x448   : > { %3746 = vpow2.f32 %v2748_v46 }
 0x449   : > { %v3737_v9 = vpop.eup %3736  ;;  %v2750_v44 = vmul.f32 1.442695, %v5687_v4  ;;  %v2752_v18 = vmul.f32 1.442695, %v5690_v26 }
 0x44a   : > { %2864 = vadd.xlane.f32.xlu1 %v3735_v15  ;;  %2866 = vadd.xlane.f32.xlu0 %v3737_v9  ;;  %v2563_v61 = vpop.xlane.xlu0 %2562  ;;  %v2565_v45 = vpop.xlane.xlu1 %2564 }
 0x44b   : > { %v3739_v8 = vpop.eup %3738  ;;  %3748 = vpow2.f32 %v2750_v44  ;;  %v5695_v53 = vsub.f32 %v5230_v25, %v2563_v61  ;;  %v5698_v57 = vsub.f32 %v5234_v60, %v2565_v45 }
 0x44c   : > { %3750 = vpow2.f32 %v2752_v18 }
 0x44d   : > { %v3741_v30 = vpop.eup %3740  ;;  %v2754_v46 = vmul.f32 1.442695, %v5695_v53  ;;  %v2756_v47 = vmul.f32 1.442695, %v5698_v57 }
 0x44e   : > { %2868 = vadd.xlane.f32.xlu1 %v3739_v8  ;;  %2870 = vadd.xlane.f32.xlu0 %v3741_v30  ;;  %v2567_v36 = vpop.xlane.xlu0 %2566  ;;  %v2569_v15 = vpop.xlane.xlu1 %2568 }
 0x44f   : > { %v3743_v9 = vpop.eup %3742  ;;  %3752 = vpow2.f32 %v2754_v46  ;;  %v5703_v44 = vsub.f32 %v5238_v28, %v2567_v36  ;;  %v5706_v25 = vsub.f32 %v5242_v52, %v2569_v15 }
 0x450   : > { %3754 = vpow2.f32 %v2756_v47 }
 0x451   : > { %v3745_v60 = vpop.eup %3744  ;;  %v2758_v18 = vmul.f32 1.442695, %v5703_v44  ;;  %v2760_v61 = vmul.f32 1.442695, %v5706_v25 }
 0x452   : > { %2872 = vadd.xlane.f32.xlu1 %v3743_v9  ;;  %2874 = vadd.xlane.f32.xlu0 %v3745_v60  ;;  %v2571_v45 = vpop.xlane.xlu0 %2570  ;;  %v2573_v8 = vpop.xlane.xlu1 %2572 }
 0x453   : > { %v3747_v30 = vpop.eup %3746  ;;  %3756 = vpow2.f32 %v2758_v18  ;;  %v5711_v46 = vsub.f32 %v5248_v3, %v2571_v45  ;;  %v5714_v28 = vsub.f32 %v5252_v23, %v2573_v8 }
 0x454   : > { %3758 = vpow2.f32 %v2760_v61 }
 0x455   : > { %v3749_v52 = vpop.eup %3748  ;;  %v2762_v47 = vmul.f32 1.442695, %v5711_v46  ;;  %v2764_v36 = vmul.f32 1.442695, %v5714_v28 }
 0x456   : > { %2876 = vadd.xlane.f32.xlu1 %v3747_v30  ;;  %2878 = vadd.xlane.f32.xlu0 %v3749_v52  ;;  %v2575_v15 = vpop.xlane.xlu0 %2574  ;;  %v2577_v9 = vpop.xlane.xlu1 %2576 }
 0x457   : > { %v3751_v60 = vpop.eup %3750  ;;  %3760 = vpow2.f32 %v2762_v47  ;;  %v5719_v18 = vsub.f32 %v5267_v37, %v2575_v15  ;;  %v5722_v3 = vsub.f32 %v5282_v40, %v2577_v9 }
 0x458   : > { %3762 = vpow2.f32 %v2764_v36 }
 0x459   : > { %v3753_v23 = vpop.eup %3752  ;;  %v2766_v61 = vmul.f32 1.442695, %v5719_v18  ;;  %v2768_v45 = vmul.f32 1.442695, %v5722_v3 }
 0x45a   : > { %2880 = vadd.xlane.f32.xlu1 %v3751_v60  ;;  %2882 = vadd.xlane.f32.xlu0 %v3753_v23  ;;  %v2579_v8 = vpop.xlane.xlu0 %2578  ;;  %v2581_v30 = vpop.xlane.xlu1 %2580 }
 0x45b   : > { %v3755_v52 = vpop.eup %3754  ;;  %3764 = vpow2.f32 %v2766_v61  ;;  %v5727_v47 = vsub.f32 %v5290_v42, %v2579_v8  ;;  %v5730_v37 = vsub.f32 %v5294_v43, %v2581_v30 }
 0x45c   : > { %3766 = vpow2.f32 %v2768_v45 }
 0x45d   : > { %v3757_v40 = vpop.eup %3756  ;;  %v2770_v36 = vmul.f32 1.442695, %v5727_v47  ;;  %v2772_v15 = vmul.f32 1.442695, %v5730_v37 }
 0x45e   : > { %2884 = vadd.xlane.f32.xlu1 %v3755_v52  ;;  %2886 = vadd.xlane.f32.xlu0 %v3757_v40  ;;  %v2583_v9 = vpop.xlane.xlu0 %2582  ;;  %v2585_v60 = vpop.xlane.xlu1 %2584 }
 0x45f   : > { %v3759_v23 = vpop.eup %3758  ;;  %3768 = vpow2.f32 %v2770_v36  ;;  %v5735_v61 = vsub.f32 %v5298_v10, %v2583_v9  ;;  %v5738_v42 = vsub.f32 %v5302_v20, %v2585_v60 }
 0x460   : > { %3770 = vpow2.f32 %v2772_v15 }
 0x461   : > { %v3761_v43 = vpop.eup %3760  ;;  %v2774_v45 = vmul.f32 1.442695, %v5735_v61  ;;  %v2776_v8 = vmul.f32 1.442695, %v5738_v42 }
 0x462   : > { %2888 = vadd.xlane.f32.xlu1 %v3759_v23  ;;  %2890 = vadd.xlane.f32.xlu0 %v3761_v43  ;;  %v2587_v30 = vpop.xlane.xlu0 %2586  ;;  %v2589_v52 = vpop.xlane.xlu1 %2588 }
 0x463   : > { %v3763_v40 = vpop.eup %3762  ;;  %3772 = vpow2.f32 %v2774_v45  ;;  %v5743_v36 = vsub.f32 %v5306_v1, %v2587_v30  ;;  %v5746_v10 = vsub.f32 %v5310_v2, %v2589_v52 }
 0x464   : > { %3774 = vpow2.f32 %v2776_v8 }
 0x465   : > { %v3765_v20 = vpop.eup %3764  ;;  %v2778_v15 = vmul.f32 1.442695, %v5743_v36  ;;  %v2780_v9 = vmul.f32 1.442695, %v5746_v10 }
 0x466   : > { %2892 = vadd.xlane.f32.xlu1 %v3763_v40  ;;  %2894 = vadd.xlane.f32.xlu0 %v3765_v20  ;;  %v2591_v60 = vpop.xlane.xlu0 %2590  ;;  %v2593_v23 = vpop.xlane.xlu1 %2592 }
 0x467   : > { %v3767_v43 = vpop.eup %3766  ;;  %3776 = vpow2.f32 %v2778_v15  ;;  %v5751_v45 = vsub.f32 %v5335_v48, %v2591_v60  ;;  %v5754_v1 = vsub.f32 %v5352_v11, %v2593_v23 }
 0x468   : > { %3778 = vpow2.f32 %v2780_v9 }
 0x469   : > { %v3769_v2 = vpop.eup %3768  ;;  %v2782_v8 = vmul.f32 1.442695, %v5751_v45  ;;  %v2784_v30 = vmul.f32 1.442695, %v5754_v1 }
 0x46a   : > { %2896 = vadd.xlane.f32.xlu1 %v3767_v43  ;;  %2898 = vadd.xlane.f32.xlu0 %v3769_v2  ;;  %v2595_v52 = vpop.xlane.xlu0 %2594  ;;  %v2597_v40 = vpop.xlane.xlu1 %2596 }
 0x46b   : > { %v3771_v20 = vpop.eup %3770  ;;  %3780 = vpow2.f32 %v2782_v8  ;;  %v5759_v15 = vsub.f32 %v5362_v38, %v2595_v52  ;;  %v5762_v48 = vsub.f32 %v5366_v7, %v2597_v40 }
 0x46c   : > { %3782 = vpow2.f32 %v2784_v30 }
 0x46d   : > { %v3773_v11 = vpop.eup %3772  ;;  %v2786_v9 = vmul.f32 1.442695, %v5759_v15  ;;  %v2788_v60 = vmul.f32 1.442695, %v5762_v48 }
 0x46e   : > { %2900 = vadd.xlane.f32.xlu1 %v3771_v20  ;;  %2902 = vadd.xlane.f32.xlu0 %v3773_v11  ;;  %v2599_v23 = vpop.xlane.xlu0 %2598  ;;  %v2601_v43 = vpop.xlane.xlu1 %2600 }
 0x46f   : > { %v3775_v2 = vpop.eup %3774  ;;  %3784 = vpow2.f32 %v2786_v9  ;;  %v5767_v8 = vsub.f32 %v5370_v12, %v2599_v23  ;;  %v5770_v38 = vsub.f32 %v5374_v41, %v2601_v43 }
 0x470   : > { %3786 = vpow2.f32 %v2788_v60 }
 0x471   : > { %v3777_v7 = vpop.eup %3776  ;;  %v2790_v30 = vmul.f32 1.442695, %v5767_v8  ;;  %v2792_v52 = vmul.f32 1.442695, %v5770_v38 }
 0x472   : > { %2904 = vadd.xlane.f32.xlu1 %v3775_v2  ;;  %2906 = vadd.xlane.f32.xlu0 %v3777_v7  ;;  %v2603_v40 = vpop.xlane.xlu0 %2602  ;;  %v2605_v20 = vpop.xlane.xlu1 %2604 }
 0x473   : > { %v3779_v11 = vpop.eup %3778  ;;  %3788 = vpow2.f32 %v2790_v30  ;;  %v5775_v9 = vsub.f32 %v5380_v35, %v2603_v40  ;;  %v5778_v12 = vsub.f32 %v5384_v55, %v2605_v20 }
 0x474   : > { %3790 = vpow2.f32 %v2792_v52 }
 0x475   : > { %v3781_v41 = vpop.eup %3780  ;;  %v2794_v60 = vmul.f32 1.442695, %v5775_v9  ;;  %v2796_v23 = vmul.f32 1.442695, %v5778_v12 }
 0x476   : > { %2908 = vadd.xlane.f32.xlu1 %v3779_v11  ;;  %2910 = vadd.xlane.f32.xlu0 %v3781_v41  ;;  %v2607_v43 = vpop.xlane.xlu0 %2606  ;;  %v2609_v2 = vpop.xlane.xlu1 %2608 }
 0x477   : > { %v3783_v7 = vpop.eup %3782  ;;  %3792 = vpow2.f32 %v2794_v60  ;;  %v5783_v30 = vsub.f32 %v5409_v6, %v2607_v43  ;;  %v5786_v35 = vsub.f32 %v5428_v49, %v2609_v2 }
 0x478   : > { %3794 = vpow2.f32 %v2796_v23 }
 0x479   : > { %6023 = vst [vmem:[#allocation17_spill] sm:$0xff] %v5783_v30  ;;  %6024 = vst [vmem:[#allocation18_spill] sm:$0xff] %v5786_v35  ;;  %v3785_v55 = vpop.eup %3784  ;;  %v2798_v52 = vmul.f32 1.442695, %v5783_v30  ;;  %v2800_v40 = vmul.f32 1.442695, %v5786_v35 }
 0x47a   : > { %2912 = vadd.xlane.f32.xlu1 %v3783_v7  ;;  %2914 = vadd.xlane.f32.xlu0 %v3785_v55  ;;  %v2611_v20 = vpop.xlane.xlu0 %2610  ;;  %v2613_v11 = vpop.xlane.xlu1 %2612  ;;  %v6027_v35 = vld [vmem:[#allocation9_spill] sm:$0xff] }
 0x47b   : > { %v3787_v41 = vpop.eup %3786  ;;  %3796 = vpow2.f32 %v2798_v52  ;;  %v5791_v60 = vsub.f32 %v5438_v13, %v2611_v20  ;;  %v5794_v6 = vsub.f32 %v5442_v51, %v2613_v11  ;;  %v6029_v13 = vld [vmem:[#allocation10_spill] sm:$0xff] }
 0x47c   : > { %3798 = vpow2.f32 %v2800_v40 }
 0x47d   : > { %6025 = vst [vmem:[#allocation19_spill] sm:$0xff] %v5791_v60  ;;  %6026 = vst [vmem:[#allocation20_spill] sm:$0xff] %v5794_v6  ;;  %v3789_v49 = vpop.eup %3788  ;;  %v2802_v23 = vmul.f32 1.442695, %v5791_v60  ;;  %v2804_v43 = vmul.f32 1.442695, %v5794_v6 }
 0x47e   : > { %2916 = vadd.xlane.f32.xlu1 %v3787_v41  ;;  %2918 = vadd.xlane.f32.xlu0 %v3789_v49  ;;  %v2615_v2 = vpop.xlane.xlu0 %2614  ;;  %v2617_v7 = vpop.xlane.xlu1 %2616  ;;  %v6031_v60 = vld [vmem:[#allocation11_spill] sm:$0xff] }
 0x47f   : > { %v3791_v55 = vpop.eup %3790  ;;  %3800 = vpow2.f32 %v2802_v23  ;;  %v5799_v52 = vsub.f32 %v6027_v35, %v2615_v2  ;;  %v5802_v20 = vsub.f32 %v6029_v13, %v2617_v7  ;;  %v6033_v35 = vld [vmem:[#allocation21_spill] sm:$0xff] }
 0x480   : > { %3802 = vpow2.f32 %v2804_v43 }
 0x481   : > { %6028 = vst [vmem:[#allocation9_spill] sm:$0xff] %v5799_v52  ;;  %6030 = vst [vmem:[#allocation10_spill] sm:$0xff] %v5802_v20  ;;  %v3793_v51 = vpop.eup %3792  ;;  %v2806_v40 = vmul.f32 1.442695, %v5799_v52  ;;  %v2808_v11 = vmul.f32 1.442695, %v5802_v20 }
 0x482   : > { %2920 = vadd.xlane.f32.xlu1 %v3791_v55  ;;  %2922 = vadd.xlane.f32.xlu0 %v3793_v51  ;;  %v2619_v41 = vpop.xlane.xlu0 %2618  ;;  %v2621_v49 = vpop.xlane.xlu1 %2620  ;;  %v6035_v52 = vld [vmem:[#allocation5_spill] sm:$0xff] }
 0x483   : > { %v3795_v6 = vpop.eup %3794  ;;  %3804 = vpow2.f32 %v2806_v40  ;;  %v5807_v23 = vsub.f32 %v6031_v60, %v2619_v41  ;;  %v5810_v2 = vsub.f32 %v6033_v35, %v2621_v49  ;;  %v6037_v60 = vld [vmem:[#allocation6_spill] sm:$0xff] }
 0x484   : > { %3806 = vpow2.f32 %v2808_v11 }
 0x485   : > { %6032 = vst [vmem:[#allocation11_spill] sm:$0xff] %v5807_v23  ;;  %6034 = vst [vmem:[#allocation21_spill] sm:$0xff] %v5810_v2  ;;  %v3797_v7 = vpop.eup %3796  ;;  %v2810_v43 = vmul.f32 1.442695, %v5807_v23  ;;  %v2812_v13 = vmul.f32 1.442695, %v5810_v2 }
 0x486   : > { %2924 = vadd.xlane.f32.xlu1 %v3795_v6  ;;  %2926 = vadd.xlane.f32.xlu0 %v3797_v7  ;;  %v2623_v55 = vpop.xlane.xlu0 %2622  ;;  %v2625_v51 = vpop.xlane.xlu1 %2624 }
 0x487   : > { %v3799_v20 = vpop.eup %3798  ;;  %3808 = vpow2.f32 %v2810_v43  ;;  %v5815_v40 = vsub.f32 %v6035_v52, %v2623_v55  ;;  %v5818_v41 = vsub.f32 %v6037_v60, %v2625_v51 }
 0x488   : > { %3810 = vpow2.f32 %v2812_v13 }
 0x489   : > { %6036 = vst [vmem:[#allocation5_spill] sm:$0xff] %v5815_v40  ;;  %6038 = vst [vmem:[#allocation6_spill] sm:$0xff] %v5818_v41  ;;  %v3801_v49 = vpop.eup %3800  ;;  %v2814_v11 = vmul.f32 1.442695, %v5815_v40  ;;  %v2816_v35 = vmul.f32 1.442695, %v5818_v41 }
 0x48a   : > { %2928 = vadd.xlane.f32.xlu1 %v3799_v20  ;;  %2930 = vadd.xlane.f32.xlu0 %v3801_v49  ;;  %v3803_v6 = vpop.eup %3802  ;;  %v6039_v41 = vld [vmem:[#allocation7_spill] sm:$0xff] }
 0x48b   : > { %3812 = vpow2.f32 %v2814_v11 }
 0x48c   : > { %3814 = vpow2.f32 %v2816_v35 }
 0x48d   : > { %v3805_v7 = vpop.eup %3804 }
 0x48e   : > { %2932 = vadd.xlane.f32.xlu1 %v3803_v6  ;;  %2934 = vadd.xlane.f32.xlu0 %v3805_v7  ;;  %v3807_v43 = vpop.eup %3806 }
 0x491   : > { %v3809_v52 = vpop.eup %3808 }
 0x492   : > { %2936 = vadd.xlane.f32.xlu1 %v3807_v43  ;;  %2938 = vadd.xlane.f32.xlu0 %v3809_v52  ;;  %v3811_v55 = vpop.eup %3810 }
 0x495   : > { %v3813_v51 = vpop.eup %3812 }
 0x496   : > { %2940 = vadd.xlane.f32.xlu1 %v3811_v55  ;;  %2942 = vadd.xlane.f32.xlu0 %v3813_v51  ;;  %v3815_v13 = vpop.eup %3814 }
 0x49a   : > { %2944 = vadd.xlane.f32.xlu1 %v3815_v13 }
 0x4a7   : > { %v2819_v60 = vpop.xlane.xlu0 %2818 }
 0x4a8   : > { %3816 = vlog2.f32 %v2819_v60 }
 0x4ab   : > { %v2821_v20 = vpop.xlane.xlu1 %2820  ;;  %v2823_v49 = vpop.xlane.xlu0 %2822 }
 0x4ac   : > { %3818 = vlog2.f32 %v2821_v20 }
 0x4ad   : > { %3820 = vlog2.f32 %v2823_v49 }
 0x4af   : > { %v2825_v11 = vpop.xlane.xlu1 %2824  ;;  %v2827_v35 = vpop.xlane.xlu0 %2826 }
 0x4b0   : > { %3822 = vlog2.f32 %v2825_v11 }
 0x4b1   : > { %3824 = vlog2.f32 %v2827_v35  ;;  %v6040_v35 = vld [vmem:[#allocation8_spill] sm:$0xff] }
 0x4b2   : > { %v3817_v6 = vpop.eup %3816 }
 0x4b3   : > { %v2947_v7 = vmul.f32 0.6931472, %v3817_v6  ;;  %v2829_v43 = vpop.xlane.xlu1 %2828  ;;  %v2831_v52 = vpop.xlane.xlu0 %2830 }
 0x4b4   : > { %3826 = vlog2.f32 %v2829_v43 }
 0x4b5   : > { %v3074_v55 = vsub.f32 %v6039_v41, %v2947_v7  ;;  %3828 = vlog2.f32 %v2831_v52  ;;  %v6041_v52 = vld [vmem:[#allocation12_spill] sm:$0xff] }
 0x4b6   : > { %v3819_v51 = vpop.eup %3818 }
 0x4b7   : > { %v3821_v13 = vpop.eup %3820  ;;  %3138 = vst [vmem:[#allocation2] sm:$0xff] %v3074_v55  ;;  %v2949_v60 = vmul.f32 0.6931472, %v3819_v51  ;;  %v2833_v40 = vpop.xlane.xlu1 %2832 }
 0x4b8   : > { %v2835_v2 = vpop.xlane.xlu0 %2834  ;;  %v2951_v20 = vmul.f32 0.6931472, %v3821_v13  ;;  %3830 = vlog2.f32 %v2833_v40 }
 0x4b9   : > { %v3075_v49 = vsub.f32 %v5575_v59, %v2949_v60  ;;  %3832 = vlog2.f32 %v2835_v2 }
 0x4ba   : > { %v3823_v11 = vpop.eup %3822  ;;  %v3076_v6 = vsub.f32 %v6040_v35, %v2951_v20 }
 0x4bb   : > { %v3825_v23 = vpop.eup %3824  ;;  %3139 = vst [vmem:[#allocation2 + $0x8] sm:$0xff] %v3075_v49  ;;  %v2953_v43 = vmul.f32 0.6931472, %v3823_v11  ;;  %v2837_v30 = vpop.xlane.xlu1 %2836  ;;  %v6042_v49 = vld [vmem:[#allocation13_spill] sm:$0xff] }
 0x4bc   : > { %v2839_v41 = vpop.xlane.xlu0 %2838  ;;  %3140 = vst [vmem:[#allocation2 + $0x10] sm:$0xff] %v3076_v6  ;;  %v2955_v7 = vmul.f32 0.6931472, %v3825_v23  ;;  %3834 = vlog2.f32 %v2837_v30 }
 0x4bd   : > { %v3077_v55 = vsub.f32 %v6041_v52, %v2953_v43  ;;  %3836 = vlog2.f32 %v2839_v41 }
 0x4be   : > { %v3827_v51 = vpop.eup %3826  ;;  %v3078_v40 = vsub.f32 %v5583_v0, %v2955_v7 }
 0x4bf   : > { %v3829_v13 = vpop.eup %3828  ;;  %3141 = vst [vmem:[#allocation2 + $0x18] sm:$0xff] %v3077_v55  ;;  %v2957_v59 = vmul.f32 0.6931472, %v3827_v51  ;;  %v2841_v2 = vpop.xlane.xlu1 %2840 }
 0x4c0   : > { %v2843_v60 = vpop.xlane.xlu0 %2842  ;;  %3142 = vst [vmem:[#allocation2 + $0x20] sm:$0xff] %v3078_v40  ;;  %v2959_v20 = vmul.f32 0.6931472, %v3829_v13  ;;  %3838 = vlog2.f32 %v2841_v2 }
 0x4c1   : > { %v3079_v11 = vsub.f32 %v6042_v49, %v2957_v59  ;;  %3840 = vlog2.f32 %v2843_v60 }
 0x4c2   : > { %v3831_v35 = vpop.eup %3830  ;;  %v3080_v30 = vsub.f32 %v5591_v63, %v2959_v20 }
 0x4c3   : > { %v3833_v23 = vpop.eup %3832  ;;  %3143 = vst [vmem:[#allocation2 + $0x28] sm:$0xff] %v3079_v11  ;;  %v2961_v6 = vmul.f32 0.6931472, %v3831_v35  ;;  %v2845_v43 = vpop.xlane.xlu1 %2844 }
 0x4c4   : > { %v2847_v41 = vpop.xlane.xlu0 %2846  ;;  %3144 = vst [vmem:[#allocation2 + $0x30] sm:$0xff] %v3080_v30  ;;  %v2963_v0 = vmul.f32 0.6931472, %v3833_v23  ;;  %3842 = vlog2.f32 %v2845_v43 }
 0x4c5   : > { %v3081_v7 = vsub.f32 %v5594_v5, %v2961_v6  ;;  %3844 = vlog2.f32 %v2847_v41  ;;  %v6043_v6 = vld [vmem:[#allocation14_spill] sm:$0xff] }
 0x4c6   : > { %v3835_v52 = vpop.eup %3834  ;;  %v3082_v55 = vsub.f32 %v5599_v34, %v2963_v0 }
 0x4c7   : > { %v3837_v51 = vpop.eup %3836  ;;  %3145 = vst [vmem:[#allocation2 + $0x38] sm:$0xff] %v3081_v7  ;;  %v2965_v40 = vmul.f32 0.6931472, %v3835_v52  ;;  %v2849_v13 = vpop.xlane.xlu1 %2848  ;;  %v6044_v52 = vld [vmem:[#allocation15_spill] sm:$0xff] }
 0x4c8   : > { %v2851_v59 = vpop.xlane.xlu0 %2850  ;;  %3146 = vst [vmem:[#allocation2 + $0x40] sm:$0xff] %v3082_v55  ;;  %v2967_v63 = vmul.f32 0.6931472, %v3837_v51  ;;  %3846 = vlog2.f32 %v2849_v13 }
 0x4c9   : > { %v3083_v2 = vsub.f32 %v5602_v54, %v2965_v40  ;;  %3848 = vlog2.f32 %v2851_v59 }
 0x4ca   : > { %v3839_v60 = vpop.eup %3838  ;;  %v3084_v20 = vsub.f32 %v5607_v19, %v2967_v63 }
 0x4cb   : > { %v3841_v49 = vpop.eup %3840  ;;  %3147 = vst [vmem:[#allocation2 + $0x48] sm:$0xff] %v3083_v2  ;;  %v2969_v5 = vmul.f32 0.6931472, %v3839_v60  ;;  %v2853_v11 = vpop.xlane.xlu1 %2852  ;;  %v6045_v60 = vld [vmem:[#allocation16_spill] sm:$0xff] }
 0x4cc   : > { %v2855_v35 = vpop.xlane.xlu0 %2854  ;;  %3148 = vst [vmem:[#allocation2 + $0x50] sm:$0xff] %v3084_v20  ;;  %v2971_v34 = vmul.f32 0.6931472, %v3841_v49  ;;  %3850 = vlog2.f32 %v2853_v11 }
 0x4cd   : > { %v3085_v30 = vsub.f32 %v5610_v22, %v2969_v5  ;;  %3852 = vlog2.f32 %v2855_v35 }
 0x4ce   : > { %v3843_v23 = vpop.eup %3842  ;;  %v3086_v43 = vsub.f32 %v6043_v6, %v2971_v34 }
 0x4cf   : > { %v3845_v41 = vpop.eup %3844  ;;  %3149 = vst [vmem:[#allocation2 + $0x58] sm:$0xff] %v3085_v30  ;;  %v2973_v54 = vmul.f32 0.6931472, %v3843_v23  ;;  %v2857_v0 = vpop.xlane.xlu1 %2856 }
 0x4d0   : > { %v2859_v7 = vpop.xlane.xlu0 %2858  ;;  %3150 = vst [vmem:[#allocation2 + $0x60] sm:$0xff] %v3086_v43  ;;  %v2975_v19 = vmul.f32 0.6931472, %v3845_v41  ;;  %3854 = vlog2.f32 %v2857_v0 }
 0x4d1   : > { %v3087_v55 = vsub.f32 %v6044_v52, %v2973_v54  ;;  %3856 = vlog2.f32 %v2859_v7 }
 0x4d2   : > { %v3847_v51 = vpop.eup %3846  ;;  %v3088_v40 = vsub.f32 %v5623_v50, %v2975_v19 }
 0x4d3   : > { %v3849_v13 = vpop.eup %3848  ;;  %3151 = vst [vmem:[#allocation2 + $0x68] sm:$0xff] %v3087_v55  ;;  %v2977_v22 = vmul.f32 0.6931472, %v3847_v51  ;;  %v2861_v59 = vpop.xlane.xlu1 %2860 }
 0x4d4   : > { %v2863_v63 = vpop.xlane.xlu0 %2862  ;;  %3152 = vst [vmem:[#allocation2 + $0x70] sm:$0xff] %v3088_v40  ;;  %v2979_v2 = vmul.f32 0.6931472, %v3849_v13  ;;  %3858 = vlog2.f32 %v2861_v59 }
 0x4d5   : > { %v3089_v20 = vsub.f32 %v6045_v60, %v2977_v22  ;;  %3860 = vlog2.f32 %v2863_v63 }
 0x4d6   : > { %v3851_v49 = vpop.eup %3850  ;;  %v3090_v5 = vsub.f32 %v5631_v16, %v2979_v2 }
 0x4d7   : > { %v3853_v11 = vpop.eup %3852  ;;  %3153 = vst [vmem:[#allocation2 + $0x78] sm:$0xff] %v3089_v20  ;;  %v2981_v35 = vmul.f32 0.6931472, %v3851_v49  ;;  %v2865_v34 = vpop.xlane.xlu1 %2864 }
 0x4d8   : > { %v2867_v30 = vpop.xlane.xlu0 %2866  ;;  %3154 = vst [vmem:[#allocation2 + $0x80] sm:$0xff] %v3090_v5  ;;  %v2983_v50 = vmul.f32 0.6931472, %v3853_v11  ;;  %3862 = vlog2.f32 %v2865_v34 }
 0x4d9   : > { %v3091_v23 = vsub.f32 %v5634_v58, %v2981_v35  ;;  %3864 = vlog2.f32 %v2867_v30 }
 0x4da   : > { %v3855_v6 = vpop.eup %3854  ;;  %v3092_v43 = vsub.f32 %v5639_v56, %v2983_v50 }
 0x4db   : > { %v3857_v41 = vpop.eup %3856  ;;  %3155 = vst [vmem:[#allocation2 + $0x88] sm:$0xff] %v3091_v23  ;;  %v2985_v54 = vmul.f32 0.6931472, %v3855_v6  ;;  %v2869_v0 = vpop.xlane.xlu1 %2868 }
 0x4dc   : > { %v2871_v7 = vpop.xlane.xlu0 %2870  ;;  %3156 = vst [vmem:[#allocation2 + $0x90] sm:$0xff] %v3092_v43  ;;  %v2987_v16 = vmul.f32 0.6931472, %v3857_v41  ;;  %3866 = vlog2.f32 %v2869_v0 }
 0x4dd   : > { %v3093_v19 = vsub.f32 %v5642_v27, %v2985_v54  ;;  %3868 = vlog2.f32 %v2871_v7 }
 0x4de   : > { %v3859_v52 = vpop.eup %3858  ;;  %v3094_v55 = vsub.f32 %v5647_v21, %v2987_v16 }
 0x4df   : > { %v3861_v51 = vpop.eup %3860  ;;  %3157 = vst [vmem:[#allocation2 + $0x98] sm:$0xff] %v3093_v19  ;;  %v2989_v58 = vmul.f32 0.6931472, %v3859_v52  ;;  %v2873_v40 = vpop.xlane.xlu1 %2872 }
 0x4e0   : > { %v2875_v13 = vpop.xlane.xlu0 %2874  ;;  %3158 = vst [vmem:[#allocation2 + $0xa0] sm:$0xff] %v3094_v55  ;;  %v2991_v56 = vmul.f32 0.6931472, %v3861_v51  ;;  %3870 = vlog2.f32 %v2873_v40 }
 0x4e1   : > { %v3095_v22 = vsub.f32 %v5650_v62, %v2989_v58  ;;  %3872 = vlog2.f32 %v2875_v13 }
 0x4e2   : > { %v3863_v59 = vpop.eup %3862  ;;  %v3096_v63 = vsub.f32 %v5655_v17, %v2991_v56 }
 0x4e3   : > { %v3865_v2 = vpop.eup %3864  ;;  %3159 = vst [vmem:[#allocation2 + $0xa8] sm:$0xff] %v3095_v22  ;;  %v2993_v27 = vmul.f32 0.6931472, %v3863_v59  ;;  %v2877_v60 = vpop.xlane.xlu1 %2876 }
 0x4e4   : > { %v2879_v20 = vpop.xlane.xlu0 %2878  ;;  %3160 = vst [vmem:[#allocation2 + $0xb0] sm:$0xff] %v3096_v63  ;;  %v2995_v21 = vmul.f32 0.6931472, %v3865_v2  ;;  %3874 = vlog2.f32 %v2877_v60 }
 0x4e5   : > { %v3097_v49 = vsub.f32 %v5658_v31, %v2993_v27  ;;  %3876 = vlog2.f32 %v2879_v20 }
 0x4e6   : > { %v3867_v5 = vpop.eup %3866  ;;  %v3098_v11 = vsub.f32 %v5663_v32, %v2995_v21 }
 0x4e7   : > { %v3869_v35 = vpop.eup %3868  ;;  %3161 = vst [vmem:[#allocation2 + $0xb8] sm:$0xff] %v3097_v49  ;;  %v2997_v62 = vmul.f32 0.6931472, %v3867_v5  ;;  %v2881_v34 = vpop.xlane.xlu1 %2880 }
 0x4e8   : > { %v2883_v30 = vpop.xlane.xlu0 %2882  ;;  %3162 = vst [vmem:[#allocation2 + $0xc0] sm:$0xff] %v3098_v11  ;;  %v2999_v17 = vmul.f32 0.6931472, %v3869_v35  ;;  %3878 = vlog2.f32 %v2881_v34 }
 0x4e9   : > { %v3099_v50 = vsub.f32 %v5666_v24, %v2997_v62  ;;  %3880 = vlog2.f32 %v2883_v30 }
 0x4ea   : > { %v3871_v23 = vpop.eup %3870  ;;  %v3100_v6 = vsub.f32 %v5671_v39, %v2999_v17 }
 0x4eb   : > { %v3873_v43 = vpop.eup %3872  ;;  %3163 = vst [vmem:[#allocation2 + $0xc8] sm:$0xff] %v3099_v50  ;;  %v3001_v31 = vmul.f32 0.6931472, %v3871_v23  ;;  %v2885_v41 = vpop.xlane.xlu1 %2884 }
 0x4ec   : > { %v2887_v54 = vpop.xlane.xlu0 %2886  ;;  %3164 = vst [vmem:[#allocation2 + $0xd0] sm:$0xff] %v3100_v6  ;;  %v3003_v32 = vmul.f32 0.6931472, %v3873_v43  ;;  %3882 = vlog2.f32 %v2885_v41 }
 0x4ed   : > { %v3101_v0 = vsub.f32 %v5674_v33, %v3001_v31  ;;  %3884 = vlog2.f32 %v2887_v54 }
 0x4ee   : > { %v3875_v7 = vpop.eup %3874  ;;  %v3102_v16 = vsub.f32 %v5679_v29, %v3003_v32 }
 0x4ef   : > { %v3877_v19 = vpop.eup %3876  ;;  %3165 = vst [vmem:[#allocation2 + $0xd8] sm:$0xff] %v3101_v0  ;;  %v3005_v24 = vmul.f32 0.6931472, %v3875_v7  ;;  %v2889_v52 = vpop.xlane.xlu1 %2888 }
 0x4f0   : > { %v2891_v55 = vpop.xlane.xlu0 %2890  ;;  %3166 = vst [vmem:[#allocation2 + $0xe0] sm:$0xff] %v3102_v16  ;;  %v3007_v39 = vmul.f32 0.6931472, %v3877_v19  ;;  %3886 = vlog2.f32 %v2889_v52 }
 0x4f1   : > { %v3103_v51 = vsub.f32 %v5682_v14, %v3005_v24  ;;  %3888 = vlog2.f32 %v2891_v55 }
 0x4f2   : > { %v3879_v58 = vpop.eup %3878  ;;  %v3104_v40 = vsub.f32 %v5687_v4, %v3007_v39 }
 0x4f3   : > { %v3881_v13 = vpop.eup %3880  ;;  %3167 = vst [vmem:[#allocation2 + $0xe8] sm:$0xff] %v3103_v51  ;;  %v3009_v33 = vmul.f32 0.6931472, %v3879_v58  ;;  %v2893_v56 = vpop.xlane.xlu1 %2892 }
 0x4f4   : > { %v2895_v22 = vpop.xlane.xlu0 %2894  ;;  %3168 = vst [vmem:[#allocation2 + $0xf0] sm:$0xff] %v3104_v40  ;;  %v3011_v29 = vmul.f32 0.6931472, %v3881_v13  ;;  %3890 = vlog2.f32 %v2893_v56 }
 0x4f5   : > { %v3105_v59 = vsub.f32 %v5690_v26, %v3009_v33  ;;  %3892 = vlog2.f32 %v2895_v22 }
 0x4f6   : > { %v3883_v63 = vpop.eup %3882  ;;  %v3106_v2 = vsub.f32 %v5695_v53, %v3011_v29 }
 0x4f7   : > { %v3885_v27 = vpop.eup %3884  ;;  %3169 = vst [vmem:[#allocation2 + $0xf8] sm:$0xff] %v3105_v59  ;;  %v3013_v14 = vmul.f32 0.6931472, %v3883_v63  ;;  %v2897_v60 = vpop.xlane.xlu1 %2896 }
 0x4f8   : > { %v2899_v20 = vpop.xlane.xlu0 %2898  ;;  %3170 = vst [vmem:[#allocation2 + $0x100] sm:$0xff] %v3106_v2  ;;  %v3015_v4 = vmul.f32 0.6931472, %v3885_v27  ;;  %3894 = vlog2.f32 %v2897_v60 }
 0x4f9   : > { %v3107_v21 = vsub.f32 %v5698_v57, %v3013_v14  ;;  %3896 = vlog2.f32 %v2899_v20 }
 0x4fa   : > { %v3887_v49 = vpop.eup %3886  ;;  %v3108_v5 = vsub.f32 %v5703_v44, %v3015_v4 }
 0x4fb   : > { %v3889_v11 = vpop.eup %3888  ;;  %3171 = vst [vmem:[#allocation2 + $0x108] sm:$0xff] %v3107_v21  ;;  %v3017_v26 = vmul.f32 0.6931472, %v3887_v49  ;;  %v2901_v35 = vpop.xlane.xlu1 %2900 }
 0x4fc   : > { %v2903_v62 = vpop.xlane.xlu0 %2902  ;;  %3172 = vst [vmem:[#allocation2 + $0x110] sm:$0xff] %v3108_v5  ;;  %v3019_v53 = vmul.f32 0.6931472, %v3889_v11  ;;  %3898 = vlog2.f32 %v2901_v35 }
 0x4fd   : > { %v3109_v34 = vsub.f32 %v5706_v25, %v3017_v26  ;;  %3900 = vlog2.f32 %v2903_v62 }
 0x4fe   : > { %v3891_v30 = vpop.eup %3890  ;;  %v3110_v17 = vsub.f32 %v5711_v46, %v3019_v53 }
 0x4ff   : > { %v3893_v50 = vpop.eup %3892  ;;  %3173 = vst [vmem:[#allocation2 + $0x118] sm:$0xff] %v3109_v34  ;;  %v3021_v57 = vmul.f32 0.6931472, %v3891_v30  ;;  %v2905_v23 = vpop.xlane.xlu1 %2904 }
 0x500   : > { %v2907_v6 = vpop.xlane.xlu0 %2906  ;;  %3174 = vst [vmem:[#allocation2 + $0x120] sm:$0xff] %v3110_v17  ;;  %v3023_v44 = vmul.f32 0.6931472, %v3893_v50  ;;  %3902 = vlog2.f32 %v2905_v23 }
 0x501   : > { %v3111_v43 = vsub.f32 %v5714_v28, %v3021_v57  ;;  %3904 = vlog2.f32 %v2907_v6 }
 0x502   : > { %v3895_v31 = vpop.eup %3894  ;;  %v3112_v41 = vsub.f32 %v5719_v18, %v3023_v44 }
 0x503   : > { %v3897_v54 = vpop.eup %3896  ;;  %3175 = vst [vmem:[#allocation2 + $0x128] sm:$0xff] %v3111_v43  ;;  %v3025_v25 = vmul.f32 0.6931472, %v3895_v31  ;;  %v2909_v32 = vpop.xlane.xlu1 %2908 }
 0x504   : > { %v2911_v0 = vpop.xlane.xlu0 %2910  ;;  %3176 = vst [vmem:[#allocation2 + $0x130] sm:$0xff] %v3112_v41  ;;  %v3027_v46 = vmul.f32 0.6931472, %v3897_v54  ;;  %3906 = vlog2.f32 %v2909_v32  ;;  %v6046_v32 = vld [vmem:[#allocation17_spill] sm:$0xff] }
 0x505   : > { %v3113_v7 = vsub.f32 %v5722_v3, %v3025_v25  ;;  %3908 = vlog2.f32 %v2911_v0 }
 0x506   : > { %v3899_v16 = vpop.eup %3898  ;;  %v3114_v19 = vsub.f32 %v5727_v47, %v3027_v46 }
 0x507   : > { %v3901_v24 = vpop.eup %3900  ;;  %3177 = vst [vmem:[#allocation2 + $0x138] sm:$0xff] %v3113_v7  ;;  %v3029_v28 = vmul.f32 0.6931472, %v3899_v16  ;;  %v2913_v52 = vpop.xlane.xlu1 %2912 }
 0x508   : > { %v2915_v55 = vpop.xlane.xlu0 %2914  ;;  %3178 = vst [vmem:[#allocation2 + $0x140] sm:$0xff] %v3114_v19  ;;  %v3031_v18 = vmul.f32 0.6931472, %v3901_v24  ;;  %3910 = vlog2.f32 %v2913_v52  ;;  %v6047_v19 = vld [vmem:[#allocation18_spill] sm:$0xff]  ;;  %v6048_v52 = vld [vmem:[#allocation19_spill] sm:$0xff] }
 0x509   : > { %v3115_v39 = vsub.f32 %v5730_v37, %v3029_v28  ;;  %3912 = vlog2.f32 %v2915_v55 }
 0x50a   : > { %v3903_v51 = vpop.eup %3902  ;;  %v3116_v58 = vsub.f32 %v5735_v61, %v3031_v18 }
 0x50b   : > { %v3905_v40 = vpop.eup %3904  ;;  %3179 = vst [vmem:[#allocation2 + $0x148] sm:$0xff] %v3115_v39  ;;  %v3033_v3 = vmul.f32 0.6931472, %v3903_v51  ;;  %v2917_v13 = vpop.xlane.xlu1 %2916 }
 0x50c   : > { %v2919_v33 = vpop.xlane.xlu0 %2918  ;;  %3180 = vst [vmem:[#allocation2 + $0x150] sm:$0xff] %v3116_v58  ;;  %v3035_v47 = vmul.f32 0.6931472, %v3905_v40  ;;  %3914 = vlog2.f32 %v2917_v13  ;;  %v6049_v58 = vld [vmem:[#allocation20_spill] sm:$0xff]  ;;  %v6050_v13 = vld [vmem:[#allocation9_spill] sm:$0xff] }
 0x50d   : > { %v3117_v56 = vsub.f32 %v5738_v42, %v3033_v3  ;;  %3916 = vlog2.f32 %v2919_v33 }
 0x50e   : > { %v3907_v22 = vpop.eup %3906  ;;  %v3118_v29 = vsub.f32 %v5743_v36, %v3035_v47 }
 0x50f   : > { %v3909_v59 = vpop.eup %3908  ;;  %3181 = vst [vmem:[#allocation2 + $0x158] sm:$0xff] %v3117_v56  ;;  %v3037_v37 = vmul.f32 0.6931472, %v3907_v22  ;;  %v2921_v63 = vpop.xlane.xlu1 %2920 }
 0x510   : > { %v2923_v2 = vpop.xlane.xlu0 %2922  ;;  %3182 = vst [vmem:[#allocation2 + $0x160] sm:$0xff] %v3118_v29  ;;  %v3039_v61 = vmul.f32 0.6931472, %v3909_v59  ;;  %3918 = vlog2.f32 %v2921_v63  ;;  %v6051_v29 = vld [vmem:[#allocation10_spill] sm:$0xff]  ;;  %v6052_v63 = vld [vmem:[#allocation11_spill] sm:$0xff] }
 0x511   : > { %v3119_v27 = vsub.f32 %v5746_v10, %v3037_v37  ;;  %3920 = vlog2.f32 %v2923_v2 }
 0x512   : > { %v3911_v14 = vpop.eup %3910  ;;  %v3120_v60 = vsub.f32 %v5751_v45, %v3039_v61 }
 0x513   : > { %v3913_v20 = vpop.eup %3912  ;;  %3183 = vst [vmem:[#allocation2 + $0x168] sm:$0xff] %v3119_v27  ;;  %v3041_v42 = vmul.f32 0.6931472, %v3911_v14  ;;  %v2925_v4 = vpop.xlane.xlu1 %2924 }
 0x514   : > { %v2927_v21 = vpop.xlane.xlu0 %2926  ;;  %3184 = vst [vmem:[#allocation2 + $0x170] sm:$0xff] %v3120_v60  ;;  %v3043_v36 = vmul.f32 0.6931472, %v3913_v20  ;;  %3922 = vlog2.f32 %v2925_v4  ;;  %v6053_v60 = vld [vmem:[#allocation21_spill] sm:$0xff] }
 0x515   : > { %v3121_v49 = vsub.f32 %v5754_v1, %v3041_v42  ;;  %3924 = vlog2.f32 %v2927_v21  ;;  %v6054_v4 = vld [vmem:[#allocation5_spill] sm:$0xff] }
 0x516   : > { %v3915_v5 = vpop.eup %3914  ;;  %v3122_v11 = vsub.f32 %v5759_v15, %v3043_v36 }
 0x517   : > { %v3917_v26 = vpop.eup %3916  ;;  %3185 = vst [vmem:[#allocation2 + $0x178] sm:$0xff] %v3121_v49  ;;  %v3045_v10 = vmul.f32 0.6931472, %v3915_v5  ;;  %v2929_v35 = vpop.xlane.xlu1 %2928  ;;  %v6055_v49 = vld [vmem:[#allocation6_spill] sm:$0xff] }
 0x518   : > { %v2931_v62 = vpop.xlane.xlu0 %2930  ;;  %3186 = vst [vmem:[#allocation2 + $0x180] sm:$0xff] %v3122_v11  ;;  %v3047_v45 = vmul.f32 0.6931472, %v3917_v26  ;;  %3926 = vlog2.f32 %v2929_v35 }
 0x519   : > { %v3123_v53 = vsub.f32 %v5762_v48, %v3045_v10  ;;  %3928 = vlog2.f32 %v2931_v62 }
 0x51a   : > { %v3919_v34 = vpop.eup %3918  ;;  %v3124_v30 = vsub.f32 %v5767_v8, %v3047_v45 }
 0x51b   : > { %v3921_v17 = vpop.eup %3920  ;;  %3187 = vst [vmem:[#allocation2 + $0x188] sm:$0xff] %v3123_v53  ;;  %v3049_v1 = vmul.f32 0.6931472, %v3919_v34  ;;  %v2933_v50 = vpop.xlane.xlu1 %2932 }
 0x51c   : > { %v2935_v57 = vpop.xlane.xlu0 %2934  ;;  %3188 = vst [vmem:[#allocation2 + $0x190] sm:$0xff] %v3124_v30  ;;  %v3051_v15 = vmul.f32 0.6931472, %v3921_v17  ;;  %3930 = vlog2.f32 %v2933_v50 }
 0x51d   : > { %v3125_v23 = vsub.f32 %v5770_v38, %v3049_v1  ;;  %3932 = vlog2.f32 %v2935_v57 }
 0x51e   : > { %v3923_v6 = vpop.eup %3922  ;;  %v3126_v44 = vsub.f32 %v5775_v9, %v3051_v15 }
 0x51f   : > { %v3925_v43 = vpop.eup %3924  ;;  %3189 = vst [vmem:[#allocation2 + $0x198] sm:$0xff] %v3125_v23  ;;  %v3053_v48 = vmul.f32 0.6931472, %v3923_v6  ;;  %v2937_v31 = vpop.xlane.xlu1 %2936 }
 0x520   : > { %v2939_v41 = vpop.xlane.xlu0 %2938  ;;  %3190 = vst [vmem:[#allocation2 + $0x1a0] sm:$0xff] %v3126_v44  ;;  %v3055_v8 = vmul.f32 0.6931472, %v3925_v43  ;;  %3934 = vlog2.f32 %v2937_v31 }
 0x521   : > { %v3127_v54 = vsub.f32 %v5778_v12, %v3053_v48  ;;  %3936 = vlog2.f32 %v2939_v41 }
 0x522   : > { %v3927_v25 = vpop.eup %3926  ;;  %v3128_v0 = vsub.f32 %v6046_v32, %v3055_v8 }
 0x523   : > { %v3929_v46 = vpop.eup %3928  ;;  %3191 = vst [vmem:[#allocation2 + $0x1a8] sm:$0xff] %v3127_v54  ;;  %v3057_v38 = vmul.f32 0.6931472, %v3927_v25  ;;  %v2941_v7 = vpop.xlane.xlu1 %2940 }
 0x524   : > { %v2943_v16 = vpop.xlane.xlu0 %2942  ;;  %3192 = vst [vmem:[#allocation2 + $0x1b0] sm:$0xff] %v3128_v0  ;;  %v3059_v9 = vmul.f32 0.6931472, %v3929_v46  ;;  %3938 = vlog2.f32 %v2941_v7 }
 0x525   : > { %v3129_v24 = vsub.f32 %v6047_v19, %v3057_v38  ;;  %3940 = vlog2.f32 %v2943_v16 }
 0x526   : > { %v3931_v28 = vpop.eup %3930  ;;  %v3130_v55 = vsub.f32 %v6048_v52, %v3059_v9 }
 0x527   : > { %v3933_v18 = vpop.eup %3932  ;;  %3193 = vst [vmem:[#allocation2 + $0x1b8] sm:$0xff] %v3129_v24  ;;  %v3061_v12 = vmul.f32 0.6931472, %v3931_v28  ;;  %v2945_v39 = vpop.xlane.xlu1 %2944 }
 0x528   : > { %3194 = vst [vmem:[#allocation2 + $0x1c0] sm:$0xff] %v3130_v55  ;;  %v3063_v51 = vmul.f32 0.6931472, %v3933_v18  ;;  %3942 = vlog2.f32 %v2945_v39 }
 0x529   : > { %v3131_v40 = vsub.f32 %v6049_v58, %v3061_v12 }
 0x52a   : > { %v3935_v3 = vpop.eup %3934  ;;  %v3132_v33 = vsub.f32 %v6050_v13, %v3063_v51 }
 0x52b   : > { %v3937_v47 = vpop.eup %3936  ;;  %3195 = vst [vmem:[#allocation2 + $0x1c8] sm:$0xff] %v3131_v40  ;;  %v3065_v56 = vmul.f32 0.6931472, %v3935_v3 }
 0x52c   : > { %3196 = vst [vmem:[#allocation2 + $0x1d0] sm:$0xff] %v3132_v33  ;;  %v3067_v22 = vmul.f32 0.6931472, %v3937_v47 }
 0x52d   : > { %v3133_v59 = vsub.f32 %v6051_v29, %v3065_v56 }
 0x52e   : > { %v3939_v37 = vpop.eup %3938  ;;  %v3134_v2 = vsub.f32 %v6052_v63, %v3067_v22 }
 0x52f   : > { %v3941_v61 = vpop.eup %3940  ;;  %3197 = vst [vmem:[#allocation2 + $0x1d8] sm:$0xff] %v3133_v59  ;;  %v3069_v27 = vmul.f32 0.6931472, %v3939_v37 }
 0x530   : > { %3198 = vst [vmem:[#allocation2 + $0x1e0] sm:$0xff] %v3134_v2  ;;  %v3071_v14 = vmul.f32 0.6931472, %v3941_v61 }
 0x531   : > { %v3135_v20 = vsub.f32 %v6053_v60, %v3069_v27 }
 0x532   : > { %v3943_v42 = vpop.eup %3942  ;;  %v3136_v21 = vsub.f32 %v6054_v4, %v3071_v14 }
 0x533   : > { %3199 = vst [vmem:[#allocation2 + $0x1e8] sm:$0xff] %v3135_v20  ;;  %v3073_v36 = vmul.f32 0.6931472, %v3943_v42 }
 0x534   : > { %3200 = vst [vmem:[#allocation2 + $0x1f0] sm:$0xff] %v3136_v21 }
 0x535   : > { %v3137_v5 = vsub.f32 %v6055_v49, %v3073_v36 }
 0x537   : > { %3201 = vst [vmem:[#allocation2 + $0x1f8] sm:$0xff] %v3137_v5 }
 0x538 PF: > { %p3635_p5 = scmp.eq.s32.totalorder %s4041_s10, 1  ;;  %s3982_s22 = smov [#allocation2]  }
 0x539   : > { %s3208_s23 = sshll.u32 %s3982_s22, 4  ;;  %s3209_s23 = int_to_ptr.vmem [resolvable:$true] %s3208_s23 }
 0x53a   : > { %s3944_s24 = scalar_lea.vmem %s3209_s23, 8192  ;;  %p3951_p9 = scmp.lt.s32.totalorder %s3209_s23, %s3209_s23 }
 0x53b   : > { %p3945_p6 = scmp.ne.s32.totalorder %s3209_s23, %s3944_s24  ;;  %p3952_p10 = scmp.lt.s32.totalorder %s3944_s24, %s3944_s24 }
 0x53d   : > { %p3946_p7 = pnand %p3945_p6, %p3635_p5  ;;  %p3953_p11 = por %p3952_p10, %p3951_p9 }
 0x53f   : > { %p3947_p8 = pneg %p3946_p7 }
 0x541   : > { %p3954_p12 = pnand %p3953_p11, %p3947_p8 }
 0x543   : > { %3957 = shalt.err (!%p3954_p12)
}
 0x544   : > { %s3958_s27 = scalar_lea.hbm %s5921_s9, 8192 }
 0x545   : > { %p3959_p13 = scmp.ne.s32.totalorder %s5921_s9, %s3958_s27  ;;  %p3964_p2 = scmp.lt.u32.totalorder %s3958_s27, %s5921_s9 }
 0x547   : > { %p3960_p0 = pnand %p3959_p13, %p3635_p5 }
 0x549   : > { %p3961_p1 = pneg %p3960_p0 }
 0x54b   : > { %p3966_p3 = pnand %p3964_p2, %p3961_p1 }
 0x54d   : > { %3969 = shalt.err (!%p3966_p3)
}
 0x54e   : > { %s3983_s13 = smov 128   ;;  %s3984_s14 = smov 8  }
 0x54f   : > { %3632 = dma.vmem_to_hbm [thread:$0]  (%p3635_p5), %s3209_s23, 8192, %s5921_s9, [#allocation3], %s3983_s13, %s3983_s13, %s3984_s14  }
 0x550   : > { %3975 = dma.done.wait (%p3635_p5), [#allocation3], 8192  }
 0x551   : > { %3977 = vsyncadd (%p3635_p5), [#allocation3], 4294959104 }
 0x552 PF: > { %s20_s30 = sadd.s32 1, %s3980_s30  }
 0x553   : > { %p17_p4 = scmp.ge.s32.totalorder %s20_s30, 4  }
 0x555   :  { %19 = sbr.rel (!%p17_p4) target bundleno = 1 (0x1), region = 91 }
 0x55c   :  { %3224 = vsyncpa [#allocation3], 1 }
 0x55d   :  { %3226 = vsyncpa [#allocation3 + $0x1], 1 }

</bundles_post_ra>
